<compile_context>
chip_gen: v6e
topology: v6e:2x2x1
jax: 0.10.0
libtpu: 0.0.40
codegen_flags: <defaults>
</compile_context>

<pallas_src>
import functools

import numpy as np
import jax
import jax.numpy as jnp
from jax.experimental import pallas as pl
from jax.experimental.pallas import tpu as pltpu

EPS = 1e-5      # nn.BatchNorm2d default eps
KSIZE = 5       # conv kernel size
STRIDE = 2      # conv stride

_VMEM = pl.BlockSpec(memory_space=pltpu.MemorySpace.VMEM)


def _conv_out(s, k=KSIZE, st=STRIDE):
    return (s - (k - 1) - 1) // st + 1


# ----------------------------------------------------------------------------
# The single fused Pallas kernel
# ----------------------------------------------------------------------------
def _fused_forward_kernel(
    x_ref,                                   # (N*H, W*C) f32, rows=(n,h), lanes=(w,c)
    l1_ref, w1_ref, sh1_ref,                 # conv1: row-tap gathers / banded weights / BN shift
    l2_ref, w2_ref, sh2_ref,                 # conv2
    l3_ref, w3_ref, sh3_ref,                 # conv3 (output rows ordered (oi, n))
    wh1_ref, bh1_ref,                        # fused pi1/v1: per-oi weight blocks + bias
    wp2_ref, bp2_ref, wv2_ref, bv2_ref,      # pi2 / v2
    logits_ref, values_ref,                  # (N, a_dim) / (N, 1) f32
):
    """Whole Net forward; all operands VMEM-resident, no in-kernel relayouts."""

    def conv_bn_relu(a, l_ref, w_ref, sh_ref):
        # O[(n,oi),(p,oc)] = sum_ki (L_ki @ A) @ W_ki
        #   L_ki : 0/1 row-tap gather  (selects input row h = 2*oi + ki per batch)
        #   W_ki : banded (w,c)->(p,oc) weight, conv bias + BN scale folded in.
        acc = None
        for ki in range(KSIZE):
            # exact 0/1 gather; f32 accumulate then pack to bf16 (cheap, robust)
            r = jnp.dot(l_ref[ki], a,
                        preferred_element_type=jnp.float32).astype(jnp.bfloat16)
            o = jnp.dot(r, w_ref[ki], preferred_element_type=jnp.float32)
            acc = o if acc is None else acc + o
        # BN shift + ReLU + downcast in one epilogue.  Output layout is directly
        # the next conv's input layout: rows=(n, h'), lanes=(w', c').
        return jnp.maximum(acc + sh_ref[...], 0.0).astype(jnp.bfloat16)

    a0 = x_ref[...].astype(jnp.bfloat16)
    a1 = conv_bn_relu(a0, l1_ref, w1_ref, sh1_ref)     # (N*18, 18*16)
    a2 = conv_bn_relu(a1, l2_ref, w2_ref, sh2_ref)     # (N*7,  7*32)
    a3 = conv_bn_relu(a2, l3_ref, w3_ref, sh3_ref)     # (2*N,  2*32) rows=(oi,n)

    n = logits_ref.shape[0]
    oh3 = wh1_ref.shape[0]
    # Heads: pi1/v1 fused into one 256-wide matmul; the NCHW flatten permutation
    # is absorbed into the per-oi weight blocks -> accumulating dots, no concat.
    acc = None
    for oi in range(oh3):
        part = jnp.dot(a3[oi * n:(oi + 1) * n, :], wh1_ref[oi],
                       preferred_element_type=jnp.float32)
        acc = part if acc is None else acc + part
    h1 = jnp.tanh(acc + bh1_ref[...]).astype(jnp.bfloat16)        # (N, 256)

    nh = wp2_ref.shape[0]                                         # 128 (aligned slice)
    logits_ref[...] = (jnp.dot(h1[:, :nh], wp2_ref[...],
                               preferred_element_type=jnp.float32)
                       + bp2_ref[...])
    values_ref[...] = (jnp.dot(h1[:, nh:], wv2_ref[...],
                               preferred_element_type=jnp.float32)
                       + bv2_ref[...])


# ----------------------------------------------------------------------------
# Host-side constant construction (done once)
# ----------------------------------------------------------------------------
def _row_gather(n, h_in, oh, order="nh", k=KSIZE, stride=STRIDE):
    """L[ki, out_row, n*h_in + h] = 1 iff h == stride*oi + ki (per batch n).

    out_row = n*oh + oi  ('nh', conv1/conv2)  or  oi*n + n  ('hn', conv3)."""
    L = np.zeros((k, n * oh, n * h_in), np.float32)
    for ki in range(k):
        for oi in range(oh):
            h = stride * oi + ki
            for b in range(n):
                r = b * oh + oi if order == "nh" else oi * n + b
                L[ki, r, b * h_in + h] = 1.0
    return L


def _col_band_weight(w_scaled, w_in, ow, k=KSIZE, stride=STRIDE):
    """W[ki, w*C + c, p*OC + oc] = w_scaled[ki, w - stride*p, c, oc] (banded)."""
    _, _, c_in, oc = w_scaled.shape
    W = np.zeros((k, w_in * c_in, ow * oc), np.float32)
    for ki in range(k):
        for p in range(ow):
            for kj in range(k):
                w = stride * p + kj
                W[ki, w * c_in:(w + 1) * c_in, p * oc:(p + 1) * oc] = w_scaled[ki, kj]
    return W


def prepare_fused_params(params, *, h, w, n, a_dim):
    """Fold conv bias + BN into the weights and build the gather / banded /
    head matrices consumed by the fused kernel.  Pure host-side, done once."""
    f32, bf16 = np.float32, jnp.bfloat16

    heights, widths = [h], [w]
    for _ in range(3):
        heights.append(_conv_out(heights[-1]))
        widths.append(_conv_out(widths[-1]))

    prepared = {}
    ocs = []
    for i, (wk, bk, bnk) in enumerate(
            [("w1", "b1", "bn1"), ("w2", "b2", "bn2"), ("w3", "b3", "bn3")],
            start=1):
        wc = np.asarray(params[wk], f32)                     # (k,k,C,OC) HWIO
        bc = np.asarray(params[bk], f32)
        gamma, beta, mean, var = (np.asarray(t, f32) for t in params[bnk])
        scale = gamma / np.sqrt(var + EPS)
        shift = beta + (bc - mean) * scale                   # per-OC shift
        w_scaled = wc * scale                                # fold BN scale
        h_in, oh = heights[i - 1], heights[i]
        w_in, ow = widths[i - 1], widths[i]
        c_in, oc = wc.shape[2], wc.shape[3]
        ocs.append(oc)
        order = "hn" if i == 3 else "nh"     # conv3 rows = (oi, n) for the heads
        prepared[f"l{i}"] = jnp.asarray(_row_gather(n, h_in, oh, order=order), bf16)
        prepared[f"w{i}"] = jnp.asarray(_col_band_weight(w_scaled, w_in, ow), bf16)
        prepared[f"sh{i}"] = jnp.asarray(np.tile(shift, ow)[None, :], jnp.float32)

    # ---- heads -------------------------------------------------------------
    oh3, ow3, oc3 = heights[3], widths[3], ocs[2]
    wp1 = np.asarray(params["wp1"], f32)          # (F, 128), rows = NCHW flatten
    wv1 = np.asarray(params["wv1"], f32)          # (F, 128)
    w1cat = np.concatenate([wp1, wv1], axis=1)    # (F, 256)
    # kernel feature layout: per-oi block, lanes ordered (p, oc);
    # NCHW flatten index is  f = oc*(oh3*ow3) + oi*ow3 + p
    wh1 = np.zeros((oh3, ow3 * oc3, w1cat.shape[1]), f32)
    for oi in range(oh3):
        for p in range(ow3):
            for oc in range(oc3):
                wh1[oi, p * oc3 + oc, :] = w1cat[oc * (oh3 * ow3) + oi * ow3 + p, :]
    prepared["wh1"] = jnp.asarray(wh1, bf16)                         # (oh3, 64, 256)
    prepared["bh1"] = jnp.asarray(
        np.concatenate([np.asarray(params["bp1"], f32),
                        np.asarray(params["bv1"], f32)])[None, :], jnp.float32)

    prepared["wp2"] = jnp.asarray(np.asarray(params["wp2"], f32), bf16)   # (128, a_dim)
    prepared["bp2"] = jnp.asarray(np.asarray(params["bp2"], f32)[None, :], jnp.float32)
    prepared["wv2"] = jnp.asarray(np.asarray(params["wv2"], f32), bf16)   # (128, 1)
    prepared["bv2"] = jnp.asarray(np.asarray(params["bv2"], f32)[None, :], jnp.float32)
    return prepared


# ----------------------------------------------------------------------------
# Wrapper
# ----------------------------------------------------------------------------
@functools.partial(jax.jit, static_argnames=("a_dim",))
def net_forward(x_nhwc, prepared, *, a_dim):
    """x_nhwc: (N, H, W, 4) f32 -> (logits (N, a_dim), values (N, 1))."""
    n, h, w, c = x_nhwc.shape
    # NHWC is already rows=(n,h), lanes=(w,c): a pure reshape, no transpose/cast.
    x2d = x_nhwc.reshape(n * h, w * c)

    cost = pl.CostEstimate(flops=33_000_000, transcendentals=600,
                           bytes_accessed=1_500_000)
    logits, values = pl.pallas_call(
        _fused_forward_kernel,
        out_shape=(jax.ShapeDtypeStruct((n, a_dim), jnp.float32),
                   jax.ShapeDtypeStruct((n, 1), jnp.float32)),
        in_specs=[_VMEM] * 16,
        out_specs=(_VMEM, _VMEM),
        cost_estimate=cost,
    )(x2d,
      prepared["l1"], prepared["w1"], prepared["sh1"],
      prepared["l2"], prepared["w2"], prepared["sh2"],
      prepared["l3"], prepared["w3"], prepared["sh3"],
      prepared["wh1"], prepared["bh1"],
      prepared["wp2"], prepared["bp2"], prepared["wv2"], prepared["bv2"])
    return logits, values


# ----------------------------------------------------------------------------
# Pure-JAX f32 reference (for the correctness check)
# ----------------------------------------------------------------------------
def reference_forward(x, params):
    def conv_bn_relu(x, w, b, bn):
        gamma, beta, mean, var = bn
        y = jax.lax.conv_general_dilated(
            x, w, (STRIDE, STRIDE), "VALID",
            dimension_numbers=("NHWC", "HWIO", "NHWC")) + b
        scale = gamma / jnp.sqrt(var + EPS)
        return jnp.maximum((y - mean) * scale + beta, 0.0)

    x = conv_bn_relu(x, params["w1"], params["b1"], params["bn1"])
    x = conv_bn_relu(x, params["w2"], params["b2"], params["bn2"])
    x = conv_bn_relu(x, params["w3"], params["b3"], params["bn3"])
    n = x.shape[0]
    feat = jnp.transpose(x, (0, 3, 1, 2)).reshape(n, -1)      # NCHW flatten
    pi1 = jnp.tanh(feat @ params["wp1"] + params["bp1"])
    logits = pi1 @ params["wp2"] + params["bp2"]
    v1 = jnp.tanh(feat @ params["wv1"] + params["bv1"])
    values = v1 @ params["wv2"] + params["bv2"]
    return logits, values


# ----------------------------------------------------------------------------
# Deterministic synthetic parameters (PyTorch-equivalent layout)
# ----------------------------------------------------------------------------
def init_params(key, *, h, w, a_dim):
    convw = _conv_out(_conv_out(_conv_out(w)))
    convh = _conv_out(_conv_out(_conv_out(h)))
    linear_input_size = convw * convh * 32

    ks = jax.random.split(key, 16)
    nrm = lambda k, shape, s=0.05: s * jax.random.normal(k, shape, jnp.float32)

    def bn(k, c):
        k1, k2, k3, k4 = jax.random.split(k, 4)
        gamma = 1.0 + 0.1 * jax.random.normal(k1, (c,), jnp.float32)
        beta = 0.1 * jax.random.normal(k2, (c,), jnp.float32)
        mean = 0.05 * jax.random.normal(k3, (c,), jnp.float32)
        var = 1.0 + 0.1 * jnp.abs(jax.random.normal(k4, (c,), jnp.float32))
        return (gamma, beta, mean, var)

    return {
        # conv weights in (kh, kw, in_c, out_c) layout
        "w1": nrm(ks[0], (5, 5, 4, 16)), "b1": nrm(ks[1], (16,)),
        "bn1": bn(ks[2], 16),
        "w2": nrm(ks[3], (5, 5, 16, 32)), "b2": nrm(ks[4], (32,)),
        "bn2": bn(ks[5], 32),
        "w3": nrm(ks[6], (5, 5, 32, 32)), "b3": nrm(ks[7], (32,)),
        "bn3": bn(ks[8], 32),
        # heads: Linear weights stored as (in, out)
        "wp1": nrm(ks[9], (linear_input_size, 128)), "bp1": nrm(ks[10], (128,)),
        "wp2": nrm(ks[11], (128, a_dim)), "bp2": nrm(ks[12], (a_dim,)),
        "wv1": nrm(ks[13], (linear_input_size, 128)), "bv1": nrm(ks[14], (128,)),
        "wv2": nrm(ks[15], (128, 1)),
        "bv2": jnp.zeros((1,), jnp.float32),
    }


if __name__ == "__main__":
    # N=2, 40x40 screen, 4 channels, a_dim=6.  40 -> 18 -> 7 -> 2 spatially,
    # so linear_input_size = 2*2*32 = 128.
    N, H, W, C = 2, 40, 40, 4
    A_DIM = 6

    key = jax.random.PRNGKey(0)
    kx, kp = jax.random.split(key)
    x = jax.random.normal(kx, (N, H, W, C), jnp.float32)
    params = init_params(kp, h=H, w=W, a_dim=A_DIM)
    prepared = prepare_fused_params(params, h=H, w=W, n=N, a_dim=A_DIM)

    logits, values = net_forward(x, prepared, a_dim=A_DIM)
    jax.block_until_ready((logits, values))

    # correctness check against the pure-JAX f32 reference (loose tolerance
    # because the kernel uses bf16 matmul operands with f32 accumulation)
    ref_logits, ref_values = reference_forward(x, params)
    np.testing.assert_allclose(np.asarray(logits), np.asarray(ref_logits),
                               rtol=1e-1, atol=1e-2)
    np.testing.assert_allclose(np.asarray(values), np.asarray(ref_values),
                               rtol=1e-1, atol=1e-2)

    assert logits.shape == (N, A_DIM) and values.shape == (N, 1)
    assert jnp.all(jnp.isfinite(logits)) and jnp.all(jnp.isfinite(values))
    print("KERNEL_OK")
</pallas_src>

<mosaic_0001>
module attributes {stable_mosaic.version = 11 : i64} {
  func.func @_fused_forward_kernel(%arg0: memref<80x160xf32, #tpu.memory_space<vmem>>, %arg1: memref<5x36x80xbf16, #tpu.memory_space<vmem>>, %arg2: memref<5x160x288xbf16, #tpu.memory_space<vmem>>, %arg3: memref<1x288xf32, #tpu.memory_space<vmem>>, %arg4: memref<5x14x36xbf16, #tpu.memory_space<vmem>>, %arg5: memref<5x288x224xbf16, #tpu.memory_space<vmem>>, %arg6: memref<1x224xf32, #tpu.memory_space<vmem>>, %arg7: memref<5x4x14xbf16, #tpu.memory_space<vmem>>, %arg8: memref<5x224x64xbf16, #tpu.memory_space<vmem>>, %arg9: memref<1x64xf32, #tpu.memory_space<vmem>>, %arg10: memref<2x64x256xbf16, #tpu.memory_space<vmem>>, %arg11: memref<1x256xf32, #tpu.memory_space<vmem>>, %arg12: memref<128x6xbf16, #tpu.memory_space<vmem>>, %arg13: memref<1x6xf32, #tpu.memory_space<vmem>>, %arg14: memref<128x1xbf16, #tpu.memory_space<vmem>>, %arg15: memref<1x1xf32, #tpu.memory_space<vmem>>, %arg16: memref<2x6xf32, #tpu.memory_space<vmem>>, %arg17: memref<2x1xf32, #tpu.memory_space<vmem>>) attributes {dimension_semantics = [], scalar_prefetch = 0 : i64, scratch_operands = 0 : i64, tpu.core_type = #tpu.core_type<tc>} {
    %c0 = arith.constant 0 : index
    %c0_0 = arith.constant 0 : index
    %0 = vector.load %arg0[%c0, %c0_0] : memref<80x160xf32, #tpu.memory_space<vmem>>, vector<80x160xf32>
    %1 = arith.truncf %0 : vector<80x160xf32> to vector<80x160xbf16>
    %c0_1 = arith.constant 0 : index
    %c0_2 = arith.constant 0 : index
    %c0_3 = arith.constant 0 : index
    %2 = vector.load %arg1[%c0_1, %c0_2, %c0_3] : memref<5x36x80xbf16, #tpu.memory_space<vmem>>, vector<1x36x80xbf16>
    %3 = vector.shape_cast %2 : vector<1x36x80xbf16> to vector<36x80xbf16>
    %cst = arith.constant dense<0.000000e+00> : vector<36x160xf32>
    %4 = tpu.matmul %3, %1, %cst {dimension_numbers = #tpu.dot_dimension_numbers<[1], [0], [0], [1], [0, 0, 1, 1], [], []>} : vector<36x80xbf16>, vector<80x160xbf16>, vector<36x160xf32> -> vector<36x160xf32>
    %5 = arith.truncf %4 : vector<36x160xf32> to vector<36x160xbf16>
    %c0_4 = arith.constant 0 : index
    %c0_5 = arith.constant 0 : index
    %c0_6 = arith.constant 0 : index
    %6 = vector.load %arg2[%c0_4, %c0_5, %c0_6] : memref<5x160x288xbf16, #tpu.memory_space<vmem>>, vector<1x160x288xbf16>
    %7 = vector.shape_cast %6 : vector<1x160x288xbf16> to vector<160x288xbf16>
    %cst_7 = arith.constant dense<0.000000e+00> : vector<36x288xf32>
    %8 = tpu.matmul %5, %7, %cst_7 {dimension_numbers = #tpu.dot_dimension_numbers<[1], [0], [0], [1], [0, 0, 1, 1], [], []>} : vector<36x160xbf16>, vector<160x288xbf16>, vector<36x288xf32> -> vector<36x288xf32>
    %c1 = arith.constant 1 : index
    %c0_8 = arith.constant 0 : index
    %c0_9 = arith.constant 0 : index
    %9 = vector.load %arg1[%c1, %c0_8, %c0_9] : memref<5x36x80xbf16, #tpu.memory_space<vmem>>, vector<1x36x80xbf16>
    %10 = vector.shape_cast %9 : vector<1x36x80xbf16> to vector<36x80xbf16>
    %cst_10 = arith.constant dense<0.000000e+00> : vector<36x160xf32>
    %11 = tpu.matmul %10, %1, %cst_10 {dimension_numbers = #tpu.dot_dimension_numbers<[1], [0], [0], [1], [0, 0, 1, 1], [], []>} : vector<36x80xbf16>, vector<80x160xbf16>, vector<36x160xf32> -> vector<36x160xf32>
    %12 = arith.truncf %11 : vector<36x160xf32> to vector<36x160xbf16>
    %c1_11 = arith.constant 1 : index
    %c0_12 = arith.constant 0 : index
    %c0_13 = arith.constant 0 : index
    %13 = vector.load %arg2[%c1_11, %c0_12, %c0_13] : memref<5x160x288xbf16, #tpu.memory_space<vmem>>, vector<1x160x288xbf16>
    %14 = vector.shape_cast %13 : vector<1x160x288xbf16> to vector<160x288xbf16>
    %cst_14 = arith.constant dense<0.000000e+00> : vector<36x288xf32>
    %15 = tpu.matmul %12, %14, %cst_14 {dimension_numbers = #tpu.dot_dimension_numbers<[1], [0], [0], [1], [0, 0, 1, 1], [], []>} : vector<36x160xbf16>, vector<160x288xbf16>, vector<36x288xf32> -> vector<36x288xf32>
    %16 = arith.addf %8, %15 : vector<36x288xf32>
    %c2 = arith.constant 2 : index
    %c0_15 = arith.constant 0 : index
    %c0_16 = arith.constant 0 : index
    %17 = vector.load %arg1[%c2, %c0_15, %c0_16] : memref<5x36x80xbf16, #tpu.memory_space<vmem>>, vector<1x36x80xbf16>
    %18 = vector.shape_cast %17 : vector<1x36x80xbf16> to vector<36x80xbf16>
    %cst_17 = arith.constant dense<0.000000e+00> : vector<36x160xf32>
    %19 = tpu.matmul %18, %1, %cst_17 {dimension_numbers = #tpu.dot_dimension_numbers<[1], [0], [0], [1], [0, 0, 1, 1], [], []>} : vector<36x80xbf16>, vector<80x160xbf16>, vector<36x160xf32> -> vector<36x160xf32>
    %20 = arith.truncf %19 : vector<36x160xf32> to vector<36x160xbf16>
    %c2_18 = arith.constant 2 : index
    %c0_19 = arith.constant 0 : index
    %c0_20 = arith.constant 0 : index
    %21 = vector.load %arg2[%c2_18, %c0_19, %c0_20] : memref<5x160x288xbf16, #tpu.memory_space<vmem>>, vector<1x160x288xbf16>
    %22 = vector.shape_cast %21 : vector<1x160x288xbf16> to vector<160x288xbf16>
    %cst_21 = arith.constant dense<0.000000e+00> : vector<36x288xf32>
    %23 = tpu.matmul %20, %22, %cst_21 {dimension_numbers = #tpu.dot_dimension_numbers<[1], [0], [0], [1], [0, 0, 1, 1], [], []>} : vector<36x160xbf16>, vector<160x288xbf16>, vector<36x288xf32> -> vector<36x288xf32>
    %24 = arith.addf %16, %23 : vector<36x288xf32>
    %c3 = arith.constant 3 : index
    %c0_22 = arith.constant 0 : index
    %c0_23 = arith.constant 0 : index
    %25 = vector.load %arg1[%c3, %c0_22, %c0_23] : memref<5x36x80xbf16, #tpu.memory_space<vmem>>, vector<1x36x80xbf16>
    %26 = vector.shape_cast %25 : vector<1x36x80xbf16> to vector<36x80xbf16>
    %cst_24 = arith.constant dense<0.000000e+00> : vector<36x160xf32>
    %27 = tpu.matmul %26, %1, %cst_24 {dimension_numbers = #tpu.dot_dimension_numbers<[1], [0], [0], [1], [0, 0, 1, 1], [], []>} : vector<36x80xbf16>, vector<80x160xbf16>, vector<36x160xf32> -> vector<36x160xf32>
    %28 = arith.truncf %27 : vector<36x160xf32> to vector<36x160xbf16>
    %c3_25 = arith.constant 3 : index
    %c0_26 = arith.constant 0 : index
    %c0_27 = arith.constant 0 : index
    %29 = vector.load %arg2[%c3_25, %c0_26, %c0_27] : memref<5x160x288xbf16, #tpu.memory_space<vmem>>, vector<1x160x288xbf16>
    %30 = vector.shape_cast %29 : vector<1x160x288xbf16> to vector<160x288xbf16>
    %cst_28 = arith.constant dense<0.000000e+00> : vector<36x288xf32>
    %31 = tpu.matmul %28, %30, %cst_28 {dimension_numbers = #tpu.dot_dimension_numbers<[1], [0], [0], [1], [0, 0, 1, 1], [], []>} : vector<36x160xbf16>, vector<160x288xbf16>, vector<36x288xf32> -> vector<36x288xf32>
    %32 = arith.addf %24, %31 : vector<36x288xf32>
    %c4 = arith.constant 4 : index
    %c0_29 = arith.constant 0 : index
    %c0_30 = arith.constant 0 : index
    %33 = vector.load %arg1[%c4, %c0_29, %c0_30] : memref<5x36x80xbf16, #tpu.memory_space<vmem>>, vector<1x36x80xbf16>
    %34 = vector.shape_cast %33 : vector<1x36x80xbf16> to vector<36x80xbf16>
    %cst_31 = arith.constant dense<0.000000e+00> : vector<36x160xf32>
    %35 = tpu.matmul %34, %1, %cst_31 {dimension_numbers = #tpu.dot_dimension_numbers<[1], [0], [0], [1], [0, 0, 1, 1], [], []>} : vector<36x80xbf16>, vector<80x160xbf16>, vector<36x160xf32> -> vector<36x160xf32>
    %36 = arith.truncf %35 : vector<36x160xf32> to vector<36x160xbf16>
    %c4_32 = arith.constant 4 : index
    %c0_33 = arith.constant 0 : index
    %c0_34 = arith.constant 0 : index
    %37 = vector.load %arg2[%c4_32, %c0_33, %c0_34] : memref<5x160x288xbf16, #tpu.memory_space<vmem>>, vector<1x160x288xbf16>
    %38 = vector.shape_cast %37 : vector<1x160x288xbf16> to vector<160x288xbf16>
    %cst_35 = arith.constant dense<0.000000e+00> : vector<36x288xf32>
    %39 = tpu.matmul %36, %38, %cst_35 {dimension_numbers = #tpu.dot_dimension_numbers<[1], [0], [0], [1], [0, 0, 1, 1], [], []>} : vector<36x160xbf16>, vector<160x288xbf16>, vector<36x288xf32> -> vector<36x288xf32>
    %40 = arith.addf %32, %39 : vector<36x288xf32>
    %c0_36 = arith.constant 0 : index
    %c0_37 = arith.constant 0 : index
    %41 = vector.load %arg3[%c0_36, %c0_37] : memref<1x288xf32, #tpu.memory_space<vmem>>, vector<1x288xf32>
    %42 = vector.broadcast %41 : vector<1x288xf32> to vector<36x288xf32>
    %43 = arith.addf %40, %42 : vector<36x288xf32>
    %cst_38 = arith.constant 0.000000e+00 : f32
    %44 = vector.broadcast %cst_38 : f32 to vector<36x288xf32>
    %45 = arith.maximumf %43, %44 : vector<36x288xf32>
    %46 = arith.truncf %45 : vector<36x288xf32> to vector<36x288xbf16>
    %c0_39 = arith.constant 0 : index
    %c0_40 = arith.constant 0 : index
    %c0_41 = arith.constant 0 : index
    %47 = vector.load %arg4[%c0_39, %c0_40, %c0_41] : memref<5x14x36xbf16, #tpu.memory_space<vmem>>, vector<1x14x36xbf16>
    %48 = vector.shape_cast %47 : vector<1x14x36xbf16> to vector<14x36xbf16>
    %cst_42 = arith.constant dense<0.000000e+00> : vector<14x288xf32>
    %49 = tpu.matmul %48, %46, %cst_42 {dimension_numbers = #tpu.dot_dimension_numbers<[1], [0], [0], [1], [0, 0, 1, 1], [], []>} : vector<14x36xbf16>, vector<36x288xbf16>, vector<14x288xf32> -> vector<14x288xf32>
    %50 = arith.truncf %49 : vector<14x288xf32> to vector<14x288xbf16>
    %c0_43 = arith.constant 0 : index
    %c0_44 = arith.constant 0 : index
    %c0_45 = arith.constant 0 : index
    %51 = vector.load %arg5[%c0_43, %c0_44, %c0_45] : memref<5x288x224xbf16, #tpu.memory_space<vmem>>, vector<1x288x224xbf16>
    %52 = vector.shape_cast %51 : vector<1x288x224xbf16> to vector<288x224xbf16>
    %cst_46 = arith.constant dense<0.000000e+00> : vector<14x224xf32>
    %53 = tpu.matmul %50, %52, %cst_46 {dimension_numbers = #tpu.dot_dimension_numbers<[1], [0], [0], [1], [0, 0, 1, 1], [], []>} : vector<14x288xbf16>, vector<288x224xbf16>, vector<14x224xf32> -> vector<14x224xf32>
    %c1_47 = arith.constant 1 : index
    %c0_48 = arith.constant 0 : index
    %c0_49 = arith.constant 0 : index
    %54 = vector.load %arg4[%c1_47, %c0_48, %c0_49] : memref<5x14x36xbf16, #tpu.memory_space<vmem>>, vector<1x14x36xbf16>
    %55 = vector.shape_cast %54 : vector<1x14x36xbf16> to vector<14x36xbf16>
    %cst_50 = arith.constant dense<0.000000e+00> : vector<14x288xf32>
    %56 = tpu.matmul %55, %46, %cst_50 {dimension_numbers = #tpu.dot_dimension_numbers<[1], [0], [0], [1], [0, 0, 1, 1], [], []>} : vector<14x36xbf16>, vector<36x288xbf16>, vector<14x288xf32> -> vector<14x288xf32>
    %57 = arith.truncf %56 : vector<14x288xf32> to vector<14x288xbf16>
    %c1_51 = arith.constant 1 : index
    %c0_52 = arith.constant 0 : index
    %c0_53 = arith.constant 0 : index
    %58 = vector.load %arg5[%c1_51, %c0_52, %c0_53] : memref<5x288x224xbf16, #tpu.memory_space<vmem>>, vector<1x288x224xbf16>
    %59 = vector.shape_cast %58 : vector<1x288x224xbf16> to vector<288x224xbf16>
    %cst_54 = arith.constant dense<0.000000e+00> : vector<14x224xf32>
    %60 = tpu.matmul %57, %59, %cst_54 {dimension_numbers = #tpu.dot_dimension_numbers<[1], [0], [0], [1], [0, 0, 1, 1], [], []>} : vector<14x288xbf16>, vector<288x224xbf16>, vector<14x224xf32> -> vector<14x224xf32>
    %61 = arith.addf %53, %60 : vector<14x224xf32>
    %c2_55 = arith.constant 2 : index
    %c0_56 = arith.constant 0 : index
    %c0_57 = arith.constant 0 : index
    %62 = vector.load %arg4[%c2_55, %c0_56, %c0_57] : memref<5x14x36xbf16, #tpu.memory_space<vmem>>, vector<1x14x36xbf16>
    %63 = vector.shape_cast %62 : vector<1x14x36xbf16> to vector<14x36xbf16>
    %cst_58 = arith.constant dense<0.000000e+00> : vector<14x288xf32>
    %64 = tpu.matmul %63, %46, %cst_58 {dimension_numbers = #tpu.dot_dimension_numbers<[1], [0], [0], [1], [0, 0, 1, 1], [], []>} : vector<14x36xbf16>, vector<36x288xbf16>, vector<14x288xf32> -> vector<14x288xf32>
    %65 = arith.truncf %64 : vector<14x288xf32> to vector<14x288xbf16>
    %c2_59 = arith.constant 2 : index
    %c0_60 = arith.constant 0 : index
    %c0_61 = arith.constant 0 : index
    %66 = vector.load %arg5[%c2_59, %c0_60, %c0_61] : memref<5x288x224xbf16, #tpu.memory_space<vmem>>, vector<1x288x224xbf16>
    %67 = vector.shape_cast %66 : vector<1x288x224xbf16> to vector<288x224xbf16>
    %cst_62 = arith.constant dense<0.000000e+00> : vector<14x224xf32>
    %68 = tpu.matmul %65, %67, %cst_62 {dimension_numbers = #tpu.dot_dimension_numbers<[1], [0], [0], [1], [0, 0, 1, 1], [], []>} : vector<14x288xbf16>, vector<288x224xbf16>, vector<14x224xf32> -> vector<14x224xf32>
    %69 = arith.addf %61, %68 : vector<14x224xf32>
    %c3_63 = arith.constant 3 : index
    %c0_64 = arith.constant 0 : index
    %c0_65 = arith.constant 0 : index
    %70 = vector.load %arg4[%c3_63, %c0_64, %c0_65] : memref<5x14x36xbf16, #tpu.memory_space<vmem>>, vector<1x14x36xbf16>
    %71 = vector.shape_cast %70 : vector<1x14x36xbf16> to vector<14x36xbf16>
    %cst_66 = arith.constant dense<0.000000e+00> : vector<14x288xf32>
    %72 = tpu.matmul %71, %46, %cst_66 {dimension_numbers = #tpu.dot_dimension_numbers<[1], [0], [0], [1], [0, 0, 1, 1], [], []>} : vector<14x36xbf16>, vector<36x288xbf16>, vector<14x288xf32> -> vector<14x288xf32>
    %73 = arith.truncf %72 : vector<14x288xf32> to vector<14x288xbf16>
    %c3_67 = arith.constant 3 : index
    %c0_68 = arith.constant 0 : index
    %c0_69 = arith.constant 0 : index
    %74 = vector.load %arg5[%c3_67, %c0_68, %c0_69] : memref<5x288x224xbf16, #tpu.memory_space<vmem>>, vector<1x288x224xbf16>
    %75 = vector.shape_cast %74 : vector<1x288x224xbf16> to vector<288x224xbf16>
    %cst_70 = arith.constant dense<0.000000e+00> : vector<14x224xf32>
    %76 = tpu.matmul %73, %75, %cst_70 {dimension_numbers = #tpu.dot_dimension_numbers<[1], [0], [0], [1], [0, 0, 1, 1], [], []>} : vector<14x288xbf16>, vector<288x224xbf16>, vector<14x224xf32> -> vector<14x224xf32>
    %77 = arith.addf %69, %76 : vector<14x224xf32>
    %c4_71 = arith.constant 4 : index
    %c0_72 = arith.constant 0 : index
    %c0_73 = arith.constant 0 : index
    %78 = vector.load %arg4[%c4_71, %c0_72, %c0_73] : memref<5x14x36xbf16, #tpu.memory_space<vmem>>, vector<1x14x36xbf16>
    %79 = vector.shape_cast %78 : vector<1x14x36xbf16> to vector<14x36xbf16>
    %cst_74 = arith.constant dense<0.000000e+00> : vector<14x288xf32>
    %80 = tpu.matmul %79, %46, %cst_74 {dimension_numbers = #tpu.dot_dimension_numbers<[1], [0], [0], [1], [0, 0, 1, 1], [], []>} : vector<14x36xbf16>, vector<36x288xbf16>, vector<14x288xf32> -> vector<14x288xf32>
    %81 = arith.truncf %80 : vector<14x288xf32> to vector<14x288xbf16>
    %c4_75 = arith.constant 4 : index
    %c0_76 = arith.constant 0 : index
    %c0_77 = arith.constant 0 : index
    %82 = vector.load %arg5[%c4_75, %c0_76, %c0_77] : memref<5x288x224xbf16, #tpu.memory_space<vmem>>, vector<1x288x224xbf16>
    %83 = vector.shape_cast %82 : vector<1x288x224xbf16> to vector<288x224xbf16>
    %cst_78 = arith.constant dense<0.000000e+00> : vector<14x224xf32>
    %84 = tpu.matmul %81, %83, %cst_78 {dimension_numbers = #tpu.dot_dimension_numbers<[1], [0], [0], [1], [0, 0, 1, 1], [], []>} : vector<14x288xbf16>, vector<288x224xbf16>, vector<14x224xf32> -> vector<14x224xf32>
    %85 = arith.addf %77, %84 : vector<14x224xf32>
    %c0_79 = arith.constant 0 : index
    %c0_80 = arith.constant 0 : index
    %86 = vector.load %arg6[%c0_79, %c0_80] : memref<1x224xf32, #tpu.memory_space<vmem>>, vector<1x224xf32>
    %87 = vector.broadcast %86 : vector<1x224xf32> to vector<14x224xf32>
    %88 = arith.addf %85, %87 : vector<14x224xf32>
    %cst_81 = arith.constant 0.000000e+00 : f32
    %89 = vector.broadcast %cst_81 : f32 to vector<14x224xf32>
    %90 = arith.maximumf %88, %89 : vector<14x224xf32>
    %91 = arith.truncf %90 : vector<14x224xf32> to vector<14x224xbf16>
    %c0_82 = arith.constant 0 : index
    %c0_83 = arith.constant 0 : index
    %c0_84 = arith.constant 0 : index
    %92 = vector.load %arg7[%c0_82, %c0_83, %c0_84] : memref<5x4x14xbf16, #tpu.memory_space<vmem>>, vector<1x4x14xbf16>
    %93 = vector.shape_cast %92 : vector<1x4x14xbf16> to vector<4x14xbf16>
    %cst_85 = arith.constant dense<0.000000e+00> : vector<4x224xf32>
    %94 = tpu.matmul %93, %91, %cst_85 {dimension_numbers = #tpu.dot_dimension_numbers<[1], [0], [0], [1], [0, 0, 1, 1], [], []>} : vector<4x14xbf16>, vector<14x224xbf16>, vector<4x224xf32> -> vector<4x224xf32>
    %95 = arith.truncf %94 : vector<4x224xf32> to vector<4x224xbf16>
    %c0_86 = arith.constant 0 : index
    %c0_87 = arith.constant 0 : index
    %c0_88 = arith.constant 0 : index
    %96 = vector.load %arg8[%c0_86, %c0_87, %c0_88] : memref<5x224x64xbf16, #tpu.memory_space<vmem>>, vector<1x224x64xbf16>
    %97 = vector.shape_cast %96 : vector<1x224x64xbf16> to vector<224x64xbf16>
    %cst_89 = arith.constant dense<0.000000e+00> : vector<4x64xf32>
    %98 = tpu.matmul %95, %97, %cst_89 {dimension_numbers = #tpu.dot_dimension_numbers<[1], [0], [0], [1], [0, 0, 1, 1], [], []>} : vector<4x224xbf16>, vector<224x64xbf16>, vector<4x64xf32> -> vector<4x64xf32>
    %c1_90 = arith.constant 1 : index
    %c0_91 = arith.constant 0 : index
    %c0_92 = arith.constant 0 : index
    %99 = vector.load %arg7[%c1_90, %c0_91, %c0_92] : memref<5x4x14xbf16, #tpu.memory_space<vmem>>, vector<1x4x14xbf16>
    %100 = vector.shape_cast %99 : vector<1x4x14xbf16> to vector<4x14xbf16>
    %cst_93 = arith.constant dense<0.000000e+00> : vector<4x224xf32>
    %101 = tpu.matmul %100, %91, %cst_93 {dimension_numbers = #tpu.dot_dimension_numbers<[1], [0], [0], [1], [0, 0, 1, 1], [], []>} : vector<4x14xbf16>, vector<14x224xbf16>, vector<4x224xf32> -> vector<4x224xf32>
    %102 = arith.truncf %101 : vector<4x224xf32> to vector<4x224xbf16>
    %c1_94 = arith.constant 1 : index
    %c0_95 = arith.constant 0 : index
    %c0_96 = arith.constant 0 : index
    %103 = vector.load %arg8[%c1_94, %c0_95, %c0_96] : memref<5x224x64xbf16, #tpu.memory_space<vmem>>, vector<1x224x64xbf16>
    %104 = vector.shape_cast %103 : vector<1x224x64xbf16> to vector<224x64xbf16>
    %cst_97 = arith.constant dense<0.000000e+00> : vector<4x64xf32>
    %105 = tpu.matmul %102, %104, %cst_97 {dimension_numbers = #tpu.dot_dimension_numbers<[1], [0], [0], [1], [0, 0, 1, 1], [], []>} : vector<4x224xbf16>, vector<224x64xbf16>, vector<4x64xf32> -> vector<4x64xf32>
    %106 = arith.addf %98, %105 : vector<4x64xf32>
    %c2_98 = arith.constant 2 : index
    %c0_99 = arith.constant 0 : index
    %c0_100 = arith.constant 0 : index
    %107 = vector.load %arg7[%c2_98, %c0_99, %c0_100] : memref<5x4x14xbf16, #tpu.memory_space<vmem>>, vector<1x4x14xbf16>
    %108 = vector.shape_cast %107 : vector<1x4x14xbf16> to vector<4x14xbf16>
    %cst_101 = arith.constant dense<0.000000e+00> : vector<4x224xf32>
    %109 = tpu.matmul %108, %91, %cst_101 {dimension_numbers = #tpu.dot_dimension_numbers<[1], [0], [0], [1], [0, 0, 1, 1], [], []>} : vector<4x14xbf16>, vector<14x224xbf16>, vector<4x224xf32> -> vector<4x224xf32>
    %110 = arith.truncf %109 : vector<4x224xf32> to vector<4x224xbf16>
    %c2_102 = arith.constant 2 : index
    %c0_103 = arith.constant 0 : index
    %c0_104 = arith.constant 0 : index
    %111 = vector.load %arg8[%c2_102, %c0_103, %c0_104] : memref<5x224x64xbf16, #tpu.memory_space<vmem>>, vector<1x224x64xbf16>
    %112 = vector.shape_cast %111 : vector<1x224x64xbf16> to vector<224x64xbf16>
    %cst_105 = arith.constant dense<0.000000e+00> : vector<4x64xf32>
    %113 = tpu.matmul %110, %112, %cst_105 {dimension_numbers = #tpu.dot_dimension_numbers<[1], [0], [0], [1], [0, 0, 1, 1], [], []>} : vector<4x224xbf16>, vector<224x64xbf16>, vector<4x64xf32> -> vector<4x64xf32>
    %114 = arith.addf %106, %113 : vector<4x64xf32>
    %c3_106 = arith.constant 3 : index
    %c0_107 = arith.constant 0 : index
    %c0_108 = arith.constant 0 : index
    %115 = vector.load %arg7[%c3_106, %c0_107, %c0_108] : memref<5x4x14xbf16, #tpu.memory_space<vmem>>, vector<1x4x14xbf16>
    %116 = vector.shape_cast %115 : vector<1x4x14xbf16> to vector<4x14xbf16>
    %cst_109 = arith.constant dense<0.000000e+00> : vector<4x224xf32>
    %117 = tpu.matmul %116, %91, %cst_109 {dimension_numbers = #tpu.dot_dimension_numbers<[1], [0], [0], [1], [0, 0, 1, 1], [], []>} : vector<4x14xbf16>, vector<14x224xbf16>, vector<4x224xf32> -> vector<4x224xf32>
    %118 = arith.truncf %117 : vector<4x224xf32> to vector<4x224xbf16>
    %c3_110 = arith.constant 3 : index
    %c0_111 = arith.constant 0 : index
    %c0_112 = arith.constant 0 : index
    %119 = vector.load %arg8[%c3_110, %c0_111, %c0_112] : memref<5x224x64xbf16, #tpu.memory_space<vmem>>, vector<1x224x64xbf16>
    %120 = vector.shape_cast %119 : vector<1x224x64xbf16> to vector<224x64xbf16>
    %cst_113 = arith.constant dense<0.000000e+00> : vector<4x64xf32>
    %121 = tpu.matmul %118, %120, %cst_113 {dimension_numbers = #tpu.dot_dimension_numbers<[1], [0], [0], [1], [0, 0, 1, 1], [], []>} : vector<4x224xbf16>, vector<224x64xbf16>, vector<4x64xf32> -> vector<4x64xf32>
    %122 = arith.addf %114, %121 : vector<4x64xf32>
    %c4_114 = arith.constant 4 : index
    %c0_115 = arith.constant 0 : index
    %c0_116 = arith.constant 0 : index
    %123 = vector.load %arg7[%c4_114, %c0_115, %c0_116] : memref<5x4x14xbf16, #tpu.memory_space<vmem>>, vector<1x4x14xbf16>
    %124 = vector.shape_cast %123 : vector<1x4x14xbf16> to vector<4x14xbf16>
    %cst_117 = arith.constant dense<0.000000e+00> : vector<4x224xf32>
    %125 = tpu.matmul %124, %91, %cst_117 {dimension_numbers = #tpu.dot_dimension_numbers<[1], [0], [0], [1], [0, 0, 1, 1], [], []>} : vector<4x14xbf16>, vector<14x224xbf16>, vector<4x224xf32> -> vector<4x224xf32>
    %126 = arith.truncf %125 : vector<4x224xf32> to vector<4x224xbf16>
    %c4_118 = arith.constant 4 : index
    %c0_119 = arith.constant 0 : index
    %c0_120 = arith.constant 0 : index
    %127 = vector.load %arg8[%c4_118, %c0_119, %c0_120] : memref<5x224x64xbf16, #tpu.memory_space<vmem>>, vector<1x224x64xbf16>
    %128 = vector.shape_cast %127 : vector<1x224x64xbf16> to vector<224x64xbf16>
    %cst_121 = arith.constant dense<0.000000e+00> : vector<4x64xf32>
    %129 = tpu.matmul %126, %128, %cst_121 {dimension_numbers = #tpu.dot_dimension_numbers<[1], [0], [0], [1], [0, 0, 1, 1], [], []>} : vector<4x224xbf16>, vector<224x64xbf16>, vector<4x64xf32> -> vector<4x64xf32>
    %130 = arith.addf %122, %129 : vector<4x64xf32>
    %c0_122 = arith.constant 0 : index
    %c0_123 = arith.constant 0 : index
    %131 = vector.load %arg9[%c0_122, %c0_123] : memref<1x64xf32, #tpu.memory_space<vmem>>, vector<1x64xf32>
    %132 = vector.broadcast %131 : vector<1x64xf32> to vector<4x64xf32>
    %133 = arith.addf %130, %132 : vector<4x64xf32>
    %cst_124 = arith.constant 0.000000e+00 : f32
    %134 = vector.broadcast %cst_124 : f32 to vector<4x64xf32>
    %135 = arith.maximumf %133, %134 : vector<4x64xf32>
    %136 = arith.truncf %135 : vector<4x64xf32> to vector<4x64xbf16>
    %137 = vector.extract_strided_slice %136 {offsets = [0, 0], sizes = [2, 64], strides = [1, 1]} : vector<4x64xbf16> to vector<2x64xbf16>
    %c0_125 = arith.constant 0 : index
    %c0_126 = arith.constant 0 : index
    %c0_127 = arith.constant 0 : index
    %138 = vector.load %arg10[%c0_125, %c0_126, %c0_127] : memref<2x64x256xbf16, #tpu.memory_space<vmem>>, vector<1x64x256xbf16>
    %139 = vector.shape_cast %138 : vector<1x64x256xbf16> to vector<64x256xbf16>
    %cst_128 = arith.constant dense<0.000000e+00> : vector<2x256xf32>
    %140 = tpu.matmul %137, %139, %cst_128 {dimension_numbers = #tpu.dot_dimension_numbers<[1], [0], [0], [1], [0, 0, 1, 1], [], []>} : vector<2x64xbf16>, vector<64x256xbf16>, vector<2x256xf32> -> vector<2x256xf32>
    %141 = vector.extract_strided_slice %136 {offsets = [2, 0], sizes = [2, 64], strides = [1, 1]} : vector<4x64xbf16> to vector<2x64xbf16>
    %c1_129 = arith.constant 1 : index
    %c0_130 = arith.constant 0 : index
    %c0_131 = arith.constant 0 : index
    %142 = vector.load %arg10[%c1_129, %c0_130, %c0_131] : memref<2x64x256xbf16, #tpu.memory_space<vmem>>, vector<1x64x256xbf16>
    %143 = vector.shape_cast %142 : vector<1x64x256xbf16> to vector<64x256xbf16>
    %cst_132 = arith.constant dense<0.000000e+00> : vector<2x256xf32>
    %144 = tpu.matmul %141, %143, %cst_132 {dimension_numbers = #tpu.dot_dimension_numbers<[1], [0], [0], [1], [0, 0, 1, 1], [], []>} : vector<2x64xbf16>, vector<64x256xbf16>, vector<2x256xf32> -> vector<2x256xf32>
    %145 = arith.addf %140, %144 : vector<2x256xf32>
    %c0_133 = arith.constant 0 : index
    %c0_134 = arith.constant 0 : index
    %146 = vector.load %arg11[%c0_133, %c0_134] : memref<1x256xf32, #tpu.memory_space<vmem>>, vector<1x256xf32>
    %147 = vector.broadcast %146 : vector<1x256xf32> to vector<2x256xf32>
    %148 = arith.addf %145, %147 : vector<2x256xf32>
    %149 = math.tanh %148 : vector<2x256xf32>
    %150 = arith.truncf %149 : vector<2x256xf32> to vector<2x256xbf16>
    %151 = vector.extract_strided_slice %150 {offsets = [0, 0], sizes = [2, 128], strides = [1, 1]} : vector<2x256xbf16> to vector<2x128xbf16>
    %c0_135 = arith.constant 0 : index
    %c0_136 = arith.constant 0 : index
    %152 = vector.load %arg12[%c0_135, %c0_136] : memref<128x6xbf16, #tpu.memory_space<vmem>>, vector<128x6xbf16>
    %cst_137 = arith.constant dense<0.000000e+00> : vector<2x6xf32>
    %153 = tpu.matmul %151, %152, %cst_137 {dimension_numbers = #tpu.dot_dimension_numbers<[1], [0], [0], [1], [0, 0, 1, 1], [], []>} : vector<2x128xbf16>, vector<128x6xbf16>, vector<2x6xf32> -> vector<2x6xf32>
    %c0_138 = arith.constant 0 : index
    %c0_139 = arith.constant 0 : index
    %154 = vector.load %arg13[%c0_138, %c0_139] : memref<1x6xf32, #tpu.memory_space<vmem>>, vector<1x6xf32>
    %155 = vector.broadcast %154 : vector<1x6xf32> to vector<2x6xf32>
    %156 = arith.addf %153, %155 : vector<2x6xf32>
    %c0_140 = arith.constant 0 : index
    %c0_141 = arith.constant 0 : index
    %157 = vector.load %arg16[%c0_140, %c0_141] : memref<2x6xf32, #tpu.memory_space<vmem>>, vector<2x6xf32>
    tpu.vector_store %arg16[%c0_140, %c0_141], %156 {strides = array<i32>} : memref<2x6xf32, #tpu.memory_space<vmem>>, vector<2x6xf32>,
    %158 = vector.extract_strided_slice %150 {offsets = [0, 128], sizes = [2, 128], strides = [1, 1]} : vector<2x256xbf16> to vector<2x128xbf16>
    %c0_142 = arith.constant 0 : index
    %c0_143 = arith.constant 0 : index
    %159 = vector.load %arg14[%c0_142, %c0_143] : memref<128x1xbf16, #tpu.memory_space<vmem>>, vector<128x1xbf16>
    %cst_144 = arith.constant dense<0.000000e+00> : vector<2x1xf32>
    %160 = tpu.matmul %158, %159, %cst_144 {dimension_numbers = #tpu.dot_dimension_numbers<[1], [0], [0], [1], [0, 0, 1, 1], [], []>} : vector<2x128xbf16>, vector<128x1xbf16>, vector<2x1xf32> -> vector<2x1xf32>
    %c0_145 = arith.constant 0 : index
    %c0_146 = arith.constant 0 : index
    %161 = vector.load %arg15[%c0_145, %c0_146] : memref<1x1xf32, #tpu.memory_space<vmem>>, vector<1x1xf32>
    %162 = vector.broadcast %161 : vector<1x1xf32> to vector<2x1xf32>
    %163 = arith.addf %160, %162 : vector<2x1xf32>
    %c0_147 = arith.constant 0 : index
    %c0_148 = arith.constant 0 : index
    %164 = vector.load %arg17[%c0_147, %c0_148] : memref<2x1xf32, #tpu.memory_space<vmem>>, vector<2x1xf32>
    tpu.vector_store %arg17[%c0_147, %c0_148], %163 {strides = array<i32>} : memref<2x1xf32, #tpu.memory_space<vmem>>, vector<2x1xf32>,
    return
  }
}

</mosaic_0001>

<bundles_post_ra>
// kernel: net_forward.1
= control target key start
LH: loop header
LB: loop body
LE: loop exit
PB: predicated region body
PF: predicated region fallthrough
CT: control target
= control target key end

     0   :  { %s9283_s0 = inlined_call_operand.vmem [shape: f32[80,160], index: 0, kind: input, shape index: {}]   ;;  %s9284_s1 = inlined_call_operand.vmem [shape: bf16[5,36,80], index: 1, kind: input, shape index: {}]   ;;  %s9285_s2 = inlined_call_operand.hbm [shape: bf16[5,160,288], index: 2, kind: input, shape index: {}]   ;;  %s9286_s3 = inlined_call_operand.vmem [shape: f32[1,288], index: 3, kind: input, shape index: {}]   ;;  %s9287_s4 = inlined_call_operand.vmem [shape: bf16[5,14,36], index: 4, kind: input, shape index: {}]   ;;  %s9288_s5 = inlined_call_operand.vmem [shape: bf16[5,288,224], index: 5, kind: input, shape index: {}]   ;;  %s9289_s6 = inlined_call_operand.vmem [shape: f32[1,224], index: 6, kind: input, shape index: {}]   ;;  %s9290_s7 = inlined_call_operand.vmem [shape: bf16[5,4,14], index: 7, kind: input, shape index: {}]   ;;  %s9291_s8 = inlined_call_operand.vmem [shape: bf16[5,224,64], index: 8, kind: input, shape index: {}]   ;;  %s9292_s9 = inlined_call_operand.vmem [shape: f32[1,64], index: 9, kind: input, shape index: {}]   ;;  %s9293_s10 = inlined_call_operand.vmem [shape: bf16[2,64,256], index: 10, kind: input, shape index: {}]   ;;  %s9294_s11 = inlined_call_operand.vmem [shape: f32[1,256], index: 11, kind: input, shape index: {}]   ;;  %s9295_s12 = inlined_call_operand.vmem [shape: bf16[128,6], index: 12, kind: input, shape index: {}]   ;;  %s9296_s13 = inlined_call_operand.vmem [shape: f32[1,6], index: 13, kind: input, shape index: {}]   ;;  %s9297_s14 = inlined_call_operand.vmem [shape: bf16[128,1], index: 14, kind: input, shape index: {}]   ;;  %s9298_s15 = inlined_call_operand.<no memory space> [shape: f32[1,1], index: 15, kind: input, shape index: {}]   ;;  %s9299_s16 = inlined_call_operand.hbm [shape: f32[2,6], index: 16, kind: output, shape index: {0}]   ;;  %s9300_s17 = inlined_call_operand.vmem [shape: f32[2,1], index: 17, kind: output, shape index: {1}]  }
   0x1   :  { %9303 = sst [smem:[#allocation9_spill]] %s9283_s0  ;;  %v23_v0 = vstv %s9298_s15 }
   0x2   :  { %9304 = sst [smem:[#allocation10_spill]] %s9284_s1  ;;  %24 = vst [vmem:[#allocation2] sm:$0x1] %v23_v0 }
   0x3   :  { %25 = vsyncpa [#allocation4], 0 }
   0x4   :  { %26 = vsyncpa [#allocation5], 0  ;;  %s7484_s26 = smov [#allocation3]  }
   0x5   :  { %s36_s27 = sshll.u32 %s7484_s26, 4  ;;  %s37_s27 = int_to_ptr.vmem [resolvable:$true] %s36_s27 }
   0x6   :  { %s7448_s28 = scalar_lea.vmem %s37_s27, 19200  ;;  %p7453_p1 = scmp.lt.s32.totalorder %s37_s27, %s37_s27 }
   0x7   :  { %p7449_p0 = scmp.ne.s32.totalorder %s37_s27, %s7448_s28  ;;  %p7454_p2 = scmp.lt.s32.totalorder %s7448_s28, %s7448_s28 }
   0x9   :  { %p7455_p3 = por %p7454_p2, %p7453_p1 }
   0xb   :  { %p7456_p4 = pnand %p7455_p3, %p7449_p0 }
   0xd   :  { %7459 = shalt.err (!%p7456_p4)
}
   0xe   :  { %s7485_s29 = smov 192   ;;  %s7486_s0 = smov 12  }
   0xf   :  { %42 = dma.hbm_to_vmem [thread:$0]  %s9285_s2, 19200, %s37_s27, [#allocation4], %s7485_s29, %s7485_s29, %s7486_s0  }
  0x10   :  { %7480 = dma.done.wait [#allocation4], 19200  }
  0x11   :  { %7481 = vsyncadd [#allocation4], 4294948096  ;;  %v7487_v1 = vmov 0   ;;  %s9305_s1 = sld [smem:[#allocation9_spill]]  ;;  %v6844_v32 = vld [vmem:[#allocation3 + $0x19c] ss:$12 sps:$4 sm:$0xff]  }
  0x12   :  { %298 = vmatprep.mubr.bf16.mxu1 %v7487_v1  ;;  %163 = vmatprep.mubr.bf16.mxu0 %v7487_v1  ;;  %s9306_s27 = sld [smem:[#allocation10_spill]]  ;;  %vm121_vm0 = vcmask 654336   ;;  %v6842_v35 = vld [vmem:[#allocation3 + $0x198] ss:$12 sps:$4 sm:$0xff]   ;;  %v6845_v36 = vld [vmem:[#allocation3 + $0x1a0] ss:$12 sps:$4 sm:$0xff]  }
  0x13   :  { %v6848_v37 = vld [vmem:[#allocation3 + $0x184] ss:$12 sps:$4 sm:$0xff]   ;;  %v6846_v38 = vld [vmem:[#allocation3 + $0x180] ss:$12 sps:$4 sm:$0xff]   ;;  %v6849_v40 = vld [vmem:[#allocation3 + $0x188] ss:$12 sps:$4 sm:$0xff]  }
  0x14   :  { %v6852_v41 = vld [vmem:[#allocation3 + $0x16c] ss:$12 sps:$4 sm:$0xff]   ;;  %v6850_v43 = vld [vmem:[#allocation3 + $0x168] ss:$12 sps:$4 sm:$0xff]   ;;  %v6853_v44 = vld [vmem:[#allocation3 + $0x170] ss:$12 sps:$4 sm:$0xff]  }
  0x15   :  { %v6856_v45 = vld [vmem:[#allocation3 + $0x154] ss:$12 sps:$4 sm:$0xff]   ;;  %v6854_v46 = vld [vmem:[#allocation3 + $0x150] ss:$12 sps:$4 sm:$0xff]   ;;  %v6857_v47 = vld [vmem:[#allocation3 + $0x158] ss:$12 sps:$4 sm:$0xff]  }
  0x16   :  { %v6860_v48 = vld [vmem:[#allocation3 + $0x13c] ss:$12 sps:$4 sm:$0xff]   ;;  %v6858_v51 = vld [vmem:[#allocation3 + $0x138] ss:$12 sps:$4 sm:$0xff]   ;;  %v6861_v52 = vld [vmem:[#allocation3 + $0x140] ss:$12 sps:$4 sm:$0xff]  }
  0x17   :  { %v90_v2 = vld [vmem:[%s9305_s1 + $0x88] sm:$0xff]  ;;  %v92_v3 = vld [vmem:[%s9305_s1 + $0x98] sm:$0xff]  ;;  %v89_v4 = vld [vmem:[%s9305_s1 + $0x80] sm:$0xff]  ;;  %vm534_vm1 = vcmask 261120   ;;  %vm2325_vm2 = vcmask 1041408   ;;  %vm2321_vm3 = vcmask 293888  }
  0x18   :  { %v7598_v5 = vpack.c.bf16 %v92_v3, %v90_v2  ;;  %v91_v6 = vld [vmem:[%s9305_s1 + $0x90] sm:$0xff]  ;;  %v86_v7 = vld [vmem:[%s9305_s1 + $0x68] sm:$0xff]  ;;  %v88_v8 = vld [vmem:[%s9305_s1 + $0x78] sm:$0xff]  ;;  %vm7489_vm4 = vmmov 0   ;;  %vm4382_vm5 = vcmask 1046528   ;;  %vm4378_vm6 = vcmask 113664  }
  0x19   :  { %v7609_v9 = vpack.c.bf16 %v91_v6, %v89_v4  ;;  %v7611_v10 = vpack.c.bf16 %v88_v8, %v86_v7  ;;  %v85_v11 = vld [vmem:[%s9305_s1 + $0x60] sm:$0xff]  ;;  %v87_v12 = vld [vmem:[%s9305_s1 + $0x70] sm:$0xff]  ;;  %v82_v13 = vld [vmem:[%s9305_s1 + $0x48] sm:$0xff]  ;;  %vm4621_vm7 = vcmask 785408   ;;  %vm5476_vm8 = vcmask 523264  }
  0x1a   :  { %272 = vmatprep.subr.bf16.mxu1 %v7598_v5  ;;  %v84_v14 = vld [vmem:[%s9305_s1 + $0x58] sm:$0xff]  ;;  %137 = vmatprep.subr.bf16.mxu0 %v7598_v5  ;;  %v7628_v15 = vpack.c.bf16 %v87_v12, %v85_v11  ;;  %v81_v17 = vld [vmem:[%s9305_s1 + $0x40] sm:$0xff]  ;;  %v83_v18 = vld [vmem:[%s9305_s1 + $0x50] sm:$0xff]  ;;  %vm5734_vm9 = vcmask 41984   ;;  %vm5847_vm10 = vcmask 1024  }
  0x1b   :  { %273 = vmatpush1.bf16.msra.mxu1 %v7609_v9  ;;  %138 = vmatpush1.bf16.msra.mxu0 %v7609_v9  ;;  %v7632_v16 = vpack.c.bf16 %v84_v14, %v82_v13  ;;  %v78_v19 = vld [vmem:[%s9305_s1 + $0x28] sm:$0xff]  ;;  %v80_v20 = vld [vmem:[%s9305_s1 + $0x38] sm:$0xff]  ;;  %v77_v21 = vld [vmem:[%s9305_s1 + $0x20] sm:$0xff]  ;;  %v7651_v22 = vpack.c.bf16 %v83_v18, %v81_v17 }
  0x1c   :  { %274 = vmatprep.subr.bf16.mxu1 %v7611_v10  ;;  %139 = vmatprep.subr.bf16.mxu0 %v7611_v10  ;;  %v79_v23 = vld [vmem:[%s9305_s1 + $0x30] sm:$0xff]  ;;  %v7658_v24 = vpack.c.bf16 %v80_v20, %v78_v19  ;;  %v74_v25 = vld [vmem:[%s9305_s1 + $0x8] sm:$0xff]  ;;  %v76_v26 = vld [vmem:[%s9305_s1 + $0x18] sm:$0xff] }
  0x1d   :  { %v7668_v27 = vpack.c.bf16 %v79_v23, %v77_v21  ;;  %v73_v28 = vld [vmem:[%s9305_s1] sm:$0xff]  ;;  %v7675_v29 = vpack.c.bf16 %v76_v26, %v74_v25  ;;  %v75_v30 = vld [vmem:[%s9305_s1 + $0x10] sm:$0xff]  ;;  %v6840_v42 = vld [vmem:[%s9306_s27 + $0x8] sm:$0xff]  }
  0x1e   :  { %v7682_v31 = vpack.c.bf16 %v75_v30, %v73_v28  ;;  %v6836_v33 = vld [vmem:[%s9306_s27 + $0x14] sm:$0xff]   ;;  %v6839_v34 = vld [vmem:[%s9306_s27] sm:$0xff]   ;;  %v6841_v50 = vld [vmem:[%s9306_s27 + $0x10] ss:$0 sps:$4 sm:$0x33]  }
  0x1f   :  { %275 = vmatpush1.bf16.msra.mxu1 %v7628_v15  ;;  %140 = vmatpush1.bf16.msra.mxu0 %v7628_v15  ;;  %v6837_v39 = vld [vmem:[%s9306_s27 + $0x1c] sm:$0xff]   ;;  %v6838_v49 = vld [vmem:[%s9306_s27 + $0x24] ss:$0 sps:$4 sm:$0x33]   ;;  %v6864_v53 = vld [vmem:[#allocation3 + $0x124] ss:$12 sps:$4 sm:$0xff]  }
  0x20   :  { %276 = vmatprep.subr.bf16.mxu1 %v7632_v16  ;;  %141 = vmatprep.subr.bf16.mxu0 %v7632_v16  ;;  %v6862_v54 = vld [vmem:[#allocation3 + $0x120] ss:$12 sps:$4 sm:$0xff]   ;;  %v6865_v55 = vld [vmem:[#allocation3 + $0x128] ss:$12 sps:$4 sm:$0xff]   ;;  %v6869_v58 = vld [vmem:[#allocation3 + $0x110] ss:$12 sps:$4 sm:$0xff]  }
  0x21   :  { %v6868_v56 = vld [vmem:[#allocation3 + $0x10c] ss:$12 sps:$4 sm:$0xff]   ;;  %v6866_v57 = vld [vmem:[#allocation3 + $0x108] ss:$12 sps:$4 sm:$0xff]   ;;  %v6870_v60 = vld [vmem:[#allocation3 + $0xf0] ss:$12 sps:$4 sm:$0xff]  }
  0x22   :  { %v6872_v59 = vld [vmem:[#allocation3 + $0xf4] ss:$12 sps:$4 sm:$0xff]   ;;  %v6873_v61 = vld [vmem:[#allocation3 + $0xf8] ss:$12 sps:$4 sm:$0xff]   ;;  %v6877_v0 = vld [vmem:[#allocation3 + $0x1d0] ss:$12 sps:$4 sm:$0xff]  }
  0x23   :  { %277 = vmatpush1.bf16.msra.mxu1 %v7651_v22  ;;  %142 = vmatpush1.bf16.msra.mxu0 %v7651_v22  ;;  %v6876_v62 = vld [vmem:[#allocation3 + $0x1cc] ss:$12 sps:$4 sm:$0xff]   ;;  %v6874_v63 = vld [vmem:[#allocation3 + $0x1c8] ss:$12 sps:$4 sm:$0xff]   ;;  %v6878_v3 = vld [vmem:[#allocation3 + $0x1b0] ss:$12 sps:$4 sm:$0xff]  }
  0x24   :  { %278 = vmatprep.subr.bf16.mxu1 %v7658_v24  ;;  %143 = vmatprep.subr.bf16.mxu0 %v7658_v24  ;;  %v6880_v2 = vld [vmem:[#allocation3 + $0x1b4] ss:$12 sps:$4 sm:$0xff]   ;;  %v6881_v4 = vld [vmem:[#allocation3 + $0x1b8] ss:$12 sps:$4 sm:$0xff]   ;;  %v6885_v18 = vld [vmem:[#allocation3 + $0xb0] ss:$12 sps:$4 sm:$0xff]  }
  0x25   :  { %v6884_v6 = vld [vmem:[#allocation3 + $0xac] ss:$12 sps:$4 sm:$0xff]   ;;  %v6882_v17 = vld [vmem:[#allocation3 + $0xa8] ss:$12 sps:$4 sm:$0xff]   ;;  %v6886_v30 = vld [vmem:[#allocation3 + $0x90] ss:$12 sps:$4 sm:$0xff]  }
  0x26   :  { %v6888_v20 = vld [vmem:[#allocation3 + $0x94] ss:$12 sps:$4 sm:$0xff]  }
  0x27   :  { %279 = vmatpush1.bf16.msra.mxu1 %v7668_v27  ;;  %144 = vmatpush1.bf16.msra.mxu0 %v7668_v27 }
  0x28   :  { %280 = vmatprep.subr.bf16.mxu1 %v7675_v29  ;;  %145 = vmatprep.subr.bf16.mxu0 %v7675_v29 }
  0x2b   :  { %281 = vmatpush1.bf16.msra.mxu1 %v7682_v31  ;;  %146 = vmatpush1.bf16.msra.mxu0 %v7682_v31 }
  0x2c   :  { %544 = vmatprep.subr.bf16.mxu0 %v6844_v32  ;;  %605 = vmatprep.subr.bf16.mxu1 %v7487_v1  ;;  %v6889_v32 = vld [vmem:[#allocation3 + $0x98] ss:$12 sps:$4 sm:$0xff]  }
  0x2e   :  { %5882 = vmatmul.mubr.msk.bf16.vlgmr.msra.gmra.mxu1 %vm121_vm0, %v6836_v33  ;;  %5871 = vmatmul.mubr.msk.bf16.vlgmr.msra.gmra.mxu0 %vm121_vm0, %v6839_v34  ;;  %v6892_v34 = vld [vmem:[#allocation3 + $0x7c] ss:$12 sps:$4 sm:$0xff]  }
  0x2f   :  { %308 = vmatprep.mubr.bf16.mxu1 %v7487_v1  ;;  %173 = vmatprep.mubr.bf16.mxu0 %v7487_v1 }
  0x30   :  { %545 = vmatpush1.bf16.msra.mxu0 %v6842_v35  ;;  %606 = vmatpush1.bf16.msra.mxu1 %v6845_v36 }
  0x31   :  { %546 = vmatprep.subr.bf16.mxu0 %v6848_v37  ;;  %607 = vmatprep.subr.bf16.mxu1 %v7487_v1 }
  0x34   :  { %547 = vmatpush1.bf16.msra.mxu0 %v6846_v38  ;;  %608 = vmatpush1.bf16.msra.mxu1 %v6849_v40  ;;  %v6890_v38 = vld [vmem:[#allocation3 + $0x78] ss:$12 sps:$4 sm:$0xff]  }
  0x35   :  { %548 = vmatprep.subr.bf16.mxu0 %v6852_v41  ;;  %609 = vmatprep.subr.bf16.mxu1 %v7487_v1 }
  0x36   :  { %5883 = vmatmul.mubr.msk.bf16.gmra.mxu1 %vm121_vm0, %v6837_v39  ;;  %5872 = vmatmul.mubr.msk.bf16.gmra.mxu0 %vm121_vm0, %v6840_v42 }
  0x37   :  { %318 = vmatprep.mubr.bf16.mxu1 %v7487_v1  ;;  %183 = vmatprep.mubr.bf16.mxu0 %v7487_v1 }
  0x38   :  { %549 = vmatpush1.bf16.msra.mxu0 %v6850_v43  ;;  %610 = vmatpush1.bf16.msra.mxu1 %v6853_v44  ;;  %v6893_v43 = vld [vmem:[#allocation3 + $0x80] ss:$12 sps:$4 sm:$0xff]   ;;  %v6896_v44 = vld [vmem:[#allocation3 + $0x64] ss:$12 sps:$4 sm:$0xff]  }
  0x39   :  { %550 = vmatprep.subr.bf16.mxu0 %v6856_v45  ;;  %611 = vmatprep.subr.bf16.mxu1 %v7487_v1 }
  0x3c   :  { %551 = vmatpush1.bf16.msra.mxu0 %v6854_v46  ;;  %612 = vmatpush1.bf16.msra.mxu1 %v6857_v47 }
  0x3d   :  { %552 = vmatprep.subr.bf16.mxu0 %v6860_v48  ;;  %613 = vmatprep.subr.bf16.mxu1 %v7487_v1 }
  0x3e   :  { %5884 = vmatmul.mubr.msk.bf16.gmra.mxu1 %vm121_vm0, %v6838_v49  ;;  %5873 = vmatmul.mubr.msk.bf16.gmra.mxu0 %vm121_vm0, %v6841_v50  ;;  %v6894_v49 = vld [vmem:[#allocation3 + $0x60] ss:$12 sps:$4 sm:$0xff]   ;;  %v6897_v50 = vld [vmem:[#allocation3 + $0x68] ss:$12 sps:$4 sm:$0xff]  }
  0x40   :  { %553 = vmatpush1.bf16.msra.mxu0 %v6858_v51  ;;  %614 = vmatpush1.bf16.msra.mxu1 %v6861_v52  ;;  %v6900_v52 = vld [vmem:[#allocation3 + $0x4c] ss:$12 sps:$4 sm:$0xff]  }
  0x41   :  { %554 = vmatprep.subr.bf16.mxu0 %v6864_v53  ;;  %615 = vmatprep.subr.bf16.mxu1 %v7487_v1 }
  0x44   :  { %555 = vmatpush1.bf16.msra.mxu0 %v6862_v54  ;;  %616 = vmatpush1.bf16.msra.mxu1 %v6865_v55 }
  0x45   :  { %556 = vmatprep.subr.bf16.mxu0 %v6868_v56  ;;  %617 = vmatprep.subr.bf16.mxu1 %v7487_v1 }
  0x48   :  { %557 = vmatpush1.bf16.msra.mxu0 %v6866_v57  ;;  %618 = vmatpush1.bf16.msra.mxu1 %v6869_v58  ;;  %v6898_v58 = vld [vmem:[#allocation3 + $0x48] ss:$12 sps:$4 sm:$0xff]  }
  0x49   :  { %558 = vmatprep.subr.bf16.mxu0 %v6872_v59  ;;  %619 = vmatprep.subr.bf16.mxu1 %v7487_v1  ;;  %v6901_v59 = vld [vmem:[#allocation3 + $0x50] ss:$12 sps:$4 sm:$0xff]  }
  0x4c   :  { %559 = vmatpush1.bf16.msra.mxu0 %v6870_v60  ;;  %620 = vmatpush1.bf16.msra.mxu1 %v6873_v61  ;;  %v6904_v60 = vld [vmem:[#allocation3 + $0x34] ss:$12 sps:$4 sm:$0xff]  }
  0x4d   :  { %633 = vmatprep.subr.bf16.mxu1 %v7487_v1  ;;  %572 = vmatprep.subr.bf16.mxu0 %v6876_v62  ;;  %v6902_v62 = vld [vmem:[#allocation3 + $0x30] ss:$12 sps:$4 sm:$0xff]  }
  0x50   :  { %573 = vmatpush2.bf16.msra.mxu0 %v6874_v63  ;;  %634 = vmatpush2.bf16.msra.mxu1 %v6877_v0  ;;  %v6905_v63 = vld [vmem:[#allocation3 + $0x38] ss:$12 sps:$4 sm:$0xff]   ;;  %v6908_v0 = vld [vmem:[#allocation3 + $0x1c] ss:$12 sps:$4 sm:$0xff]  }
  0x51   :  { %635 = vmatprep.subr.bf16.mxu1 %v7487_v1  ;;  %574 = vmatprep.subr.bf16.mxu0 %v6880_v2  ;;  %v6906_v2 = vld [vmem:[#allocation3 + $0x18] ss:$12 sps:$4 sm:$0xff]  }
  0x54   :  { %575 = vmatpush2.bf16.msra.mxu0 %v6878_v3  ;;  %636 = vmatpush2.bf16.msra.mxu1 %v6881_v4  ;;  %v6909_v3 = vld [vmem:[#allocation3 + $0x20] ss:$12 sps:$4 sm:$0xff]   ;;  %v6912_v4 = vld [vmem:[#allocation3 + $0x4] ss:$12 sps:$4 sm:$0xff]  }
  0x55   :  { %891 = vmatprep.subr.bf16.mxu1 %v7487_v1  ;;  %830 = vmatprep.subr.bf16.mxu0 %v6884_v6  ;;  %v6910_v6 = vld [vmem:[#allocation3] ss:$12 sps:$4 sm:$0xff]  }
  0xee   :  { %v300_v7 = vpop.f32.mrf.mxu1  ;;  %v7728_v8 = vpop.f32.mrf.mxu0 }
  0xf0   :  { %v302_v11 = vpop.f32.mrf.mxu1  ;;  %v7730_v12 = vpop.f32.mrf.mxu0 }
  0xf2   :  { %v304_v13 = vpop.f32.mrf.mxu1  ;;  %v7732_v14 = vpop.f32.mrf.mxu0 }
  0xf3   :  { %v327_v25 = vpack.c.bf16 %v304_v13, %v300_v7  ;;  %v6913_v7 = vld [vmem:[#allocation3 + $0x8] ss:$12 sps:$4 sm:$0xff]   ;;  %v6917_v13 = vld [vmem:[#allocation3 + $0xe0] ss:$12 sps:$4 sm:$0xff]  }
  0xf4   :  { %v306_v19 = vpop.f32.mrf.mxu1  ;;  %v171_v21 = vpop.f32.mrf.mxu0 }
  0xf5   :  { %v328_v23 = vpack.c.bf16 %v306_v19, %v302_v11  ;;  %v193_v61 = vpack.c.bf16 %v171_v21, %v7730_v12  ;;  %v6916_v11 = vld [vmem:[#allocation3 + $0xdc] ss:$12 sps:$4 sm:$0xff]   ;;  %v6914_v12 = vld [vmem:[#allocation3 + $0xd8] ss:$12 sps:$4 sm:$0xff]   ;;  %v192_v21 = vpack.c.bf16 %v7732_v14, %v7728_v8 }
  0xf6   :  { %v310_v26 = vpop.f32.mrf.mxu1  ;;  %v7734_v28 = vpop.f32.mrf.mxu0  ;;  %v6921_v19 = vld [vmem:[#allocation3 + $0xc8] ss:$12 sps:$4 sm:$0xff]  }
  0xf7   :  { %5915 = vmatprep.mubr.msk.bf16.mxu0 %vm534_vm1, %v328_v23  ;;  %5918 = vmatprep.mubr.msk.bf16.mxu1 %vm534_vm1, %v328_v23  ;;  %v6922_v14 = vld [vmem:[%s9306_s27 + $0x28] sm:$0xff]  }
  0xf8   :  { %577 = vmatmul.mubr.bf16.vlgmr.msra.gmra.mxu0 %v327_v25  ;;  %638 = vmatmul.mubr.bf16.vlgmr.msra.gmra.mxu1 %v327_v25  ;;  %v312_v33 = vpop.f32.mrf.mxu1  ;;  %v7738_v35 = vpop.f32.mrf.mxu0 }
  0xf9   :  { %831 = vmatpush1.bf16.msra.mxu0 %v6882_v17  ;;  %892 = vmatpush1.bf16.msra.mxu1 %v6885_v18  ;;  %v6920_v17 = vld [vmem:[#allocation3 + $0xc4] ss:$12 sps:$4 sm:$0xff]   ;;  %v6918_v18 = vld [vmem:[#allocation3 + $0xc0] ss:$12 sps:$4 sm:$0xff]  }
  0xfa   :  { %832 = vmatprep.subr.bf16.mxu0 %v6888_v20  ;;  %893 = vmatprep.subr.bf16.mxu1 %v7487_v1  ;;  %v314_v36 = vpop.f32.mrf.mxu1  ;;  %v7741_v37 = vpop.f32.mrf.mxu0 }
  0xfb   :  { %v329_v39 = vpack.c.bf16 %v314_v36, %v310_v26  ;;  %v194_v25 = vpack.c.bf16 %v7741_v37, %v7734_v28  ;;  %v6923_v26 = vld [vmem:[%s9306_s27 + $0x30] sm:$0xff]   ;;  %v6924_v28 = vld [vmem:[%s9306_s27 + $0x38] ss:$0 sps:$4 sm:$0x33]   ;;  %v6935_v37 = vld [vmem:[#allocation3 + $0x25c] ss:$12 sps:$4 sm:$0xff]  }
  0xfc   :  { %v316_v40 = vpop.f32.mrf.mxu1  ;;  %v7743_v41 = vpop.f32.mrf.mxu0  ;;  %v6929_v36 = vld [vmem:[#allocation3 + $0x270] ss:$12 sps:$4 sm:$0xff]  }
  0xfd   :  { %833 = vmatpush1.bf16.msra.mxu0 %v6886_v30  ;;  %894 = vmatpush1.bf16.msra.mxu1 %v6889_v32  ;;  %v330_v42 = vpack.c.bf16 %v316_v40, %v312_v33  ;;  %v195_v20 = vpack.c.bf16 %v7743_v41, %v7738_v35  ;;  %v6925_v30 = vld [vmem:[#allocation3 + $0x288] ss:$12 sps:$4 sm:$0xff]   ;;  %v6927_v32 = vld [vmem:[#allocation3 + $0x28c] ss:$12 sps:$4 sm:$0xff]   ;;  %v6928_v33 = vld [vmem:[#allocation3 + $0x290] ss:$12 sps:$4 sm:$0xff]  }
  0xfe   :  { %834 = vmatprep.subr.bf16.mxu0 %v6892_v34  ;;  %895 = vmatprep.subr.bf16.mxu1 %v7487_v1  ;;  %v320_v45 = vpop.f32.mrf.mxu1  ;;  %v7746_v46 = vpop.f32.mrf.mxu0  ;;  %v6931_v34 = vld [vmem:[#allocation3 + $0x274] ss:$12 sps:$4 sm:$0xff]   ;;  %v6932_v35 = vld [vmem:[#allocation3 + $0x278] ss:$12 sps:$4 sm:$0xff]  }
  0xff   :  { %5916 = vmatprep.mubr.msk.bf16.mxu0 %vm534_vm1, %v330_v42  ;;  %5919 = vmatprep.mubr.msk.bf16.mxu1 %vm534_vm1, %v330_v42  ;;  %v331_v55 = vpack.c.bf16 %v320_v45, %v320_v45  ;;  %v196_v8 = vpack.c.bf16 %v7746_v46, %v7746_v46  ;;  %v6939_v40 = vld [vmem:[#allocation3 + $0x244] ss:$12 sps:$4 sm:$0xff]   ;;  %v6937_v41 = vld [vmem:[#allocation3 + $0x240] ss:$12 sps:$4 sm:$0xff]   ;;  %v6940_v42 = vld [vmem:[#allocation3 + $0x248] ss:$12 sps:$4 sm:$0xff]  }
 0x100   :  { %587 = vmatmul.mubr.bf16.gmra.mxu0 %v329_v39  ;;  %646 = vmatmul.mubr.bf16.gmra.mxu1 %v329_v39  ;;  %v322_v47 = vpop.f32.mrf.mxu1  ;;  %v7750_v48 = vpop.f32.mrf.mxu0  ;;  %v6936_v39 = vld [vmem:[#allocation3 + $0x260] ss:$12 sps:$4 sm:$0xff]   ;;  %v6944_v45 = vld [vmem:[#allocation3 + $0x230] ss:$12 sps:$4 sm:$0xff]  }
 0x101   :  { %835 = vmatpush1.bf16.msra.mxu0 %v6890_v38  ;;  %896 = vmatpush1.bf16.msra.mxu1 %v6893_v43  ;;  %v332_v51 = vpack.c.bf16 %v322_v47, %v322_v47  ;;  %v197_v23 = vpack.c.bf16 %v7750_v48, %v7750_v48  ;;  %v6933_v38 = vld [vmem:[#allocation3 + $0x258] ss:$12 sps:$4 sm:$0xff]   ;;  %v6947_v46 = vld [vmem:[#allocation3 + $0x214] ss:$12 sps:$4 sm:$0xff]   ;;  %v6945_v47 = vld [vmem:[#allocation3 + $0x210] ss:$12 sps:$4 sm:$0xff]  }
 0x102   :  { %836 = vmatprep.subr.bf16.mxu0 %v6896_v44  ;;  %897 = vmatprep.subr.bf16.mxu1 %v7487_v1  ;;  %v324_v53 = vpop.f32.mrf.mxu1  ;;  %v189_v54 = vpop.f32.mrf.mxu0  ;;  %v6943_v43 = vld [vmem:[#allocation3 + $0x22c] ss:$12 sps:$4 sm:$0xff]   ;;  %v6941_v44 = vld [vmem:[#allocation3 + $0x228] ss:$12 sps:$4 sm:$0xff]  }
 0x103   :  { %5917 = vmatprep.mubr.msk.bf16.mxu0 %vm534_vm1, %v332_v51  ;;  %5920 = vmatprep.mubr.msk.bf16.mxu1 %vm534_vm1, %v332_v51  ;;  %v6948_v48 = vld [vmem:[#allocation3 + $0x218] ss:$12 sps:$4 sm:$0xff]   ;;  %v6952_v51 = vld [vmem:[#allocation3 + $0x200] ss:$12 sps:$4 sm:$0xff]   ;;  %v6956_v54 = vld [vmem:[#allocation3 + $0x1e8] ss:$12 sps:$4 sm:$0xff]  }
 0x104   :  { %v325_v56 = vpop.f32.mrf.mxu1  ;;  %v190_v57 = vpop.f32.mrf.mxu0  ;;  %v6953_v53 = vld [vmem:[#allocation3 + $0x1e0] ss:$12 sps:$4 sm:$0xff]  }
 0x105   :  { %837 = vmatpush1.bf16.msra.mxu0 %v6894_v49  ;;  %898 = vmatpush1.bf16.msra.mxu1 %v6897_v50  ;;  %v6951_v49 = vld [vmem:[#allocation3 + $0x1fc] ss:$12 sps:$4 sm:$0xff]   ;;  %v6949_v50 = vld [vmem:[#allocation3 + $0x1f8] ss:$12 sps:$4 sm:$0xff]   ;;  %v6960_v57 = vld [vmem:[#allocation3 + $0x2c0] ss:$12 sps:$4 sm:$0xff]  }
 0x106   :  { %838 = vmatprep.subr.bf16.mxu0 %v6900_v52  ;;  %899 = vmatprep.subr.bf16.mxu1 %v7487_v1  ;;  %v6955_v52 = vld [vmem:[#allocation3 + $0x1e4] ss:$12 sps:$4 sm:$0xff]  }
 0x107   :  { %v6957_v56 = vld [vmem:[#allocation3 + $0x2b8] ss:$12 sps:$4 sm:$0xff]  }
 0x108   :  { %597 = vmatmul.mubr.bf16.gmra.mxu0 %v331_v55  ;;  %654 = vmatmul.mubr.bf16.gmra.mxu1 %v331_v55  ;;  %v6959_v55 = vld [vmem:[#allocation3 + $0x2bc] ss:$12 sps:$4 sm:$0xff]  }
 0x109   :  { %839 = vmatpush1.bf16.msra.mxu0 %v6898_v58  ;;  %900 = vmatpush1.bf16.msra.mxu1 %v6901_v59  ;;  %v6963_v58 = vld [vmem:[#allocation3 + $0x2a4] ss:$12 sps:$4 sm:$0xff]   ;;  %v6961_v59 = vld [vmem:[#allocation3 + $0x2a0] ss:$12 sps:$4 sm:$0xff]  }
 0x10a   :  { %840 = vmatprep.subr.bf16.mxu0 %v6904_v60  ;;  %901 = vmatprep.subr.bf16.mxu1 %v7487_v1  ;;  %v6964_v60 = vld [vmem:[#allocation3 + $0x2a8] ss:$12 sps:$4 sm:$0xff]  }
 0x10b   :  { %5951 = vmatprep.mubr.msk.bf16.mxu0 %vm534_vm1, %v193_v61  ;;  %5954 = vmatprep.mubr.msk.bf16.mxu1 %vm534_vm1, %v193_v61  ;;  %v6970_v61 = vld [vmem:[#allocation3 + $0x37c] ss:$12 sps:$4 sm:$0xff]  }
 0x10d   :  { %841 = vmatpush1.bf16.msra.mxu0 %v6902_v62  ;;  %902 = vmatpush1.bf16.msra.mxu1 %v6905_v63 }
 0x10e   :  { %842 = vmatprep.subr.bf16.mxu0 %v6908_v0  ;;  %903 = vmatprep.subr.bf16.mxu1 %v7487_v1 }
 0x111   :  { %843 = vmatpush1.bf16.msra.mxu0 %v6906_v2  ;;  %904 = vmatpush1.bf16.msra.mxu1 %v6909_v3 }
 0x112   :  { %844 = vmatprep.subr.bf16.mxu0 %v6912_v4  ;;  %905 = vmatprep.subr.bf16.mxu1 %v7487_v1 }
 0x115   :  { %845 = vmatpush1.bf16.msra.mxu0 %v6910_v6  ;;  %906 = vmatpush1.bf16.msra.mxu1 %v6913_v7 }
 0x116   :  { %858 = vmatprep.subr.bf16.mxu0 %v6916_v11  ;;  %919 = vmatprep.subr.bf16.mxu1 %v7487_v1 }
 0x119   :  { %859 = vmatpush2.bf16.msra.mxu0 %v6914_v12  ;;  %920 = vmatpush2.bf16.msra.mxu1 %v6917_v13 }
 0x11a   :  { %860 = vmatprep.subr.bf16.mxu0 %v6920_v17  ;;  %921 = vmatprep.subr.bf16.mxu1 %v7487_v1 }
 0x11d   :  { %861 = vmatpush2.bf16.msra.mxu0 %v6918_v18  ;;  %922 = vmatpush2.bf16.msra.mxu1 %v6921_v19 }
 0x11e   :  { %981 = vmatprep.subr.bf16.mxu0 %v7598_v5  ;;  %1252 = vmatprep.subr.bf16.mxu1 %v6927_v32 }
 0x120   :  { %863 = vmatmul.mubr.bf16.vlgmr.msra.gmra.mxu0 %v192_v21  ;;  %924 = vmatmul.mubr.bf16.vlgmr.msra.gmra.mxu1 %v192_v21 }
 0x121   :  { %5952 = vmatprep.mubr.msk.bf16.mxu0 %vm534_vm1, %v195_v20  ;;  %5955 = vmatprep.mubr.msk.bf16.mxu1 %vm534_vm1, %v195_v20 }
 0x122   :  { %982 = vmatpush1.bf16.msra.mxu0 %v7609_v9  ;;  %1253 = vmatpush1.bf16.msra.mxu1 %v6925_v30 }
 0x123   :  { %983 = vmatprep.subr.bf16.mxu0 %v7611_v10  ;;  %1254 = vmatprep.subr.bf16.mxu1 %v6931_v34 }
 0x126   :  { %984 = vmatpush1.bf16.msra.mxu0 %v7628_v15  ;;  %1255 = vmatpush1.bf16.msra.mxu1 %v6929_v36 }
 0x127   :  { %985 = vmatprep.subr.bf16.mxu0 %v7632_v16  ;;  %1256 = vmatprep.subr.bf16.mxu1 %v6935_v37 }
 0x128   :  { %873 = vmatmul.mubr.bf16.gmra.mxu0 %v194_v25  ;;  %932 = vmatmul.mubr.bf16.gmra.mxu1 %v194_v25 }
 0x129   :  { %5953 = vmatprep.mubr.msk.bf16.mxu0 %vm534_vm1, %v197_v23  ;;  %5956 = vmatprep.mubr.msk.bf16.mxu1 %vm534_vm1, %v197_v23 }
 0x12a   :  { %986 = vmatpush1.bf16.msra.mxu0 %v7651_v22  ;;  %1257 = vmatpush1.bf16.msra.mxu1 %v6933_v38 }
 0x12b   :  { %987 = vmatprep.subr.bf16.mxu0 %v7658_v24  ;;  %1258 = vmatprep.subr.bf16.mxu1 %v6939_v40 }
 0x12e   :  { %988 = vmatpush1.bf16.msra.mxu0 %v7668_v27  ;;  %1259 = vmatpush1.bf16.msra.mxu1 %v6937_v41 }
 0x12f   :  { %989 = vmatprep.subr.bf16.mxu0 %v7675_v29  ;;  %1260 = vmatprep.subr.bf16.mxu1 %v6943_v43 }
 0x130   :  { %883 = vmatmul.mubr.bf16.gmra.mxu0 %v196_v8  ;;  %940 = vmatmul.mubr.bf16.gmra.mxu1 %v196_v8 }
 0x131   :  { %1007 = vmatprep.mubr.bf16.mxu0 %v7487_v1 }
 0x132   :  { %990 = vmatpush1.bf16.msra.mxu0 %v7682_v31  ;;  %1261 = vmatpush1.bf16.msra.mxu1 %v6941_v44 }
 0x133   :  { %1313 = vmatprep.subr.bf16.mxu0 %v7487_v1  ;;  %1262 = vmatprep.subr.bf16.mxu1 %v6947_v46 }
 0x136   :  { %1263 = vmatpush1.bf16.msra.mxu1 %v6945_v47 }
 0x137   :  { %1264 = vmatprep.subr.bf16.mxu1 %v6951_v49 }
 0x138   :  { %5965 = vmatmul.mubr.msk.bf16.vlgmr.msra.gmra.mxu0 %vm121_vm0, %v6922_v14 }
 0x139   :  { %1017 = vmatprep.mubr.bf16.mxu0 %v7487_v1  ;;  %1314 = vmatpush1.bf16.msra.mxu0 %v6928_v33 }
 0x13a   :  { %1315 = vmatprep.subr.bf16.mxu0 %v7487_v1  ;;  %1265 = vmatpush1.bf16.msra.mxu1 %v6949_v50 }
 0x13b   :  { %1266 = vmatprep.subr.bf16.mxu1 %v6955_v52 }
 0x13d   :  { %1316 = vmatpush1.bf16.msra.mxu0 %v6932_v35 }
 0x13e   :  { %1317 = vmatprep.subr.bf16.mxu0 %v7487_v1  ;;  %1267 = vmatpush1.bf16.msra.mxu1 %v6953_v53 }
 0x13f   :  { %1280 = vmatprep.subr.bf16.mxu1 %v6959_v55 }
 0x140   :  { %5966 = vmatmul.mubr.msk.bf16.gmra.mxu0 %vm121_vm0, %v6923_v26 }
 0x141   :  { %1027 = vmatprep.mubr.bf16.mxu0 %v7487_v1  ;;  %1318 = vmatpush1.bf16.msra.mxu0 %v6936_v39 }
 0x142   :  { %1319 = vmatprep.subr.bf16.mxu0 %v7487_v1  ;;  %1281 = vmatpush2.bf16.msra.mxu1 %v6957_v56 }
 0x143   :  { %1282 = vmatprep.subr.bf16.mxu1 %v6963_v58 }
 0x145   :  { %1320 = vmatpush1.bf16.msra.mxu0 %v6940_v42 }
 0x146   :  { %1321 = vmatprep.subr.bf16.mxu0 %v7487_v1  ;;  %1283 = vmatpush2.bf16.msra.mxu1 %v6961_v59 }
 0x147   :  { %1418 = vmatprep.subr.bf16.mxu1 %v7598_v5 }
 0x148   :  { %5967 = vmatmul.mubr.msk.bf16.gmra.mxu0 %vm121_vm0, %v6924_v28 }
 0x149   :  { %1322 = vmatpush1.bf16.msra.mxu0 %v6944_v45 }
 0x14a   :  { %1323 = vmatprep.subr.bf16.mxu0 %v7487_v1 }
 0x14d   :  { %1324 = vmatpush1.bf16.msra.mxu0 %v6948_v48 }
 0x14e   :  { %1325 = vmatprep.subr.bf16.mxu0 %v7487_v1 }
 0x151   :  { %1326 = vmatpush1.bf16.msra.mxu0 %v6952_v51 }
 0x152   :  { %1327 = vmatprep.subr.bf16.mxu0 %v7487_v1 }
 0x155   :  { %1328 = vmatpush1.bf16.msra.mxu0 %v6956_v54 }
 0x156   :  { %1341 = vmatprep.subr.bf16.mxu0 %v7487_v1 }
 0x159   :  { %1342 = vmatpush2.bf16.msra.mxu0 %v6960_v57 }
 0x15a   :  { %1343 = vmatprep.subr.bf16.mxu0 %v7487_v1 }
 0x15d   :  { %1344 = vmatpush2.bf16.msra.mxu0 %v6964_v60 }
 0x15e   :  { %1689 = vmatprep.subr.bf16.mxu0 %v6970_v61 }
 0x1b8   :  { %v578_v62 = vpop.f32.mrf.mxu0  ;;  %v639_v63 = vpop.f32.mrf.mxu1 }
 0x1ba   :  { %v580_v0 = vpop.f32.mrf.mxu0  ;;  %v641_v2 = vpop.f32.mrf.mxu1 }
 0x1bc   :  { %v582_v3 = vpop.f32.mrf.mxu0  ;;  %v642_v4 = vpop.f32.mrf.mxu1 }
 0x1be   :  { %v7814_v6 = vpop.f32.mrf.mxu0  ;;  %v644_v7 = vpop.f32.mrf.mxu1 }
 0x1c0   :  { %v588_v11 = vpop.f32.mrf.mxu0  ;;  %v647_v12 = vpop.f32.mrf.mxu1 }
 0x1c2   :  { %v590_v13 = vpop.f32.mrf.mxu0  ;;  %v649_v17 = vpop.f32.mrf.mxu1 }
 0x1c4   :  { %v592_v18 = vpop.f32.mrf.mxu0  ;;  %v650_v19 = vpop.f32.mrf.mxu1 }
 0x1c6   :  { %v7816_v20 = vpop.f32.mrf.mxu0  ;;  %v652_v21 = vpop.f32.mrf.mxu1 }
 0x1c7   :  { %v6968_v21 = vld [vmem:[#allocation3 + $0x378] ss:$12 sps:$4 sm:$0xff]  }
 0x1c8   :  { %v598_v23 = vpop.f32.mrf.mxu0  ;;  %v655_v25 = vpop.f32.mrf.mxu1 }
 0x1ca   :  { %v600_v8 = vpop.f32.mrf.mxu0  ;;  %v657_v14 = vpop.f32.mrf.mxu1 }
 0x1cc   :  { %v602_v26 = vpop.f32.mrf.mxu0  ;;  %v658_v28 = vpop.f32.mrf.mxu1 }
 0x1ce   :  { %v603_v30 = vpop.f32.mrf.mxu0  ;;  %v659_v32 = vpop.f32.mrf.mxu1 }
 0x1e0   :  { %v864_v33 = vpop.f32.mrf.mxu0  ;;  %v925_v34 = vpop.f32.mrf.mxu1 }
 0x1e1   :  { %v7818_v35 = vadd.f32 %v864_v33, %v578_v62  ;;  %v7820_v36 = vadd.f32 %v925_v34, %v639_v63 }
 0x1e2   :  { %v866_v37 = vpop.f32.mrf.mxu0  ;;  %v927_v38 = vpop.f32.mrf.mxu1 }
 0x1e3   :  { %v7822_v39 = vadd.f32 %v866_v37, %v580_v0 }
 0x1e4   :  { %v868_v40 = vpop.f32.mrf.mxu0  ;;  %v928_v41 = vpop.f32.mrf.mxu1 }
 0x1e5   :  { %v7824_v42 = vadd.f32 %v868_v40, %v582_v3  ;;  %v7826_v43 = vadd.f32 %v928_v41, %v642_v4 }
 0x1e6   :  { %v7828_v44 = vpop.f32.mrf.mxu0  ;;  %v930_v45 = vpop.f32.mrf.mxu1 }
 0x1e8   :  { %v874_v46 = vpop.f32.mrf.mxu0  ;;  %v933_v47 = vpop.f32.mrf.mxu1 }
 0x1e9   :  { %v7830_v48 = vadd.f32 %v874_v46, %v588_v11  ;;  %v7832_v49 = vadd.f32 %v933_v47, %v647_v12  ;;  %v6965_v46 = vld [vmem:[%s9306_s27 + $0x3c] sm:$0xff]  }
 0x1ea   :  { %v876_v50 = vpop.f32.mrf.mxu0  ;;  %v935_v51 = vpop.f32.mrf.mxu1  ;;  %v6971_v47 = vld [vmem:[#allocation3 + $0x380] ss:$12 sps:$4 sm:$0xff]  }
 0x1eb   :  { %v7834_v52 = vadd.f32 %v876_v50, %v590_v13  ;;  %v6975_v50 = vld [vmem:[#allocation3 + $0x368] ss:$12 sps:$4 sm:$0xff]  }
 0x1ec   :  { %v878_v53 = vpop.f32.mrf.mxu0  ;;  %v936_v54 = vpop.f32.mrf.mxu1  ;;  %v6966_v51 = vld [vmem:[%s9306_s27 + $0x44] sm:$0xff]  }
 0x1ed   :  { %v7836_v55 = vadd.f32 %v878_v53, %v592_v18  ;;  %v7838_v56 = vadd.f32 %v936_v54, %v650_v19  ;;  %v6967_v53 = vld [vmem:[%s9306_s27 + $0x4c] ss:$0 sps:$4 sm:$0x33]   ;;  %v6978_v54 = vld [vmem:[#allocation3 + $0x34c] ss:$12 sps:$4 sm:$0xff]  }
 0x1ee   :  { %v7840_v57 = vpop.f32.mrf.mxu0  ;;  %v938_v58 = vpop.f32.mrf.mxu1 }
 0x1ef   :  { %v6976_v58 = vld [vmem:[#allocation3 + $0x348] ss:$12 sps:$4 sm:$0xff]  }
 0x1f0   :  { %v884_v59 = vpop.f32.mrf.mxu0  ;;  %v941_v60 = vpop.f32.mrf.mxu1 }
 0x1f1   :  { %v7842_v61 = vadd.f32 %v884_v59, %v598_v23  ;;  %v7844_v62 = vadd.f32 %v941_v60, %v655_v25  ;;  %v6974_v23 = vld [vmem:[#allocation3 + $0x364] ss:$12 sps:$4 sm:$0xff]   ;;  %v6982_v60 = vld [vmem:[#allocation3 + $0x334] ss:$12 sps:$4 sm:$0xff]  }
 0x1f2   :  { %v886_v63 = vpop.f32.mrf.mxu0  ;;  %v943_v0 = vpop.f32.mrf.mxu1  ;;  %v6979_v59 = vld [vmem:[#allocation3 + $0x350] ss:$12 sps:$4 sm:$0xff]  }
 0x1f3   :  { %v7846_v2 = vadd.f32 %v886_v63, %v600_v8  ;;  %v6972_v8 = vld [vmem:[#allocation3 + $0x360] ss:$12 sps:$4 sm:$0xff]   ;;  %v6980_v63 = vld [vmem:[#allocation3 + $0x330] ss:$12 sps:$4 sm:$0xff]   ;;  %v6983_v0 = vld [vmem:[#allocation3 + $0x338] ss:$12 sps:$4 sm:$0xff]  }
 0x1f4   :  { %v888_v3 = vpop.f32.mrf.mxu0  ;;  %v944_v4 = vpop.f32.mrf.mxu1 }
 0x1f5   :  { %v6986_v3 = vld [vmem:[#allocation3 + $0x31c] ss:$12 sps:$4 sm:$0xff]   ;;  %v6984_v4 = vld [vmem:[#allocation3 + $0x318] ss:$12 sps:$4 sm:$0xff]  }
 0x1f6   :  { %v889_v7 = vpop.f32.mrf.mxu0  ;;  %v945_v11 = vpop.f32.mrf.mxu1 }
 0x1f7   :  { %v6987_v7 = vld [vmem:[#allocation3 + $0x320] ss:$12 sps:$4 sm:$0xff]   ;;  %v6990_v11 = vld [vmem:[#allocation3 + $0x304] ss:$12 sps:$4 sm:$0xff]  }
 0x1f8   :  { %v1009_v12 = vpop.f32.mrf.mxu0 }
 0x1fa   :  { %v1011_v13 = vpop.f32.mrf.mxu0 }
 0x1fc   :  { %v1013_v17 = vpop.f32.mrf.mxu0 }
 0x1fd   :  { %v1036_v14 = vpack.c.bf16 %v1013_v17, %v1009_v12  ;;  %v6988_v12 = vld [vmem:[#allocation3 + $0x300] ss:$12 sps:$4 sm:$0xff]  }
 0x1fe   :  { %v1015_v18 = vpop.f32.mrf.mxu0  ;;  %v6994_v17 = vld [vmem:[#allocation3 + $0x2ec] ss:$12 sps:$4 sm:$0xff]  }
 0x1ff   :  { %v1037_v19 = vpack.c.bf16 %v1015_v18, %v1011_v13  ;;  %v6991_v13 = vld [vmem:[#allocation3 + $0x308] ss:$12 sps:$4 sm:$0xff]  }
 0x200   :  { %v1019_v26 = vpop.f32.mrf.mxu0  ;;  %v6992_v18 = vld [vmem:[#allocation3 + $0x2e8] ss:$12 sps:$4 sm:$0xff]  }
 0x201   :  { %5998 = vmatprep.mubr.msk.bf16.mxu1 %vm534_vm1, %v1037_v19  ;;  %6001 = vmatprep.mubr.msk.bf16.mxu0 %vm534_vm1, %v1037_v19  ;;  %v6995_v19 = vld [vmem:[#allocation3 + $0x2f0] ss:$12 sps:$4 sm:$0xff]  }
 0x202   :  { %v1021_v25 = vpop.f32.mrf.mxu0  ;;  %1285 = vmatmul.mubr.bf16.vlgmr.msra.gmra.mxu1 %v1036_v14  ;;  %1346 = vmatmul.mubr.bf16.vlgmr.msra.gmra.mxu0 %v1036_v14  ;;  %v6996_v14 = vld [vmem:[#allocation3 + $0x2d0] ss:$12 sps:$4 sm:$0xff]  }
 0x203   :  { %1419 = vmatpush1.bf16.msra.mxu1 %v7609_v9  ;;  %1690 = vmatpush1.bf16.msra.mxu0 %v6968_v21  ;;  %v6998_v21 = vld [vmem:[#allocation3 + $0x2d4] ss:$12 sps:$4 sm:$0xff]  }
 0x204   :  { %v1023_v28 = vpop.f32.mrf.mxu0  ;;  %1420 = vmatprep.subr.bf16.mxu1 %v7611_v10  ;;  %1691 = vmatprep.subr.bf16.mxu0 %v6974_v23  ;;  %v7002_v23 = vld [vmem:[#allocation3 + $0x3ac] ss:$12 sps:$4 sm:$0xff]  }
 0x205   :  { %v1038_v33 = vpack.c.bf16 %v1023_v28, %v1019_v26  ;;  %v6999_v26 = vld [vmem:[#allocation3 + $0x2d8] ss:$12 sps:$4 sm:$0xff]   ;;  %v7006_v28 = vld [vmem:[#allocation3 + $0x394] ss:$12 sps:$4 sm:$0xff]  }
 0x206   :  { %v1025_v30 = vpop.f32.mrf.mxu0 }
 0x207   :  { %v1039_v32 = vpack.c.bf16 %v1025_v30, %v1021_v25  ;;  %1421 = vmatpush1.bf16.msra.mxu1 %v7628_v15  ;;  %1692 = vmatpush1.bf16.msra.mxu0 %v6972_v8  ;;  %v7000_v25 = vld [vmem:[#allocation3 + $0x3a8] ss:$12 sps:$4 sm:$0xff]   ;;  %v7003_v8 = vld [vmem:[#allocation3 + $0x3b0] ss:$12 sps:$4 sm:$0xff]  }
 0x208   :  { %v1029_v34 = vpop.f32.mrf.mxu0  ;;  %1422 = vmatprep.subr.bf16.mxu1 %v7632_v16  ;;  %1693 = vmatprep.subr.bf16.mxu0 %v6978_v54  ;;  %v7004_v30 = vld [vmem:[#allocation3 + $0x390] ss:$12 sps:$4 sm:$0xff]  }
 0x209   :  { %5999 = vmatprep.mubr.msk.bf16.mxu1 %vm534_vm1, %v1039_v32  ;;  %6002 = vmatprep.mubr.msk.bf16.mxu0 %vm534_vm1, %v1039_v32  ;;  %v1040_v45 = vpack.c.bf16 %v1029_v34, %v1029_v34  ;;  %v7007_v32 = vld [vmem:[#allocation3 + $0x398] ss:$12 sps:$4 sm:$0xff]  }
 0x20a   :  { %v1031_v37 = vpop.f32.mrf.mxu0  ;;  %1295 = vmatmul.mubr.bf16.gmra.mxu1 %v1038_v33  ;;  %1354 = vmatmul.mubr.bf16.gmra.mxu0 %v1038_v33  ;;  %v7013_v33 = vld [vmem:[#allocation3 + $0x46c] ss:$12 sps:$4 sm:$0xff]  }
 0x20b   :  { %v1041_v38 = vpack.c.bf16 %v1031_v37, %v1031_v37  ;;  %1423 = vmatpush1.bf16.msra.mxu1 %v7651_v22  ;;  %1694 = vmatpush1.bf16.msra.mxu0 %v6976_v58 }
 0x20c   :  { %v1033_v40 = vpop.f32.mrf.mxu0  ;;  %1424 = vmatprep.subr.bf16.mxu1 %v7658_v24  ;;  %1695 = vmatprep.subr.bf16.mxu0 %v6982_v60 }
 0x20d   :  { %6000 = vmatprep.mubr.msk.bf16.mxu1 %vm534_vm1, %v1041_v38  ;;  %6003 = vmatprep.mubr.msk.bf16.mxu0 %vm534_vm1, %v1041_v38 }
 0x20e   :  { %v1034_v41 = vpop.f32.mrf.mxu0 }
 0x20f   :  { %1425 = vmatpush1.bf16.msra.mxu1 %v7668_v27  ;;  %1696 = vmatpush1.bf16.msra.mxu0 %v6980_v63 }
 0x210   :  { %1426 = vmatprep.subr.bf16.mxu1 %v7675_v29  ;;  %1697 = vmatprep.subr.bf16.mxu0 %v6986_v3 }
 0x212   :  { %1305 = vmatmul.mubr.bf16.gmra.mxu1 %v1040_v45  ;;  %1362 = vmatmul.mubr.bf16.gmra.mxu0 %v1040_v45 }
 0x213   :  { %1427 = vmatpush1.bf16.msra.mxu1 %v7682_v31  ;;  %1444 = vmatprep.mubr.bf16.mxu1 %v7487_v1 }
 0x214   :  { %1750 = vmatprep.subr.bf16.mxu1 %v7487_v1  ;;  %1698 = vmatpush1.bf16.msra.mxu0 %v6984_v4 }
 0x215   :  { %1699 = vmatprep.subr.bf16.mxu0 %v6990_v11 }
 0x218   :  { %1700 = vmatpush1.bf16.msra.mxu0 %v6988_v12 }
 0x219   :  { %1701 = vmatprep.subr.bf16.mxu0 %v6994_v17 }
 0x21a   :  { %6012 = vmatmul.mubr.msk.bf16.vlgmr.msra.gmra.mxu1 %vm121_vm0, %v6965_v46 }
 0x21b   :  { %1454 = vmatprep.mubr.bf16.mxu1 %v7487_v1  ;;  %1751 = vmatpush1.bf16.msra.mxu1 %v6971_v47 }
 0x21c   :  { %1752 = vmatprep.subr.bf16.mxu1 %v7487_v1  ;;  %1702 = vmatpush1.bf16.msra.mxu0 %v6992_v18 }
 0x21d   :  { %1703 = vmatprep.subr.bf16.mxu0 %v6998_v21 }
 0x21f   :  { %1753 = vmatpush1.bf16.msra.mxu1 %v6975_v50 }
 0x220   :  { %1754 = vmatprep.subr.bf16.mxu1 %v7487_v1  ;;  %1704 = vmatpush1.bf16.msra.mxu0 %v6996_v14 }
 0x221   :  { %1717 = vmatprep.subr.bf16.mxu0 %v7002_v23 }
 0x222   :  { %6013 = vmatmul.mubr.msk.bf16.gmra.mxu1 %vm121_vm0, %v6966_v51 }
 0x223   :  { %1464 = vmatprep.mubr.bf16.mxu1 %v7487_v1  ;;  %1755 = vmatpush1.bf16.msra.mxu1 %v6979_v59 }
 0x224   :  { %1756 = vmatprep.subr.bf16.mxu1 %v7487_v1  ;;  %1718 = vmatpush2.bf16.msra.mxu0 %v7000_v25 }
 0x225   :  { %1719 = vmatprep.subr.bf16.mxu0 %v7006_v28 }
 0x227   :  { %1757 = vmatpush1.bf16.msra.mxu1 %v6983_v0 }
 0x228   :  { %1758 = vmatprep.subr.bf16.mxu1 %v7487_v1  ;;  %1720 = vmatpush2.bf16.msra.mxu0 %v7004_v30  ;;  %v7017_v30 = vld [vmem:[#allocation3 + $0x454] ss:$12 sps:$4 sm:$0xff]  }
 0x229   :  { %1855 = vmatprep.subr.bf16.mxu0 %v7598_v5 }
 0x22a   :  { %6014 = vmatmul.mubr.msk.bf16.gmra.mxu1 %vm121_vm0, %v6967_v53 }
 0x22b   :  { %1759 = vmatpush1.bf16.msra.mxu1 %v6987_v7 }
 0x22c   :  { %1760 = vmatprep.subr.bf16.mxu1 %v7487_v1 }
 0x22f   :  { %1761 = vmatpush1.bf16.msra.mxu1 %v6991_v13 }
 0x230   :  { %1762 = vmatprep.subr.bf16.mxu1 %v7487_v1 }
 0x233   :  { %1763 = vmatpush1.bf16.msra.mxu1 %v6995_v19 }
 0x234   :  { %1764 = vmatprep.subr.bf16.mxu1 %v7487_v1 }
 0x237   :  { %1765 = vmatpush1.bf16.msra.mxu1 %v6999_v26 }
 0x238   :  { %1778 = vmatprep.subr.bf16.mxu1 %v7487_v1 }
 0x23b   :  { %1779 = vmatpush2.bf16.msra.mxu1 %v7003_v8  ;;  %v7011_v8 = vld [vmem:[#allocation3 + $0x468] ss:$12 sps:$4 sm:$0xff]  }
 0x23c   :  { %1780 = vmatprep.subr.bf16.mxu1 %v7487_v1 }
 0x23f   :  { %1781 = vmatpush2.bf16.msra.mxu1 %v7007_v32 }
 0x240   :  { %2126 = vmatprep.subr.bf16.mxu1 %v7013_v33 }
 0x2c2   :  { %v1286_v34 = vpop.f32.mrf.mxu1  ;;  %v1347_v37 = vpop.f32.mrf.mxu0 }
 0x2c3   :  { %v7890_v38 = vadd.f32 %v1286_v34, %v7818_v35  ;;  %v7893_v40 = vadd.f32 %v1347_v37, %v7820_v36 }
 0x2c4   :  { %v1288_v41 = vpop.f32.mrf.mxu1  ;;  %v1349_v45 = vpop.f32.mrf.mxu0 }
 0x2c5   :  { %v7896_v46 = vadd.f32 %v1288_v41, %v7822_v39 }
 0x2c6   :  { %v1290_v47 = vpop.f32.mrf.mxu1  ;;  %v1350_v50 = vpop.f32.mrf.mxu0 }
 0x2c7   :  { %v7899_v51 = vadd.f32 %v1290_v47, %v7824_v42  ;;  %v7902_v5 = vadd.f32 %v1350_v50, %v7826_v43  ;;  %v7021_v47 = vld [vmem:[#allocation3 + $0x43c] ss:$12 sps:$4 sm:$0xff]   ;;  %v7019_v50 = vld [vmem:[#allocation3 + $0x438] ss:$12 sps:$4 sm:$0xff]  }
 0x2c8   :  { %v7904_v53 = vpop.f32.mrf.mxu1  ;;  %v1352_v35 = vpop.f32.mrf.mxu0 }
 0x2c9   :  { %v7022_v35 = vld [vmem:[#allocation3 + $0x440] ss:$12 sps:$4 sm:$0xff]  }
 0x2ca   :  { %v1296_v54 = vpop.f32.mrf.mxu1  ;;  %v1355_v58 = vpop.f32.mrf.mxu0 }
 0x2cb   :  { %v7907_v36 = vadd.f32 %v1296_v54, %v7830_v48  ;;  %v7910_v59 = vadd.f32 %v1355_v58, %v7832_v49  ;;  %v7025_v54 = vld [vmem:[#allocation3 + $0x424] ss:$12 sps:$4 sm:$0xff]   ;;  %v7023_v58 = vld [vmem:[#allocation3 + $0x420] ss:$12 sps:$4 sm:$0xff]  }
 0x2cc   :  { %v1298_v39 = vpop.f32.mrf.mxu1  ;;  %v1357_v60 = vpop.f32.mrf.mxu0 }
 0x2cd   :  { %v7913_v63 = vadd.f32 %v1298_v39, %v7834_v52  ;;  %v7026_v39 = vld [vmem:[#allocation3 + $0x428] ss:$12 sps:$4 sm:$0xff]   ;;  %v7029_v60 = vld [vmem:[#allocation3 + $0x40c] ss:$12 sps:$4 sm:$0xff]  }
 0x2ce   :  { %v1300_v42 = vpop.f32.mrf.mxu1  ;;  %v1358_v0 = vpop.f32.mrf.mxu0 }
 0x2cf   :  { %v7916_v43 = vadd.f32 %v1300_v42, %v7836_v55  ;;  %v7919_v3 = vadd.f32 %v1358_v0, %v7838_v56  ;;  %v7027_v42 = vld [vmem:[#allocation3 + $0x408] ss:$12 sps:$4 sm:$0xff]   ;;  %v7030_v0 = vld [vmem:[#allocation3 + $0x410] ss:$12 sps:$4 sm:$0xff]  }
 0x2d0   :  { %v7921_v4 = vpop.f32.mrf.mxu1  ;;  %v1360_v48 = vpop.f32.mrf.mxu0 }
 0x2d1   :  { %v7033_v48 = vld [vmem:[#allocation3 + $0x3f4] ss:$12 sps:$4 sm:$0xff]  }
 0x2d2   :  { %v1306_v7 = vpop.f32.mrf.mxu1  ;;  %v1363_v11 = vpop.f32.mrf.mxu0 }
 0x2d3   :  { %v7924_v49 = vadd.f32 %v1306_v7, %v7842_v61  ;;  %v7927_v12 = vadd.f32 %v1363_v11, %v7844_v62  ;;  %v7031_v7 = vld [vmem:[#allocation3 + $0x3f0] ss:$12 sps:$4 sm:$0xff]   ;;  %v7034_v11 = vld [vmem:[#allocation3 + $0x3f8] ss:$12 sps:$4 sm:$0xff]  }
 0x2d4   :  { %v1308_v52 = vpop.f32.mrf.mxu1  ;;  %v1365_v13 = vpop.f32.mrf.mxu0 }
 0x2d5   :  { %v7930_v17 = vadd.f32 %v1308_v52, %v7846_v2  ;;  %v7015_v2 = vld [vmem:[#allocation3 + $0x450] ss:$12 sps:$4 sm:$0xff]   ;;  %v7035_v13 = vld [vmem:[#allocation3 + $0x3d8] ss:$12 sps:$4 sm:$0xff]  }
 0x2d6   :  { %v1310_v55 = vpop.f32.mrf.mxu1  ;;  %v1366_v18 = vpop.f32.mrf.mxu0  ;;  %v7037_v52 = vld [vmem:[#allocation3 + $0x3dc] ss:$12 sps:$4 sm:$0xff]  }
 0x2d7   :  { %v7038_v55 = vld [vmem:[#allocation3 + $0x3e0] ss:$12 sps:$4 sm:$0xff]   ;;  %v7041_v18 = vld [vmem:[#allocation3 + $0x3c4] ss:$12 sps:$4 sm:$0xff]  }
 0x2d8   :  { %v1311_v56 = vpop.f32.mrf.mxu1  ;;  %v1367_v19 = vpop.f32.mrf.mxu0 }
 0x2d9   :  { %v7039_v56 = vld [vmem:[#allocation3 + $0x3c0] ss:$12 sps:$4 sm:$0xff]   ;;  %v7042_v19 = vld [vmem:[#allocation3 + $0x3c8] ss:$12 sps:$4 sm:$0xff]  }
 0x2da   :  { %v1446_v21 = vpop.f32.mrf.mxu1 }
 0x2dc   :  { %v1448_v14 = vpop.f32.mrf.mxu1 }
 0x2de   :  { %v1450_v26 = vpop.f32.mrf.mxu1 }
 0x2df   :  { %v1473_v61 = vpack.c.bf16 %v1450_v26, %v1446_v21  ;;  %v7045_v21 = vld [vmem:[#allocation3 + $0x49c] ss:$12 sps:$4 sm:$0xff]   ;;  %v7046_v26 = vld [vmem:[#allocation3 + $0x4a0] ss:$12 sps:$4 sm:$0xff]  }
 0x2e0   :  { %v1452_v23 = vpop.f32.mrf.mxu1 }
 0x2e1   :  { %v1474_v25 = vpack.c.bf16 %v1452_v23, %v1448_v14  ;;  %v7043_v14 = vld [vmem:[#allocation3 + $0x498] ss:$12 sps:$4 sm:$0xff]  }
 0x2e2   :  { %v1456_v28 = vpop.f32.mrf.mxu1  ;;  %v7049_v23 = vld [vmem:[#allocation3 + $0x484] ss:$12 sps:$4 sm:$0xff]  }
 0x2e3   :  { %6045 = vmatprep.mubr.msk.bf16.mxu0 %vm534_vm1, %v1474_v25  ;;  %6048 = vmatprep.mubr.msk.bf16.mxu1 %vm534_vm1, %v1474_v25  ;;  %v7047_v25 = vld [vmem:[#allocation3 + $0x480] ss:$12 sps:$4 sm:$0xff]  }
 0x2e4   :  { %v1458_v62 = vpop.f32.mrf.mxu1  ;;  %1722 = vmatmul.mubr.bf16.vlgmr.msra.gmra.mxu0 %v1473_v61  ;;  %1783 = vmatmul.mubr.bf16.vlgmr.msra.gmra.mxu1 %v1473_v61 }
 0x2e5   :  { %1856 = vmatpush1.bf16.msra.mxu0 %v7609_v9  ;;  %2127 = vmatpush1.bf16.msra.mxu1 %v7011_v8  ;;  %v7050_v8 = vld [vmem:[#allocation3 + $0x488] ss:$12 sps:$4 sm:$0xff]  }
 0x2e6   :  { %v1460_v32 = vpop.f32.mrf.mxu1  ;;  %1857 = vmatprep.subr.bf16.mxu0 %v7611_v10  ;;  %2128 = vmatprep.subr.bf16.mxu1 %v7017_v30 }
 0x2e7   :  { %v1475_v37 = vpack.c.bf16 %v1460_v32, %v1456_v28 }
 0x2e8   :  { %v1462_v33 = vpop.f32.mrf.mxu1 }
 0x2e9   :  { %v1476_v34 = vpack.c.bf16 %v1462_v33, %v1458_v62  ;;  %1858 = vmatpush1.bf16.msra.mxu0 %v7628_v15  ;;  %2129 = vmatpush1.bf16.msra.mxu1 %v7015_v2 }
 0x2ea   :  { %v1466_v41 = vpop.f32.mrf.mxu1  ;;  %1859 = vmatprep.subr.bf16.mxu0 %v7632_v16  ;;  %2130 = vmatprep.subr.bf16.mxu1 %v7021_v47 }
 0x2eb   :  { %6046 = vmatprep.mubr.msk.bf16.mxu0 %vm534_vm1, %v1476_v34  ;;  %6049 = vmatprep.mubr.msk.bf16.mxu1 %vm534_vm1, %v1476_v34  ;;  %v1477_v16 = vpack.c.bf16 %v1466_v41, %v1466_v41 }
 0x2ec   :  { %v1468_v9 = vpop.f32.mrf.mxu1  ;;  %1732 = vmatmul.mubr.bf16.gmra.mxu0 %v1475_v37  ;;  %1791 = vmatmul.mubr.bf16.gmra.mxu1 %v1475_v37 }
 0x2ed   :  { %v1478_v45 = vpack.c.bf16 %v1468_v9, %v1468_v9  ;;  %1860 = vmatpush1.bf16.msra.mxu0 %v7651_v22  ;;  %v7008_v22 = vld [vmem:[%s9306_s27 + $0x50] sm:$0xff]   ;;  %2131 = vmatpush1.bf16.msra.mxu1 %v7019_v50 }
 0x2ee   :  { %v1470_v10 = vpop.f32.mrf.mxu1  ;;  %1861 = vmatprep.subr.bf16.mxu0 %v7658_v24  ;;  %v7014_v24 = vld [vmem:[#allocation3 + $0x470] ss:$12 sps:$4 sm:$0xff]   ;;  %2132 = vmatprep.subr.bf16.mxu1 %v7025_v54 }
 0x2ef   :  { %6047 = vmatprep.mubr.msk.bf16.mxu0 %vm534_vm1, %v1478_v45  ;;  %6050 = vmatprep.mubr.msk.bf16.mxu1 %vm534_vm1, %v1478_v45 }
 0x2f0   :  { %v1471_v15 = vpop.f32.mrf.mxu1 }
 0x2f1   :  { %1862 = vmatpush1.bf16.msra.mxu0 %v7668_v27  ;;  %v7018_v27 = vld [vmem:[#allocation3 + $0x458] ss:$12 sps:$4 sm:$0xff]   ;;  %2133 = vmatpush1.bf16.msra.mxu1 %v7023_v58 }
 0x2f2   :  { %1863 = vmatprep.subr.bf16.mxu0 %v7675_v29  ;;  %v7009_v29 = vld [vmem:[%s9306_s27 + $0x58] sm:$0xff]   ;;  %2134 = vmatprep.subr.bf16.mxu1 %v7029_v60 }
 0x2f4   :  { %1742 = vmatmul.mubr.bf16.gmra.mxu0 %v1477_v16  ;;  %1799 = vmatmul.mubr.bf16.gmra.mxu1 %v1477_v16 }
 0x2f5   :  { %1864 = vmatpush1.bf16.msra.mxu0 %v7682_v31  ;;  %1881 = vmatprep.mubr.bf16.mxu0 %v7487_v1  ;;  %v7010_v31 = vld [vmem:[%s9306_s27 + $0x60] ss:$0 sps:$4 sm:$0x33]  }
 0x2f6   :  { %2187 = vmatprep.subr.bf16.mxu0 %v7487_v1  ;;  %2135 = vmatpush1.bf16.msra.mxu1 %v7027_v42 }
 0x2f7   :  { %2136 = vmatprep.subr.bf16.mxu1 %v7033_v48 }
 0x2fa   :  { %2137 = vmatpush1.bf16.msra.mxu1 %v7031_v7 }
 0x2fb   :  { %2138 = vmatprep.subr.bf16.mxu1 %v7037_v52 }
 0x2fc   :  { %6059 = vmatmul.mubr.msk.bf16.vlgmr.msra.gmra.mxu0 %vm121_vm0, %v7008_v22 }
 0x2fd   :  { %1891 = vmatprep.mubr.bf16.mxu0 %v7487_v1  ;;  %2188 = vmatpush1.bf16.msra.mxu0 %v7014_v24 }
 0x2fe   :  { %2189 = vmatprep.subr.bf16.mxu0 %v7487_v1  ;;  %2139 = vmatpush1.bf16.msra.mxu1 %v7035_v13 }
 0x2ff   :  { %2140 = vmatprep.subr.bf16.mxu1 %v7041_v18 }
 0x301   :  { %2190 = vmatpush1.bf16.msra.mxu0 %v7018_v27 }
 0x302   :  { %2191 = vmatprep.subr.bf16.mxu0 %v7487_v1  ;;  %2141 = vmatpush1.bf16.msra.mxu1 %v7039_v56 }
 0x303   :  { %2154 = vmatprep.subr.bf16.mxu1 %v7045_v21 }
 0x304   :  { %6060 = vmatmul.mubr.msk.bf16.gmra.mxu0 %vm121_vm0, %v7009_v29 }
 0x305   :  { %1901 = vmatprep.mubr.bf16.mxu0 %v7487_v1  ;;  %2192 = vmatpush1.bf16.msra.mxu0 %v7022_v35 }
 0x306   :  { %2193 = vmatprep.subr.bf16.mxu0 %v7487_v1  ;;  %2155 = vmatpush2.bf16.msra.mxu1 %v7043_v14 }
 0x307   :  { %2156 = vmatprep.subr.bf16.mxu1 %v7049_v23 }
 0x309   :  { %2194 = vmatpush1.bf16.msra.mxu0 %v7026_v39 }
 0x30a   :  { %2195 = vmatprep.subr.bf16.mxu0 %v7487_v1  ;;  %2157 = vmatpush2.bf16.msra.mxu1 %v7047_v25  ;;  %v2260_v25 = vlaneseq }
 0x30c   :  { %6061 = vmatmul.mubr.msk.bf16.gmra.mxu0 %vm121_vm0, %v7010_v31 }
 0x30d   :  { %2196 = vmatpush1.bf16.msra.mxu0 %v7030_v0 }
 0x30e   :  { %2197 = vmatprep.subr.bf16.mxu0 %v7487_v1 }
 0x311   :  { %2198 = vmatpush1.bf16.msra.mxu0 %v7034_v11 }
 0x312   :  { %2199 = vmatprep.subr.bf16.mxu0 %v7487_v1 }
 0x315   :  { %2200 = vmatpush1.bf16.msra.mxu0 %v7038_v55 }
 0x316   :  { %2201 = vmatprep.subr.bf16.mxu0 %v7487_v1 }
 0x319   :  { %2202 = vmatpush1.bf16.msra.mxu0 %v7042_v19 }
 0x31a   :  { %2215 = vmatprep.subr.bf16.mxu0 %v7487_v1 }
 0x31d   :  { %2216 = vmatpush2.bf16.msra.mxu0 %v7046_v26 }
 0x31e   :  { %2217 = vmatprep.subr.bf16.mxu0 %v7487_v1 }
 0x321   :  { %2218 = vmatpush2.bf16.msra.mxu0 %v7050_v8  ;;  %v2261_v8 = vshrl.u32 %v2260_v25, 7 }
 0x3a4   :  { %v1723_v61 = vpop.f32.mrf.mxu0  ;;  %v1784_v28 = vpop.f32.mrf.mxu1 }
 0x3a5   :  { %v7973_v30 = vadd.f32 %v1723_v61, %v7890_v38  ;;  %v7976_v62 = vadd.f32 %v1784_v28, %v7893_v40  ;;  %v8023_v61 = vsub.s32 0, %v2261_v8  ;;  %v2258_v28 = vld [vmem:[%s9286_s3] sm:$0x7] }
 0x3a6   :  { %v1725_v2 = vpop.f32.mrf.mxu0  ;;  %v1786_v32 = vpop.f32.mrf.mxu1 }
 0x3a7   :  { %v7979_v33 = vadd.f32 %v1725_v2, %v7896_v46  ;;  %v2270_v2 = vsub.s32 2, %v2261_v8  ;;  %v8028_v32 = vsub.s32 1, %v2261_v8 }
 0x3a8   :  { %v1727_v34 = vpop.f32.mrf.mxu0  ;;  %v1787_v37 = vpop.f32.mrf.mxu1 }
 0x3a9   :  { %v7982_v41 = vadd.f32 %v1727_v34, %v7899_v51  ;;  %v7985_v9 = vadd.f32 %v1787_v37, %v7902_v5 }
 0x3aa   :  { %v7987_v45 = vpop.f32.mrf.mxu0  ;;  %v1789_v38 = vpop.f32.mrf.mxu1 }
 0x3ab   :  { %v871_v38 = vadd.f32 %v7828_v44, %v7814_v6 }
 0x3ac   :  { %v1733_v10 = vpop.f32.mrf.mxu0  ;;  %v1792_v15 = vpop.f32.mrf.mxu1 }
 0x3ad   :  { %v7990_v40 = vadd.f32 %v1733_v10, %v7907_v36  ;;  %v7993_v16 = vadd.f32 %v1792_v15, %v7910_v59  ;;  %v8034_v15 = vrot.slane %v2258_v28, %v8023_v61 }
 0x3ae   :  { %v1735_v46 = vpop.f32.mrf.mxu0  ;;  %v1794_v22 = vpop.f32.mrf.mxu1 }
 0x3af   :  { %v7996_v24 = vadd.f32 %v1735_v46, %v7913_v63  ;;  %v8037_v22 = vrot.slane %v2258_v28, %v2270_v2 }
 0x3b0   :  { %v1737_v51 = vpop.f32.mrf.mxu0  ;;  %v1795_v27 = vpop.f32.mrf.mxu1 }
 0x3b1   :  { %v7999_v5 = vadd.f32 %v1737_v51, %v7916_v43  ;;  %v8002_v29 = vadd.f32 %v1795_v27, %v7919_v3 }
 0x3b2   :  { %v8004_v31 = vpop.f32.mrf.mxu0  ;;  %v1797_v36 = vpop.f32.mrf.mxu1 }
 0x3b3   :  { %v1373_v36 = vadd.f32 %v7904_v53, %v871_v38 }
 0x3b4   :  { %v1743_v47 = vpop.f32.mrf.mxu0  ;;  %v1800_v50 = vpop.f32.mrf.mxu1 }
 0x3b5   :  { %v8007_v59 = vadd.f32 %v1743_v47, %v7924_v49  ;;  %v8010_v35 = vadd.f32 %v1800_v50, %v7927_v12  ;;  %v8042_v50 = vrot.slane %v2258_v28, %v8028_v32  ;;  %v1810_v44 = vadd.f32 %v7987_v45, %v1373_v36 }
 0x3b6   :  { %v1745_v63 = vpop.f32.mrf.mxu0  ;;  %v1802_v54 = vpop.f32.mrf.mxu1 }
 0x3b7   :  { %v8013_v58 = vadd.f32 %v1745_v63, %v7930_v17 }
 0x3b8   :  { %v1747_v43 = vpop.f32.mrf.mxu0  ;;  %v1803_v39 = vpop.f32.mrf.mxu1 }
 0x3ba   :  { %v1748_v3 = vpop.f32.mrf.mxu0  ;;  %v1804_v60 = vpop.f32.mrf.mxu1 }
 0x3bc   :  { %v1883_v42 = vpop.f32.mrf.mxu0 }
 0x3be   :  { %v1885_v0 = vpop.f32.mrf.mxu0 }
 0x3c0   :  { %v1887_v48 = vpop.f32.mrf.mxu0 }
 0x3c1   :  { %v1910_v52 = vpack.c.bf16 %v1887_v48, %v1883_v42  ;;  %v881_v42 = vadd.f32 %v7840_v57, %v7816_v20 }
 0x3c2   :  { %v1889_v7 = vpop.f32.mrf.mxu0 }
 0x3c3   :  { %v1911_v11 = vpack.c.bf16 %v1889_v7, %v1885_v0 }
 0x3c4   :  { %v1893_v49 = vpop.f32.mrf.mxu0 }
 0x3c5   :  { %6092 = vmatprep.mubr.msk.bf16.mxu1 %vm534_vm1, %v1911_v11  ;;  %6095 = vmatprep.mubr.msk.bf16.mxu0 %vm534_vm1, %v1911_v11 }
 0x3c6   :  { %v1895_v12 = vpop.f32.mrf.mxu0  ;;  %2159 = vmatmul.mubr.bf16.vlgmr.msra.gmra.mxu1 %v1910_v52  ;;  %2220 = vmatmul.mubr.bf16.vlgmr.msra.gmra.mxu0 %v1910_v52 }
 0x3c8   :  { %v1897_v17 = vpop.f32.mrf.mxu0 }
 0x3c9   :  { %v1912_v18 = vpack.c.bf16 %v1897_v17, %v1893_v49 }
 0x3ca   :  { %v1899_v13 = vpop.f32.mrf.mxu0 }
 0x3cb   :  { %v1913_v55 = vpack.c.bf16 %v1899_v13, %v1895_v12 }
 0x3cc   :  { %v1903_v56 = vpop.f32.mrf.mxu0 }
 0x3cd   :  { %6093 = vmatprep.mubr.msk.bf16.mxu1 %vm534_vm1, %v1913_v55  ;;  %6096 = vmatprep.mubr.msk.bf16.mxu0 %vm534_vm1, %v1913_v55  ;;  %v1914_v23 = vpack.c.bf16 %v1903_v56, %v1903_v56  ;;  %v1379_v55 = vadd.f32 %v7921_v4, %v881_v42 }
 0x3ce   :  { %v1905_v19 = vpop.f32.mrf.mxu0  ;;  %2169 = vmatmul.mubr.bf16.gmra.mxu1 %v1912_v18  ;;  %2228 = vmatmul.mubr.bf16.gmra.mxu0 %v1912_v18 }
 0x3cf   :  { %v1915_v21 = vpack.c.bf16 %v1905_v19, %v1905_v19 }
 0x3d0   :  { %v1907_v14 = vpop.f32.mrf.mxu0 }
 0x3d1   :  { %6094 = vmatprep.mubr.msk.bf16.mxu1 %vm534_vm1, %v1915_v21  ;;  %6097 = vmatprep.mubr.msk.bf16.mxu0 %vm534_vm1, %v1915_v21 }
 0x3d2   :  { %v1908_v26 = vpop.f32.mrf.mxu0 }
 0x3d6   :  { %2179 = vmatmul.mubr.bf16.gmra.mxu1 %v1914_v23  ;;  %2236 = vmatmul.mubr.bf16.gmra.mxu0 %v1914_v23 }
 0x3d7   :  { %2501 = vmatprep.mubr.bf16.mxu0 %v7487_v1  ;;  %2367 = vmatprep.mubr.bf16.mxu1 %v7487_v1 }
 0x486   :  { %v2160_v34 = vpop.f32.mrf.mxu1  ;;  %v2221_v37 = vpop.f32.mrf.mxu0 }
 0x487   :  { %v2243_v10 = vadd.f32 %v2160_v34, %v7973_v30  ;;  %v2245_v46 = vadd.f32 %v2221_v37, %v7976_v62 }
 0x488   :  { %v2162_v51 = vpop.f32.mrf.mxu1  ;;  %v2223_v27 = vpop.f32.mrf.mxu0 }
 0x489   :  { %v2244_v47 = vadd.f32 %v2162_v51, %v7979_v33  ;;  %v2275_v30 = vadd.f32 %v8034_v15, %v2243_v10  ;;  %v2277_v62 = vadd.f32 %v8037_v22, %v2245_v46 }
 0x48a   :  { %v2164_v63 = vpop.f32.mrf.mxu1  ;;  %v2224_v6 = vpop.f32.mrf.mxu0 }
 0x48b   :  { %v2246_v54 = vadd.f32 %v2164_v63, %v7982_v41  ;;  %v2248_v43 = vadd.f32 %v2224_v6, %v7985_v9  ;;  %v2276_v53 = vadd.f32 %v8042_v50, %v2244_v47  ;;  %v2290_v7 = vmax.f32 %v2275_v30, 0.0 }
 0x48c   :  { %v2166_v39 = vpop.f32.mrf.mxu1  ;;  %v2226_v3 = vpop.f32.mrf.mxu0  ;;  %v2292_v52 = vmax.f32 %v2277_v62, 0.0 }
 0x48d   :  { %v2278_v33 = vadd.f32 %v8034_v15, %v2246_v54  ;;  %v2247_v60 = vadd.f32 %v2166_v39, %v1810_v44  ;;  %v2280_v45 = vadd.f32 %v8037_v22, %v2248_v43  ;;  %v2291_v18 = vmax.f32 %v2276_v53, 0.0 }
 0x48e   :  { %v2170_v0 = vpop.f32.mrf.mxu1  ;;  %v2229_v48 = vpop.f32.mrf.mxu0 }
 0x48f   :  { %v2293_v41 = vmax.f32 %v2278_v33, 0.0  ;;  %v2279_v11 = vadd.f32 %v8042_v50, %v2247_v60  ;;  %v2249_v9 = vadd.f32 %v2170_v0, %v7990_v40  ;;  %v2295_v49 = vmax.f32 %v2280_v45, 0.0 }
 0x490   :  { %v2251_v12 = vadd.f32 %v2229_v48, %v7993_v16  ;;  %v2172_v17 = vpop.f32.mrf.mxu1  ;;  %v2231_v13 = vpop.f32.mrf.mxu0  ;;  %v1816_v40 = vadd.f32 %v8004_v31, %v1379_v55  ;;  %v7064_v55 = vld [vmem:[%s9288_s5 + $0x164] ss:$8 sps:$4 sm:$0xff]  }
 0x491   :  { %v8058_v20 = vpack.c.bf16 %v2293_v41, %v2290_v7  ;;  %v2294_v57 = vmax.f32 %v2279_v11, 0.0  ;;  %v8060_v56 = vpack.c.bf16 %v2295_v49, %v2292_v52  ;;  %v2250_v19 = vadd.f32 %v2172_v17, %v7996_v24  ;;  %v7051_v7 = vld [vmem:[%s9287_s4 + $0x8] sm:$0x7f]   ;;  %v7052_v41 = vld [vmem:[%s9287_s4] sm:$0x7f]  }
 0x492   :  { %v2174_v21 = vpop.f32.mrf.mxu1  ;;  %v2232_v14 = vpop.f32.mrf.mxu0  ;;  %v2281_v16 = vadd.f32 %v8034_v15, %v2249_v9  ;;  %v2283_v4 = vadd.f32 %v8037_v22, %v2251_v12  ;;  %v7488_v11 = vmov 0.0   ;;  %v7053_v9 = vld [vmem:[%s9288_s5 + $0x190] ss:$8 sps:$4 sm:$0xff]   ;;  %v7058_v52 = vld [vmem:[%s9288_s5 + $0x184] ss:$8 sps:$4 sm:$0xff]  }
 0x493   :  { %v8064_v26 = vpack.c.bf16 %v2294_v57, %v2291_v18  ;;  %v2252_v23 = vadd.f32 %v2174_v21, %v7999_v5  ;;  %v2254_v25 = vadd.f32 %v2232_v14, %v8002_v29  ;;  %v2282_v2 = vadd.f32 %v8042_v50, %v2250_v19  ;;  %v7056_v12 = vld [vmem:[%s9288_s5 + $0x180] ss:$8 sps:$4 sm:$0xff]   ;;  %v7061_v17 = vld [vmem:[%s9288_s5 + $0x174] ss:$8 sps:$4 sm:$0xff]   ;;  %v7059_v13 = vld [vmem:[%s9288_s5 + $0x170] ss:$8 sps:$4 sm:$0xff]  }
 0x494   :  { %v2176_v8 = vpop.f32.mrf.mxu1  ;;  %v2234_v28 = vpop.f32.mrf.mxu0  ;;  %v2296_v10 = vmax.f32 %v2281_v16, 0.0  ;;  %v2298_v27 = vmax.f32 %v2283_v4, 0.0  ;;  %v7062_v18 = vld [vmem:[%s9288_s5 + $0x160] ss:$8 sps:$4 sm:$0xff]   ;;  %v7067_v57 = vld [vmem:[%s9288_s5 + $0x154] ss:$8 sps:$4 sm:$0xff]  }
 0x495   :  { %v2284_v24 = vadd.f32 %v8034_v15, %v2252_v23  ;;  %v2253_v34 = vadd.f32 %v2176_v8, %v1816_v40  ;;  %v2286_v37 = vadd.f32 %v8037_v22, %v2254_v25  ;;  %v2297_v63 = vmax.f32 %v2282_v2, 0.0  ;;  %v7065_v19 = vld [vmem:[%s9288_s5 + $0x150] ss:$8 sps:$4 sm:$0xff]   ;;  %v7070_v21 = vld [vmem:[%s9288_s5 + $0x144] ss:$8 sps:$4 sm:$0xff]  }
 0x496   :  { %v2180_v31 = vpop.f32.mrf.mxu1  ;;  %v2237_v38 = vpop.f32.mrf.mxu0  ;;  %v7068_v14 = vld [vmem:[%s9288_s5 + $0x140] ss:$8 sps:$4 sm:$0xff]   ;;  %v7073_v40 = vld [vmem:[%s9288_s5 + $0x134] ss:$8 sps:$4 sm:$0xff]   ;;  %v7071_v16 = vld [vmem:[%s9288_s5 + $0x130] ss:$8 sps:$4 sm:$0xff]  }
 0x497   :  { %v2299_v46 = vmax.f32 %v2284_v24, 0.0  ;;  %v2285_v51 = vadd.f32 %v8042_v50, %v2253_v34  ;;  %v2255_v5 = vadd.f32 %v2180_v31, %v8007_v59  ;;  %v2301_v36 = vmax.f32 %v2286_v37, 0.0  ;;  %v7076_v23 = vld [vmem:[%s9288_s5 + $0x124] ss:$8 sps:$4 sm:$0xff]   ;;  %v7074_v4 = vld [vmem:[%s9288_s5 + $0x120] ss:$8 sps:$4 sm:$0xff]  }
 0x498   :  { %v2182_v29 = vpop.f32.mrf.mxu1  ;;  %v2239_v47 = vpop.f32.mrf.mxu0  ;;  %v2257_v45 = vadd.f32 %v2237_v38, %v8010_v35  ;;  %v7079_v25 = vld [vmem:[%s9288_s5 + $0x214] ss:$8 sps:$4 sm:$0xff]   ;;  %v7077_v8 = vld [vmem:[%s9288_s5 + $0x210] ss:$8 sps:$4 sm:$0xff]   ;;  %v7082_v28 = vld [vmem:[%s9288_s5 + $0x204] ss:$8 sps:$4 sm:$0xff]  }
 0x499   :  { %v8075_v6 = vpack.c.bf16 %v2299_v46, %v2296_v10  ;;  %v2300_v44 = vmax.f32 %v2285_v51, 0.0  ;;  %v2287_v30 = vadd.f32 %v8034_v15, %v2255_v5  ;;  %v8078_v54 = vpack.c.bf16 %v2301_v36, %v2298_v27  ;;  %v7080_v2 = vld [vmem:[%s9288_s5 + $0x200] ss:$8 sps:$4 sm:$0xff]   ;;  %v7085_v24 = vld [vmem:[%s9288_s5 + $0x1f4] ss:$8 sps:$4 sm:$0xff]  }
 0x49a   :  { %v2256_v62 = vadd.f32 %v2182_v29, %v8013_v58  ;;  %v2184_v43 = vpop.f32.mrf.mxu1  ;;  %v2240_v39 = vpop.f32.mrf.mxu0  ;;  %v2289_v58 = vadd.f32 %v8037_v22, %v2257_v45  ;;  %v7055_v22 = vld [vmem:[%s9288_s5 + $0x194] ss:$8 sps:$4 sm:$0xff]   ;;  %v7083_v34 = vld [vmem:[%s9288_s5 + $0x1f0] ss:$8 sps:$4 sm:$0xff]   ;;  %v7088_v37 = vld [vmem:[%s9288_s5 + $0x1e4] ss:$8 sps:$4 sm:$0xff]  }
 0x49b   :  { %v8081_v3 = vpack.c.bf16 %v2300_v44, %v2297_v63  ;;  %v2302_v53 = vmax.f32 %v2287_v30, 0.0  ;;  %v7086_v31 = vld [vmem:[%s9288_s5 + $0x1e0] ss:$8 sps:$4 sm:$0xff]   ;;  %v7091_v38 = vld [vmem:[%s9288_s5 + $0x1d4] ss:$8 sps:$4 sm:$0xff]  }
 0x49c   :  { %v2288_v59 = vadd.f32 %v8042_v50, %v2256_v62  ;;  %v2185_v33 = vpop.f32.mrf.mxu1  ;;  %v2241_v60 = vpop.f32.mrf.mxu0  ;;  %v2304_v35 = vmax.f32 %v2289_v58, 0.0  ;;  %v7089_v10 = vld [vmem:[%s9288_s5 + $0x1d0] ss:$8 sps:$4 sm:$0xff]   ;;  %v7094_v46 = vld [vmem:[%s9288_s5 + $0x1c4] ss:$8 sps:$4 sm:$0xff]  }
 0x49d   :  { %v2311_v42 = vpack.c.bf16 %v2302_v53, %v2302_v53  ;;  %v7092_v51 = vld [vmem:[%s9288_s5 + $0x1c0] ss:$8 sps:$4 sm:$0xff]   ;;  %v7097_v5 = vld [vmem:[%s9288_s5 + $0x1b4] ss:$8 sps:$4 sm:$0xff]   ;;  %v7095_v27 = vld [vmem:[%s9288_s5 + $0x1b0] ss:$8 sps:$4 sm:$0xff]  }
 0x49e   :  { %v2303_v0 = vmax.f32 %v2288_v59, 0.0  ;;  %v2313_v50 = vpack.c.bf16 %v2304_v35, %v2304_v35  ;;  %v7100_v36 = vld [vmem:[%s9288_s5 + $0x1a4] ss:$8 sps:$4 sm:$0xff]   ;;  %v7098_v29 = vld [vmem:[%s9288_s5 + $0x1a0] ss:$8 sps:$4 sm:$0xff]  }
 0x49f   :  { %v8088_v15 = vsel %vm2325_vm2, %v2311_v42, 0  ;;  %v7103_v47 = vld [vmem:[%s9288_s5 + $0x114] ss:$8 sps:$4 sm:$0xff]   ;;  %v7107_v63 = vld [vmem:[%s9288_s5 + $0x230] ss:$8 sps:$4 sm:$0xff]  }
 0x4a0   :  { %v8085_v48 = vpack.c.bf16 %v2303_v0, %v2303_v0  ;;  %v8122_v49 = vsel %vm2325_vm2, %v2313_v50, 0  ;;  %v7109_v44 = vld [vmem:[%s9288_s5 + $0x234] ss:$8 sps:$4 sm:$0xff]   ;;  %v7112_v30 = vld [vmem:[%s9288_s5 + $0x224] ss:$8 sps:$4 sm:$0xff]  }
 0x4a1   :  { %v7110_v62 = vld [vmem:[%s9288_s5 + $0x220] ss:$8 sps:$4 sm:$0xff]   ;;  %v7115_v43 = vld [vmem:[%s9288_s5 + $0x74] ss:$8 sps:$4 sm:$0xff]   ;;  %v7106_v50 = vld [vmem:[%s9288_s5 + $0x104] ss:$8 sps:$4 sm:$0xff]  }
 0x4a2   :  { %6099 = vmatprep.subr.msk.bf16.mxu1 %vm2325_vm2, %v8085_v48  ;;  %6105 = vmatprep.subr.msk.bf16.mxu0 %vm2325_vm2, %v8085_v48 }
 0x4a3   :  { %2346 = vmatpush1.bf16.msra.mxu1 %v8088_v15  ;;  %2480 = vmatpush1.bf16.msra.mxu0 %v8088_v15 }
 0x4a4   :  { %2347 = vmatprep.subr.bf16.mxu1 %v8081_v3  ;;  %2481 = vmatprep.subr.bf16.mxu0 %v8081_v3 }
 0x4a7   :  { %2348 = vmatpush1.bf16.msra.mxu1 %v8075_v6  ;;  %2482 = vmatpush1.bf16.msra.mxu0 %v8075_v6 }
 0x4a8   :  { %2349 = vmatprep.subr.bf16.mxu1 %v8064_v26  ;;  %2483 = vmatprep.subr.bf16.mxu0 %v8064_v26 }
 0x4ab   :  { %2350 = vmatpush1.bf16.msra.mxu1 %v8058_v20  ;;  %2484 = vmatpush1.bf16.msra.mxu0 %v8058_v20 }
 0x4ac   :  { %6739 = vmatprep.subr.bf16.mxu1 %v7488_v11  ;;  %2776 = vmatprep.subr.bf16.mxu0 %v7055_v22  ;;  %v7101_v22 = vld [vmem:[%s9288_s5 + $0x110] ss:$8 sps:$4 sm:$0xff]  }
 0x4ae   :  { %6106 = vmatmul.mubr.msk.bf16.vlgmr.msra.gmra.mxu0 %vm2321_vm3, %v7051_v7  ;;  %6100 = vmatmul.mubr.msk.bf16.vlgmr.msra.gmra.mxu1 %vm2321_vm3, %v7052_v41 }
 0x4af   :  { %6740 = vmatpush3.bf16.msra.mxu1 %v8122_v49  ;;  %6745 = vmatprep.mubr.msk.bf16.mxu1 %vm7489_vm4, %v7488_v11 }
 0x4b0   :  { %6741 = vmatprep.subr.bf16.mxu1 %v7488_v11  ;;  %2777 = vmatpush1.bf16.msra.mxu0 %v7053_v9 }
 0x4b1   :  { %2778 = vmatprep.subr.bf16.mxu0 %v7058_v52 }
 0x4b3   :  { %6742 = vmatpush3.bf16.msra.mxu1 %v8078_v54 }
 0x4b4   :  { %6743 = vmatprep.subr.bf16.mxu1 %v7488_v11  ;;  %2779 = vmatpush1.bf16.msra.mxu0 %v7056_v12 }
 0x4b5   :  { %2780 = vmatprep.subr.bf16.mxu0 %v7061_v17 }
 0x4b7   :  { %6744 = vmatpush3.bf16.msra.mxu1 %v8060_v56 }
 0x4b8   :  { %6749 = vmatprep.subr.bf16.mxu1 %v7488_v11  ;;  %2781 = vmatpush1.bf16.msra.mxu0 %v7059_v13 }
 0x4b9   :  { %2782 = vmatprep.subr.bf16.mxu0 %v7064_v55 }
 0x4ba   :  { %6746 = vmatmul.mubr.msk.bf16.vlgmr.msra.gmra.mxu1 %vm2321_vm3, %v7052_v41  ;;  %v7104_v41 = vld [vmem:[%s9288_s5 + $0x100] ss:$8 sps:$4 sm:$0xff]  }
 0x4bb   :  { %6750 = vmatpush3.bf16.msra.mxu1 %v8122_v49  ;;  %6755 = vmatprep.mubr.msk.bf16.mxu1 %vm7489_vm4, %v7488_v11 }
 0x4bc   :  { %6751 = vmatprep.subr.bf16.mxu1 %v7488_v11  ;;  %2783 = vmatpush1.bf16.msra.mxu0 %v7062_v18  ;;  %v7170_v18 = vld [vmem:[%s9288_s5 + $0x2b4] ss:$8 sps:$4 sm:$0xff]  }
 0x4bd   :  { %2784 = vmatprep.subr.bf16.mxu0 %v7067_v57 }
 0x4bf   :  { %6752 = vmatpush3.bf16.msra.mxu1 %v8078_v54 }
 0x4c0   :  { %6753 = vmatprep.subr.bf16.mxu1 %v7488_v11  ;;  %2785 = vmatpush1.bf16.msra.mxu0 %v7065_v19  ;;  %v8279_v19 = vld [vmem:[%s9287_s4 + $0x10] sm:$0x7f]  }
 0x4c1   :  { %2786 = vmatprep.subr.bf16.mxu0 %v7070_v21 }
 0x4c3   :  { %6754 = vmatpush3.bf16.msra.mxu1 %v8060_v56 }
 0x4c4   :  { %2787 = vmatpush1.bf16.msra.mxu0 %v7068_v14  ;;  %2831 = vmatprep.subr.bf16.mxu1 %v7109_v44  ;;  %v7113_v14 = vld [vmem:[%s9288_s5 + $0x70] ss:$8 sps:$4 sm:$0xff]   ;;  %v7129_v44 = vld [vmem:[%s9288_s5 + $0x20] ss:$8 sps:$4 sm:$0xff]  }
 0x4c5   :  { %2788 = vmatprep.subr.bf16.mxu0 %v7073_v40 }
 0x4c6   :  { %6756 = vmatmul.mubr.msk.bf16.vlgmr.msra.gmra.mxu1 %vm2321_vm3, %v7051_v7 }
 0x4c7   :  { %2851 = vmatprep.mubr.bf16.mxu1 %v7487_v1  ;;  %2832 = vmatpush1.bf16.msra.mxu1 %v7107_v63  ;;  %v7185_v63 = vld [vmem:[%s9288_s5 + $0x264] ss:$8 sps:$4 sm:$0xff]  }
 0x4c8   :  { %2789 = vmatpush1.bf16.msra.mxu0 %v7071_v16  ;;  %2833 = vmatprep.subr.bf16.mxu1 %v7112_v30  ;;  %v7119_v16 = vld [vmem:[%s9288_s5 + $0x64] ss:$8 sps:$4 sm:$0xff]   ;;  %v7134_v30 = vld [vmem:[%s9288_s5 + $0x14] ss:$8 sps:$4 sm:$0xff]  }
 0x4c9   :  { %2790 = vmatprep.subr.bf16.mxu0 %v7076_v23  ;;  %v7168_v23 = vld [vmem:[%s9288_s5 + $0x2b0] ss:$8 sps:$4 sm:$0xff]  }
 0x4cb   :  { %2834 = vmatpush1.bf16.msra.mxu1 %v7110_v62  ;;  %v7183_v62 = vld [vmem:[%s9288_s5 + $0x260] ss:$8 sps:$4 sm:$0xff]  }
 0x4cc   :  { %2791 = vmatpush1.bf16.msra.mxu0 %v7074_v4  ;;  %3045 = vmatprep.subr.bf16.mxu1 %v7115_v43  ;;  %v7188_v43 = vld [vmem:[%s9288_s5 + $0x254] ss:$8 sps:$4 sm:$0xff]  }
 0x4cd   :  { %2792 = vmatprep.subr.bf16.mxu0 %v7079_v25 }
 0x4d0   :  { %2793 = vmatpush2.bf16.msra.mxu0 %v7077_v8  ;;  %v7173_v8 = vld [vmem:[%s9288_s5 + $0x2a4] ss:$8 sps:$4 sm:$0xff]  }
 0x4d1   :  { %2794 = vmatprep.subr.bf16.mxu0 %v7082_v28  ;;  %v7117_v28 = vld [vmem:[%s9288_s5 + $0x60] ss:$8 sps:$4 sm:$0xff]  }
 0x4d4   :  { %2795 = vmatpush2.bf16.msra.mxu0 %v7080_v2  ;;  %v7122_v2 = vld [vmem:[%s9288_s5 + $0x54] ss:$8 sps:$4 sm:$0xff]  }
 0x4d5   :  { %2796 = vmatprep.subr.bf16.mxu0 %v7085_v24  ;;  %v7171_v24 = vld [vmem:[%s9288_s5 + $0x2a0] ss:$8 sps:$4 sm:$0xff]  }
 0x4d8   :  { %2797 = vmatpush2.bf16.msra.mxu0 %v7083_v34  ;;  %v7176_v34 = vld [vmem:[%s9288_s5 + $0x294] ss:$8 sps:$4 sm:$0xff]  }
 0x4d9   :  { %2798 = vmatprep.subr.bf16.mxu0 %v7088_v37  ;;  %v7120_v37 = vld [vmem:[%s9288_s5 + $0x50] ss:$8 sps:$4 sm:$0xff]  }
 0x4dc   :  { %2799 = vmatpush2.bf16.msra.mxu0 %v7086_v31  ;;  %v7125_v31 = vld [vmem:[%s9288_s5 + $0x44] ss:$8 sps:$4 sm:$0xff]  }
 0x4dd   :  { %2800 = vmatprep.subr.bf16.mxu0 %v7091_v38  ;;  %v7174_v38 = vld [vmem:[%s9288_s5 + $0x290] ss:$8 sps:$4 sm:$0xff]  }
 0x4e0   :  { %2801 = vmatpush2.bf16.msra.mxu0 %v7089_v10  ;;  %v7179_v10 = vld [vmem:[%s9288_s5 + $0x284] ss:$8 sps:$4 sm:$0xff]  }
 0x4e1   :  { %2802 = vmatprep.subr.bf16.mxu0 %v7094_v46  ;;  %v7123_v46 = vld [vmem:[%s9288_s5 + $0x40] ss:$8 sps:$4 sm:$0xff]  }
 0x4e4   :  { %2803 = vmatpush2.bf16.msra.mxu0 %v7092_v51  ;;  %v7128_v51 = vld [vmem:[%s9288_s5 + $0x34] ss:$8 sps:$4 sm:$0xff]  }
 0x4e5   :  { %2804 = vmatprep.subr.bf16.mxu0 %v7097_v5  ;;  %v7177_v5 = vld [vmem:[%s9288_s5 + $0x280] ss:$8 sps:$4 sm:$0xff]  }
 0x4e8   :  { %2805 = vmatpush2.bf16.msra.mxu0 %v7095_v27  ;;  %v7182_v27 = vld [vmem:[%s9288_s5 + $0x274] ss:$8 sps:$4 sm:$0xff]  }
 0x4e9   :  { %2806 = vmatprep.subr.bf16.mxu0 %v7100_v36  ;;  %v7126_v36 = vld [vmem:[%s9288_s5 + $0x30] ss:$8 sps:$4 sm:$0xff]  }
 0x4ec   :  { %2807 = vmatpush2.bf16.msra.mxu0 %v7098_v29  ;;  %v7131_v29 = vld [vmem:[%s9288_s5 + $0x24] ss:$8 sps:$4 sm:$0xff]  }
 0x4ed   :  { %3100 = vmatprep.subr.bf16.mxu0 %v7103_v47  ;;  %v7180_v47 = vld [vmem:[%s9288_s5 + $0x270] ss:$8 sps:$4 sm:$0xff]  }
 0x56e   :  { %v2503_v39 = vpop.f32.mrf.mxu0  ;;  %v8249_v53 = vpop.f32.mrf.mxu1 }
 0x570   :  { %v2505_v59 = vpop.f32.mrf.mxu0  ;;  %v2371_v33 = vpop.f32.mrf.mxu1 }
 0x572   :  { %v2507_v60 = vpop.f32.mrf.mxu0  ;;  %v8251_v42 = vpop.f32.mrf.mxu1 }
 0x573   :  { %v2419_v45 = vpack.c.bf16 %v8251_v42, %v8249_v53  ;;  %v2553_v0 = vpack.c.bf16 %v2507_v60, %v2503_v39  ;;  %v7132_v39 = vld [vmem:[%s9288_s5 + $0x10] ss:$8 sps:$4 sm:$0xff]   ;;  %v7191_v60 = vld [vmem:[%s9288_s5 + $0x244] ss:$8 sps:$4 sm:$0xff]   ;;  %v7213_v53 = vld [vmem:[%s9288_s5 + $0x2c0] ss:$8 sps:$4 sm:$0xff]  }
 0x574   :  { %v2509_v58 = vpop.f32.mrf.mxu0  ;;  %v2375_v7 = vpop.f32.mrf.mxu1  ;;  %v7164_v42 = vld [vmem:[%s9288_s5 + $0x354] ss:$8 sps:$4 sm:$0xff]  }
 0x575   :  { %v2554_v35 = vpack.c.bf16 %v2509_v58, %v2505_v59  ;;  %v2420_v4 = vpack.c.bf16 %v2375_v7, %v2371_v33  ;;  %v7137_v59 = vld [vmem:[%s9288_s5 + $0x4] ss:$8 sps:$4 sm:$0xff]   ;;  %v7186_v33 = vld [vmem:[%s9288_s5 + $0x250] ss:$8 sps:$4 sm:$0xff]   ;;  %v7140_v58 = vld [vmem:[%s9288_s5 + $0xf4] ss:$8 sps:$4 sm:$0xff]  }
 0x576   :  { %v7143_v7 = vld [vmem:[%s9288_s5 + $0xe4] ss:$8 sps:$4 sm:$0xff]  }
 0x577   :  { %2808 = vmatprep.mubr.bf16.mxu0 %v2554_v35  ;;  %v7189_v35 = vld [vmem:[%s9288_s5 + $0x240] ss:$8 sps:$4 sm:$0xff]  }
 0x578   :  { %2809 = vmatmul.mubr.bf16.vlgmr.msra.gmra.mxu0 %v2553_v0  ;;  %v7135_v0 = vld [vmem:[%s9288_s5] ss:$8 sps:$4 sm:$0xff]  }
 0x579   :  { %3101 = vmatpush1.bf16.msra.mxu0 %v7101_v22  ;;  %3120 = vmatprep.mubr.bf16.mxu0 %v7487_v1  ;;  %v7194_v22 = vld [vmem:[%s9288_s5 + $0x334] ss:$8 sps:$4 sm:$0xff]  }
 0x57a   :  { %v2412_v9 = vpop.f32.mrf.mxu1  ;;  %3102 = vmatprep.subr.bf16.mxu0 %v7106_v50  ;;  %v7138_v50 = vld [vmem:[%s9288_s5 + $0xf0] ss:$8 sps:$4 sm:$0xff]  }
 0x57c   :  { %v6747_v52 = vpop.f32.mrf.mxu1 }
 0x57d   :  { %3103 = vmatpush1.bf16.msra.mxu0 %v7104_v41  ;;  %v7192_v41 = vld [vmem:[%s9288_s5 + $0x330] ss:$8 sps:$4 sm:$0xff]   ;;  %v7146_v52 = vld [vmem:[%s9288_s5 + $0xd4] ss:$8 sps:$4 sm:$0xff]  }
 0x57e   :  { %6221 = vmatprep.subr.msk.bf16.mxu0 %vm2325_vm2, %v8085_v48  ;;  %v2415_v12 = vpop.f32.mrf.mxu1 }
 0x57f   :  { %v2421_v17 = vpack.c.bf16 %v2415_v12, %v2412_v9  ;;  %v7141_v9 = vld [vmem:[%s9288_s5 + $0xe0] ss:$8 sps:$4 sm:$0xff]   ;;  %v7144_v12 = vld [vmem:[%s9288_s5 + $0xd0] ss:$8 sps:$4 sm:$0xff]  }
 0x580   :  { %v6748_v13 = vpop.f32.mrf.mxu1 }
 0x581   :  { %6217 = vmatmul.mubr.msk.bf16.vlgmr.msra.gmra.mxu0 %vm534_vm1, %v2421_v17  ;;  %v7149_v17 = vld [vmem:[%s9288_s5 + $0xc4] ss:$8 sps:$4 sm:$0xff]   ;;  %v7147_v13 = vld [vmem:[%s9288_s5 + $0xc0] ss:$8 sps:$4 sm:$0xff]  }
 0x582   :  { %3153 = vmatpush1.bf16.msra.mxu0 %v8088_v15  ;;  %3174 = vmatprep.mubr.bf16.mxu0 %v7487_v1 }
 0x583   :  { %3154 = vmatprep.subr.bf16.mxu0 %v8081_v3 }
 0x586   :  { %3155 = vmatpush1.bf16.msra.mxu0 %v8075_v6  ;;  %v2546_v55 = vpop.f32.mrf.mxu1 }
 0x587   :  { %3156 = vmatprep.subr.bf16.mxu0 %v8064_v26 }
 0x588   :  { %v6757_v57 = vpop.f32.mrf.mxu1 }
 0x589   :  { %v7197_v57 = vld [vmem:[%s9288_s5 + $0x324] ss:$8 sps:$4 sm:$0xff]  }
 0x58a   :  { %3157 = vmatpush1.bf16.msra.mxu0 %v8058_v20  ;;  %v2549_v21 = vpop.f32.mrf.mxu1 }
 0x58b   :  { %v2555_v40 = vpack.c.bf16 %v2549_v21, %v2546_v55  ;;  %3449 = vmatprep.subr.bf16.mxu0 %v7170_v18  ;;  %v7152_v55 = vld [vmem:[%s9288_s5 + $0xb4] ss:$8 sps:$4 sm:$0xff]   ;;  %v7195_v18 = vld [vmem:[%s9288_s5 + $0x320] ss:$8 sps:$4 sm:$0xff]   ;;  %v7150_v21 = vld [vmem:[%s9288_s5 + $0xb0] ss:$8 sps:$4 sm:$0xff]  }
 0x58c   :  { %v6758_v25 = vpop.f32.mrf.mxu1 }
 0x58d   :  { %6222 = vmatmul.mubr.msk.bf16.vlgmr.msra.gmra.mxu0 %vm2321_vm3, %v8279_v19  ;;  %6180 = vmatmul.mubr.msk.bf16.vlgmr.msra.gmra.mxu1 %vm534_vm1, %v2555_v40  ;;  %v7198_v40 = vld [vmem:[%s9288_s5 + $0x310] ss:$8 sps:$4 sm:$0xff]   ;;  %v7203_v25 = vld [vmem:[%s9288_s5 + $0x304] ss:$8 sps:$4 sm:$0xff]  }
 0x58e   :  { %3046 = vmatpush1.bf16.msra.mxu1 %v7113_v14  ;;  %3077 = vmatprep.mubr.bf16.mxu1 %v2420_v4  ;;  %v7155_v14 = vld [vmem:[%s9288_s5 + $0xa4] ss:$8 sps:$4 sm:$0xff]   ;;  %v7158_v4 = vld [vmem:[%s9288_s5 + $0x94] ss:$8 sps:$4 sm:$0xff]  }
 0x58f   :  { %3047 = vmatprep.subr.bf16.mxu1 %v7119_v16  ;;  %3450 = vmatpush1.bf16.msra.mxu0 %v7168_v23  ;;  %v7200_v16 = vld [vmem:[%s9288_s5 + $0x314] ss:$8 sps:$4 sm:$0xff]   ;;  %v7153_v23 = vld [vmem:[%s9288_s5 + $0xa0] ss:$8 sps:$4 sm:$0xff]  }
 0x590   :  { %3451 = vmatprep.subr.bf16.mxu0 %v7173_v8  ;;  %v7201_v8 = vld [vmem:[%s9288_s5 + $0x300] ss:$8 sps:$4 sm:$0xff]  }
 0x592   :  { %3048 = vmatpush1.bf16.msra.mxu1 %v7117_v28  ;;  %v7156_v28 = vld [vmem:[%s9288_s5 + $0x90] ss:$8 sps:$4 sm:$0xff]  }
 0x593   :  { %3049 = vmatprep.subr.bf16.mxu1 %v7122_v2  ;;  %3452 = vmatpush1.bf16.msra.mxu0 %v7171_v24  ;;  %v7161_v2 = vld [vmem:[%s9288_s5 + $0x84] ss:$8 sps:$4 sm:$0xff]   ;;  %v7206_v24 = vld [vmem:[%s9288_s5 + $0x2f4] ss:$8 sps:$4 sm:$0xff]  }
 0x594   :  { %3453 = vmatprep.subr.bf16.mxu0 %v7176_v34  ;;  %v7204_v34 = vld [vmem:[%s9288_s5 + $0x2f0] ss:$8 sps:$4 sm:$0xff]  }
 0x596   :  { %3050 = vmatpush1.bf16.msra.mxu1 %v7120_v37  ;;  %v7159_v37 = vld [vmem:[%s9288_s5 + $0x80] ss:$8 sps:$4 sm:$0xff]  }
 0x597   :  { %3051 = vmatprep.subr.bf16.mxu1 %v7125_v31  ;;  %3454 = vmatpush1.bf16.msra.mxu0 %v7174_v38  ;;  %v7207_v31 = vld [vmem:[%s9288_s5 + $0x2e0] ss:$8 sps:$4 sm:$0xff]   ;;  %v7209_v38 = vld [vmem:[%s9288_s5 + $0x2e4] ss:$8 sps:$4 sm:$0xff]  }
 0x598   :  { %3455 = vmatprep.subr.bf16.mxu0 %v7179_v10  ;;  %v7212_v10 = vld [vmem:[%s9288_s5 + $0x2d4] ss:$8 sps:$4 sm:$0xff]  }
 0x59a   :  { %3052 = vmatpush1.bf16.msra.mxu1 %v7123_v46  ;;  %v7210_v46 = vld [vmem:[%s9288_s5 + $0x2d0] ss:$8 sps:$4 sm:$0xff]  }
 0x59b   :  { %3053 = vmatprep.subr.bf16.mxu1 %v7128_v51  ;;  %3456 = vmatpush1.bf16.msra.mxu0 %v7177_v5  ;;  %v7215_v51 = vld [vmem:[%s9288_s5 + $0x2c4] ss:$8 sps:$4 sm:$0xff]   ;;  %v7162_v5 = vld [vmem:[%s9288_s5 + $0x350] ss:$8 sps:$4 sm:$0xff]  }
 0x59c   :  { %3457 = vmatprep.subr.bf16.mxu0 %v7182_v27  ;;  %v7167_v27 = vld [vmem:[%s9288_s5 + $0x344] ss:$8 sps:$4 sm:$0xff]  }
 0x59e   :  { %3054 = vmatpush1.bf16.msra.mxu1 %v7126_v36  ;;  %v7165_v36 = vld [vmem:[%s9288_s5 + $0x340] ss:$8 sps:$4 sm:$0xff]  }
 0x59f   :  { %3055 = vmatprep.subr.bf16.mxu1 %v7131_v29  ;;  %3458 = vmatpush1.bf16.msra.mxu0 %v7180_v47 }
 0x5a0   :  { %3459 = vmatprep.subr.bf16.mxu0 %v7185_v63 }
 0x5a2   :  { %3056 = vmatpush1.bf16.msra.mxu1 %v7129_v44 }
 0x5a3   :  { %3057 = vmatprep.subr.bf16.mxu1 %v7134_v30  ;;  %3460 = vmatpush1.bf16.msra.mxu0 %v7183_v62 }
 0x5a4   :  { %3461 = vmatprep.subr.bf16.mxu0 %v7188_v43 }
 0x5a6   :  { %3058 = vmatpush1.bf16.msra.mxu1 %v7132_v39 }
 0x5a7   :  { %3059 = vmatprep.subr.bf16.mxu1 %v7137_v59  ;;  %3462 = vmatpush1.bf16.msra.mxu0 %v7186_v33 }
 0x5a8   :  { %3463 = vmatprep.subr.bf16.mxu0 %v7191_v60 }
 0x5aa   :  { %3060 = vmatpush1.bf16.msra.mxu1 %v7135_v0 }
 0x5ab   :  { %3061 = vmatprep.subr.bf16.mxu1 %v7140_v58  ;;  %3464 = vmatpush1.bf16.msra.mxu0 %v7189_v35 }
 0x5ac   :  { %3465 = vmatprep.subr.bf16.mxu0 %v7194_v22 }
 0x5ae   :  { %3062 = vmatpush2.bf16.msra.mxu1 %v7138_v50 }
 0x5af   :  { %3063 = vmatprep.subr.bf16.mxu1 %v7143_v7  ;;  %3466 = vmatpush2.bf16.msra.mxu0 %v7192_v41 }
 0x5b0   :  { %3467 = vmatprep.subr.bf16.mxu0 %v7197_v57 }
 0x5b2   :  { %3064 = vmatpush2.bf16.msra.mxu1 %v7141_v9 }
 0x5b3   :  { %3065 = vmatprep.subr.bf16.mxu1 %v7146_v52  ;;  %3468 = vmatpush2.bf16.msra.mxu0 %v7195_v18 }
 0x5b4   :  { %3469 = vmatprep.subr.bf16.mxu0 %v7200_v16 }
 0x5b6   :  { %3066 = vmatpush2.bf16.msra.mxu1 %v7144_v12 }
 0x5b7   :  { %3067 = vmatprep.subr.bf16.mxu1 %v7149_v17  ;;  %3470 = vmatpush2.bf16.msra.mxu0 %v7198_v40  ;;  %v7216_v17 = vld [vmem:[%s9288_s5 + $0x470] ss:$8 sps:$4 sm:$0xff]  }
 0x5b8   :  { %3471 = vmatprep.subr.bf16.mxu0 %v7203_v25 }
 0x5ba   :  { %3068 = vmatpush2.bf16.msra.mxu1 %v7147_v13  ;;  %v7221_v13 = vld [vmem:[%s9288_s5 + $0x464] ss:$8 sps:$4 sm:$0xff]  }
 0x5bb   :  { %3069 = vmatprep.subr.bf16.mxu1 %v7152_v55  ;;  %3472 = vmatpush2.bf16.msra.mxu0 %v7201_v8  ;;  %v7219_v55 = vld [vmem:[%s9288_s5 + $0x460] ss:$8 sps:$4 sm:$0xff]  }
 0x5bc   :  { %3473 = vmatprep.subr.bf16.mxu0 %v7206_v24 }
 0x5be   :  { %3070 = vmatpush2.bf16.msra.mxu1 %v7150_v21 }
 0x5bf   :  { %3071 = vmatprep.subr.bf16.mxu1 %v7155_v14  ;;  %3474 = vmatpush2.bf16.msra.mxu0 %v7204_v34  ;;  %v7225_v34 = vld [vmem:[%s9288_s5 + $0x3d4] ss:$8 sps:$4 sm:$0xff]  }
 0x5c0   :  { %3475 = vmatprep.subr.bf16.mxu0 %v7209_v38  ;;  %v7226_v38 = vld [vmem:[%s9288_s5 + $0x3c0] ss:$8 sps:$4 sm:$0xff]  }
 0x5c2   :  { %3072 = vmatpush2.bf16.msra.mxu1 %v7153_v23 }
 0x5c3   :  { %3073 = vmatprep.subr.bf16.mxu1 %v7158_v4  ;;  %3476 = vmatpush2.bf16.msra.mxu0 %v7207_v31  ;;  %v7228_v31 = vld [vmem:[%s9288_s5 + $0x3c4] ss:$8 sps:$4 sm:$0xff]  }
 0x5c4   :  { %3477 = vmatprep.subr.bf16.mxu0 %v7212_v10  ;;  %v7231_v10 = vld [vmem:[%s9288_s5 + $0x3b4] ss:$8 sps:$4 sm:$0xff]  }
 0x5c6   :  { %3074 = vmatpush2.bf16.msra.mxu1 %v7156_v28 }
 0x5c7   :  { %3075 = vmatprep.subr.bf16.mxu1 %v7161_v2  ;;  %3478 = vmatpush2.bf16.msra.mxu0 %v7210_v46  ;;  %v7229_v46 = vld [vmem:[%s9288_s5 + $0x3b0] ss:$8 sps:$4 sm:$0xff]  }
 0x5c8   :  { %3479 = vmatprep.subr.bf16.mxu0 %v7215_v51  ;;  %v7234_v51 = vld [vmem:[%s9288_s5 + $0x3a4] ss:$8 sps:$4 sm:$0xff]  }
 0x5ca   :  { %3076 = vmatpush2.bf16.msra.mxu1 %v7159_v37  ;;  %v7223_v37 = vld [vmem:[%s9288_s5 + $0x3d0] ss:$8 sps:$4 sm:$0xff]  }
 0x5cb   :  { %6759 = vmatprep.subr.bf16.mxu1 %v7488_v11  ;;  %3480 = vmatpush2.bf16.msra.mxu0 %v7213_v53  ;;  %v7232_v53 = vld [vmem:[%s9288_s5 + $0x3a0] ss:$8 sps:$4 sm:$0xff]  }
 0x5cd   :  { %3078 = vmatmul.mubr.bf16.vlgmr.msra.gmra.mxu1 %v2419_v45  ;;  %v7218_v45 = vld [vmem:[%s9288_s5 + $0x474] ss:$8 sps:$4 sm:$0xff]  }
 0x5ce   :  { %6760 = vmatpush3.bf16.msra.mxu1 %v8122_v49  ;;  %6765 = vmatprep.mubr.msk.bf16.mxu1 %vm7489_vm4, %v7488_v11 }
 0x5cf   :  { %6761 = vmatprep.subr.bf16.mxu1 %v7488_v11  ;;  %3912 = vmatprep.subr.bf16.mxu0 %v7218_v45  ;;  %v7235_v45 = vld [vmem:[%s9288_s5 + $0x390] ss:$8 sps:$4 sm:$0xff]  }
 0x5d2   :  { %6762 = vmatpush3.bf16.msra.mxu1 %v8078_v54 }
 0x5d3   :  { %6763 = vmatprep.subr.bf16.mxu1 %v7488_v11 }
 0x5d6   :  { %6764 = vmatpush3.bf16.msra.mxu1 %v8060_v56 }
 0x5d7   :  { %3504 = vmatprep.subr.bf16.mxu1 %v7164_v42  ;;  %v7237_v42 = vld [vmem:[%s9288_s5 + $0x394] ss:$8 sps:$4 sm:$0xff]  }
 0x5d9   :  { %6766 = vmatmul.mubr.msk.bf16.vlgmr.msra.gmra.mxu1 %vm2321_vm3, %v8279_v19 }
 0x5da   :  { %3505 = vmatpush1.bf16.msra.mxu1 %v7162_v5  ;;  %3524 = vmatprep.mubr.bf16.mxu1 %v7487_v1  ;;  %v7240_v5 = vld [vmem:[%s9288_s5 + $0x384] ss:$8 sps:$4 sm:$0xff]  }
 0x5db   :  { %3506 = vmatprep.subr.bf16.mxu1 %v7167_v27  ;;  %v7238_v27 = vld [vmem:[%s9288_s5 + $0x380] ss:$8 sps:$4 sm:$0xff]  }
 0x5de   :  { %3507 = vmatpush1.bf16.msra.mxu1 %v7165_v36  ;;  %v7243_v36 = vld [vmem:[%s9288_s5 + $0x374] ss:$8 sps:$4 sm:$0xff]  }
 0x5df   :  { %6300 = vmatprep.subr.msk.bf16.mxu1 %vm2325_vm2, %v8085_v48 }
 0x638   :  { %v2810_v29 = vpop.f32.mrf.mxu0 }
 0x63a   :  { %v2812_v47 = vpop.f32.mrf.mxu0 }
 0x63c   :  { %v2814_v63 = vpop.f32.mrf.mxu0 }
 0x63e   :  { %v2816_v44 = vpop.f32.mrf.mxu0 }
 0x641   :  { %v8502_v30 = vpop.f32.mrf.mxu0 }
 0x643   :  { %v8504_v62 = vpop.f32.mrf.mxu0 }
 0x645   :  { %v8506_v19 = vpop.f32.mrf.mxu0 }
 0x647   :  { %v8508_v43 = vpop.f32.mrf.mxu0 }
 0x64d   :  { %v3176_v39 = vpop.f32.mrf.mxu0  ;;  %v2853_v59 = vpop.f32.mrf.mxu1 }
 0x64e   :  { %v2854_v33 = vadd.f32 %v2853_v59, %v2810_v29  ;;  %v7241_v29 = vld [vmem:[%s9288_s5 + $0x370] ss:$8 sps:$4 sm:$0xff]   ;;  %v7252_v59 = vld [vmem:[%s9288_s5 + $0x444] ss:$8 sps:$4 sm:$0xff]  }
 0x64f   :  { %v3178_v60 = vpop.f32.mrf.mxu0  ;;  %v2855_v0 = vpop.f32.mrf.mxu1 }
 0x650   :  { %v2856_v58 = vadd.f32 %v2855_v0, %v2812_v47  ;;  %v7246_v47 = vld [vmem:[%s9288_s5 + $0x364] ss:$8 sps:$4 sm:$0xff]   ;;  %v7253_v0 = vld [vmem:[%s9288_s5 + $0x430] ss:$8 sps:$4 sm:$0xff]  }
 0x651   :  { %v3180_v35 = vpop.f32.mrf.mxu0  ;;  %v2857_v22 = vpop.f32.mrf.mxu1 }
 0x652   :  { %v2858_v50 = vadd.f32 %v2857_v22, %v2814_v63  ;;  %v3226_v7 = vpack.c.bf16 %v3180_v35, %v3176_v39  ;;  %v7244_v63 = vld [vmem:[%s9288_s5 + $0x360] ss:$8 sps:$4 sm:$0xff]   ;;  %v7247_v39 = vld [vmem:[%s9288_s5 + $0x450] ss:$8 sps:$4 sm:$0xff]   ;;  %v7261_v22 = vld [vmem:[%s9288_s5 + $0x414] ss:$8 sps:$4 sm:$0xff]  }
 0x653   :  { %v3182_v41 = vpop.f32.mrf.mxu0  ;;  %v2859_v9 = vpop.f32.mrf.mxu1  ;;  %v7256_v35 = vld [vmem:[%s9288_s5 + $0x420] ss:$8 sps:$4 sm:$0xff]  }
 0x654   :  { %v3227_v52 = vpack.c.bf16 %v3182_v41, %v3178_v60  ;;  %v2860_v12 = vadd.f32 %v2859_v9, %v2816_v44  ;;  %v7249_v44 = vld [vmem:[%s9288_s5 + $0x454] ss:$8 sps:$4 sm:$0xff]   ;;  %v7262_v41 = vld [vmem:[%s9288_s5 + $0x400] ss:$8 sps:$4 sm:$0xff]  }
 0x655   :  { %v7255_v60 = vld [vmem:[%s9288_s5 + $0x434] ss:$8 sps:$4 sm:$0xff]  }
 0x656   :  { %3481 = vmatprep.mubr.bf16.mxu0 %v3227_v52  ;;  %v7267_v9 = vld [vmem:[%s9288_s5 + $0x3f4] ss:$8 sps:$4 sm:$0xff]   ;;  %v7265_v52 = vld [vmem:[%s9288_s5 + $0x3f0] ss:$8 sps:$4 sm:$0xff]  }
 0x657   :  { %3482 = vmatmul.mubr.bf16.vlgmr.msra.gmra.mxu0 %v3226_v7  ;;  %v7264_v7 = vld [vmem:[%s9288_s5 + $0x404] ss:$8 sps:$4 sm:$0xff]  }
 0x658   :  { %3913 = vmatpush1.bf16.msra.mxu0 %v7216_v17  ;;  %3932 = vmatprep.mubr.bf16.mxu0 %v7487_v1  ;;  %v7268_v17 = vld [vmem:[%s9288_s5 + $0x3e0] ss:$8 sps:$4 sm:$0xff]  }
 0x659   :  { %3914 = vmatprep.subr.bf16.mxu0 %v7221_v13 }
 0x65c   :  { %3915 = vmatpush1.bf16.msra.mxu0 %v7219_v55 }
 0x65d   :  { %6379 = vmatprep.subr.msk.bf16.mxu0 %vm2325_vm2, %v8085_v48  ;;  %v7222_v48 = vld [vmem:[%s9287_s4 + $0x18] sm:$0x7f]  }
 0x68d   :  { %v3079_v18 = vpop.f32.mrf.mxu1 }
 0x68e   :  { %v8522_v57 = vadd.f32 %v3079_v18, %v2854_v33  ;;  %v7250_v33 = vld [vmem:[%s9288_s5 + $0x440] ss:$8 sps:$4 sm:$0xff]  }
 0x68f   :  { %v3081_v21 = vpop.f32.mrf.mxu1 }
 0x690   :  { %v8524_v14 = vadd.f32 %v3081_v21, %v2856_v58  ;;  %v7258_v58 = vld [vmem:[%s9288_s5 + $0x424] ss:$8 sps:$4 sm:$0xff]  }
 0x691   :  { %v3083_v40 = vpop.f32.mrf.mxu1 }
 0x692   :  { %v8526_v16 = vadd.f32 %v3083_v40, %v2858_v50  ;;  %v7259_v50 = vld [vmem:[%s9288_s5 + $0x410] ss:$8 sps:$4 sm:$0xff]   ;;  %v3123_v40 = vadd.f32 %v8502_v30, %v8522_v57 }
 0x693   :  { %v3085_v23 = vpop.f32.mrf.mxu1 }
 0x694   :  { %v8528_v4 = vadd.f32 %v3085_v23, %v2860_v12  ;;  %v7270_v12 = vld [vmem:[%s9288_s5 + $0x3e4] ss:$8 sps:$4 sm:$0xff]  }
 0x696   :  { %v3129_v30 = vadd.f32 %v8508_v43, %v8528_v4  ;;  %v7271_v4 = vld [vmem:[%s9287_s4 + $0x20] sm:$0x7f]  }
 0x699   :  { %v3219_v25 = vpop.f32.mrf.mxu1 }
 0x69b   :  { %v6767_v8 = vpop.f32.mrf.mxu1 }
 0x69c   :  { %v3125_v8 = vadd.f32 %v8504_v62, %v8524_v14 }
 0x69d   :  { %v3222_v28 = vpop.f32.mrf.mxu1 }
 0x69e   :  { %v3228_v2 = vpack.c.bf16 %v3222_v28, %v3219_v25 }
 0x69f   :  { %v6768_v24 = vpop.f32.mrf.mxu1 }
 0x6a0   :  { %6296 = vmatmul.mubr.msk.bf16.vlgmr.msra.gmra.mxu1 %vm534_vm1, %v3228_v2 }
 0x6a1   :  { %3561 = vmatpush1.bf16.msra.mxu1 %v8088_v15  ;;  %3582 = vmatprep.mubr.bf16.mxu1 %v7487_v1 }
 0x6a2   :  { %3562 = vmatprep.subr.bf16.mxu1 %v8081_v3 }
 0x6a5   :  { %3563 = vmatpush1.bf16.msra.mxu1 %v8075_v6 }
 0x6a6   :  { %3564 = vmatprep.subr.bf16.mxu1 %v8064_v26 }
 0x6a9   :  { %3565 = vmatpush1.bf16.msra.mxu1 %v8058_v20 }
 0x6aa   :  { %6769 = vmatprep.subr.bf16.mxu1 %v7488_v11 }
 0x6ac   :  { %6301 = vmatmul.mubr.msk.bf16.vlgmr.msra.gmra.mxu1 %vm2321_vm3, %v7222_v48 }
 0x6ad   :  { %6770 = vmatpush3.bf16.msra.mxu1 %v8122_v49  ;;  %6775 = vmatprep.mubr.msk.bf16.mxu1 %vm7489_vm4, %v7488_v11 }
 0x6ae   :  { %6771 = vmatprep.subr.bf16.mxu1 %v7488_v11 }
 0x6b1   :  { %6772 = vmatpush3.bf16.msra.mxu1 %v8078_v54 }
 0x6b2   :  { %6773 = vmatprep.subr.bf16.mxu1 %v7488_v11 }
 0x6b5   :  { %6774 = vmatpush3.bf16.msra.mxu1 %v8060_v56 }
 0x6b6   :  { %3857 = vmatprep.subr.bf16.mxu1 %v7225_v34  ;;  %v3127_v34 = vadd.f32 %v8506_v19, %v8526_v16 }
 0x6b8   :  { %6776 = vmatmul.mubr.msk.bf16.vlgmr.msra.gmra.mxu1 %vm2321_vm3, %v7222_v48 }
 0x6b9   :  { %3858 = vmatpush1.bf16.msra.mxu1 %v7223_v37 }
 0x6ba   :  { %3859 = vmatprep.subr.bf16.mxu1 %v7228_v31 }
 0x6bd   :  { %3860 = vmatpush1.bf16.msra.mxu1 %v7226_v38 }
 0x6be   :  { %3861 = vmatprep.subr.bf16.mxu1 %v7231_v10 }
 0x6c1   :  { %3862 = vmatpush1.bf16.msra.mxu1 %v7229_v46 }
 0x6c2   :  { %3863 = vmatprep.subr.bf16.mxu1 %v7234_v51 }
 0x6c5   :  { %3864 = vmatpush1.bf16.msra.mxu1 %v7232_v53 }
 0x6c6   :  { %3865 = vmatprep.subr.bf16.mxu1 %v7237_v42 }
 0x6c9   :  { %3866 = vmatpush1.bf16.msra.mxu1 %v7235_v45 }
 0x6ca   :  { %3867 = vmatprep.subr.bf16.mxu1 %v7240_v5 }
 0x6cd   :  { %3868 = vmatpush1.bf16.msra.mxu1 %v7238_v27 }
 0x6ce   :  { %3869 = vmatprep.subr.bf16.mxu1 %v7243_v36  ;;  %v7286_v36 = vld [vmem:[%s9288_s5 + $0x4b4] ss:$8 sps:$4 sm:$0xff]  }
 0x6d1   :  { %3870 = vmatpush1.bf16.msra.mxu1 %v7241_v29  ;;  %v7284_v29 = vld [vmem:[%s9288_s5 + $0x4b0] ss:$8 sps:$4 sm:$0xff]  }
 0x6d2   :  { %3871 = vmatprep.subr.bf16.mxu1 %v7246_v47  ;;  %v7289_v47 = vld [vmem:[%s9288_s5 + $0x4a4] ss:$8 sps:$4 sm:$0xff]  }
 0x6d5   :  { %3872 = vmatpush1.bf16.msra.mxu1 %v7244_v63  ;;  %v7287_v63 = vld [vmem:[%s9288_s5 + $0x4a0] ss:$8 sps:$4 sm:$0xff]  }
 0x6d6   :  { %3873 = vmatprep.subr.bf16.mxu1 %v7249_v44  ;;  %v7292_v44 = vld [vmem:[%s9288_s5 + $0x494] ss:$8 sps:$4 sm:$0xff]  }
 0x6d9   :  { %3874 = vmatpush2.bf16.msra.mxu1 %v7247_v39  ;;  %v7290_v39 = vld [vmem:[%s9288_s5 + $0x490] ss:$8 sps:$4 sm:$0xff]  }
 0x6da   :  { %3875 = vmatprep.subr.bf16.mxu1 %v7252_v59  ;;  %v7295_v59 = vld [vmem:[%s9288_s5 + $0x484] ss:$8 sps:$4 sm:$0xff]  }
 0x6dd   :  { %3876 = vmatpush2.bf16.msra.mxu1 %v7250_v33  ;;  %v7293_v33 = vld [vmem:[%s9288_s5 + $0x480] ss:$8 sps:$4 sm:$0xff]  }
 0x6de   :  { %3877 = vmatprep.subr.bf16.mxu1 %v7255_v60  ;;  %v7298_v60 = vld [vmem:[%s9288_s5 + $0x574] ss:$8 sps:$4 sm:$0xff]  }
 0x6e1   :  { %3878 = vmatpush2.bf16.msra.mxu1 %v7253_v0  ;;  %v7296_v0 = vld [vmem:[%s9288_s5 + $0x570] ss:$8 sps:$4 sm:$0xff]  }
 0x6e2   :  { %3879 = vmatprep.subr.bf16.mxu1 %v7258_v58  ;;  %v7301_v58 = vld [vmem:[%s9288_s5 + $0x564] ss:$8 sps:$4 sm:$0xff]  }
 0x6e5   :  { %3880 = vmatpush2.bf16.msra.mxu1 %v7256_v35  ;;  %v7299_v35 = vld [vmem:[%s9288_s5 + $0x560] ss:$8 sps:$4 sm:$0xff]  }
 0x6e6   :  { %3881 = vmatprep.subr.bf16.mxu1 %v7261_v22  ;;  %v7304_v22 = vld [vmem:[%s9288_s5 + $0x554] ss:$8 sps:$4 sm:$0xff]  }
 0x6e9   :  { %3882 = vmatpush2.bf16.msra.mxu1 %v7259_v50  ;;  %v7302_v50 = vld [vmem:[%s9288_s5 + $0x550] ss:$8 sps:$4 sm:$0xff]  }
 0x6ea   :  { %3883 = vmatprep.subr.bf16.mxu1 %v7264_v7  ;;  %v7307_v7 = vld [vmem:[%s9288_s5 + $0x544] ss:$8 sps:$4 sm:$0xff]  }
 0x6ed   :  { %3884 = vmatpush2.bf16.msra.mxu1 %v7262_v41  ;;  %v7305_v41 = vld [vmem:[%s9288_s5 + $0x540] ss:$8 sps:$4 sm:$0xff]  }
 0x6ee   :  { %3885 = vmatprep.subr.bf16.mxu1 %v7267_v9  ;;  %v7310_v9 = vld [vmem:[%s9288_s5 + $0x534] ss:$8 sps:$4 sm:$0xff]  }
 0x6f1   :  { %3886 = vmatpush2.bf16.msra.mxu1 %v7265_v52  ;;  %v7308_v52 = vld [vmem:[%s9288_s5 + $0x530] ss:$8 sps:$4 sm:$0xff]  }
 0x6f2   :  { %3887 = vmatprep.subr.bf16.mxu1 %v7270_v12  ;;  %v7313_v12 = vld [vmem:[%s9288_s5 + $0x524] ss:$8 sps:$4 sm:$0xff]  }
 0x6f5   :  { %3888 = vmatpush2.bf16.msra.mxu1 %v7268_v17  ;;  %v7311_v17 = vld [vmem:[%s9288_s5 + $0x520] ss:$8 sps:$4 sm:$0xff]  }
 0x717   :  { %v3483_v13 = vpop.f32.mrf.mxu0 }
 0x719   :  { %v3485_v55 = vpop.f32.mrf.mxu0 }
 0x71b   :  { %v3487_v21 = vpop.f32.mrf.mxu0 }
 0x71d   :  { %v3489_v48 = vpop.f32.mrf.mxu0 }
 0x760   :  { %v3526_v18 = vpop.f32.mrf.mxu1 }
 0x761   :  { %v3527_v23 = vadd.f32 %v3526_v18, %v3483_v13  ;;  %v7316_v13 = vld [vmem:[%s9288_s5 + $0x514] ss:$8 sps:$4 sm:$0xff]   ;;  %v7319_v18 = vld [vmem:[%s9288_s5 + $0x504] ss:$8 sps:$4 sm:$0xff]  }
 0x762   :  { %v3528_v25 = vpop.f32.mrf.mxu1 }
 0x763   :  { %v8650_v28 = vadd.f32 %v3527_v23, %v3123_v40  ;;  %v3529_v2 = vadd.f32 %v3528_v25, %v3485_v55  ;;  %v7314_v55 = vld [vmem:[%s9288_s5 + $0x510] ss:$8 sps:$4 sm:$0xff]   ;;  %v7322_v40 = vld [vmem:[%s9288_s5 + $0x594] ss:$8 sps:$4 sm:$0xff]   ;;  %v7325_v25 = vld [vmem:[%s9288_s5 + $0x584] ss:$8 sps:$4 sm:$0xff]  }
 0x764   :  { %v3530_v24 = vpop.f32.mrf.mxu1  ;;  %v7320_v23 = vld [vmem:[%s9288_s5 + $0x590] ss:$8 sps:$4 sm:$0xff]   ;;  %4320 = vmatprep.subr.bf16.mxu1 %v7322_v40 }
 0x765   :  { %v8654_v37 = vadd.f32 %v3529_v2, %v3125_v8  ;;  %v3531_v31 = vadd.f32 %v3530_v24, %v3487_v21  ;;  %v7317_v21 = vld [vmem:[%s9288_s5 + $0x500] ss:$8 sps:$4 sm:$0xff]  }
 0x766   :  { %v3532_v38 = vpop.f32.mrf.mxu1  ;;  %v7323_v8 = vld [vmem:[%s9288_s5 + $0x580] ss:$8 sps:$4 sm:$0xff]  }
 0x767   :  { %v8658_v57 = vadd.f32 %v3531_v31, %v3127_v34  ;;  %v3533_v10 = vadd.f32 %v3532_v38, %v3489_v48 }
 0x769   :  { %v8660_v46 = vadd.f32 %v3533_v10, %v3129_v30 }
 0x76c   :  { %v3584_v62 = vpop.f32.mrf.mxu1 }
 0x76e   :  { %v3586_v14 = vpop.f32.mrf.mxu1 }
 0x770   :  { %v3588_v51 = vpop.f32.mrf.mxu1 }
 0x771   :  { %v3634_v45 = vpack.c.bf16 %v3588_v51, %v3584_v62 }
 0x772   :  { %v3590_v53 = vpop.f32.mrf.mxu1 }
 0x773   :  { %v3635_v42 = vpack.c.bf16 %v3590_v53, %v3586_v14 }
 0x775   :  { %3889 = vmatprep.mubr.bf16.mxu1 %v3635_v42 }
 0x776   :  { %3890 = vmatmul.mubr.bf16.vlgmr.msra.gmra.mxu1 %v3634_v45 }
 0x777   :  { %4340 = vmatprep.mubr.bf16.mxu1 %v7487_v1  ;;  %4321 = vmatpush1.bf16.msra.mxu1 %v7320_v23 }
 0x778   :  { %v3627_v19 = vpop.f32.mrf.mxu1  ;;  %4322 = vmatprep.subr.bf16.mxu1 %v7325_v25 }
 0x77a   :  { %v6777_v16 = vpop.f32.mrf.mxu1 }
 0x77b   :  { %4323 = vmatpush1.bf16.msra.mxu1 %v7323_v8 }
 0x77c   :  { %v3630_v5 = vpop.f32.mrf.mxu1 }
 0x77d   :  { %v3636_v27 = vpack.c.bf16 %v3630_v5, %v3627_v19 }
 0x77e   :  { %v6778_v43 = vpop.f32.mrf.mxu1 }
 0x77f   :  { %6375 = vmatmul.mubr.msk.bf16.vlgmr.msra.gmra.mxu0 %vm534_vm1, %v3636_v27 }
 0x780   :  { %3969 = vmatpush1.bf16.msra.mxu0 %v8088_v15  ;;  %3990 = vmatprep.mubr.bf16.mxu0 %v7487_v1  ;;  %v7283_v15 = vld [vmem:[%s9288_s5 + $0x4c4] ss:$8 sps:$4 sm:$0xff]  }
 0x781   :  { %3970 = vmatprep.subr.bf16.mxu0 %v8081_v3  ;;  %v7278_v3 = vld [vmem:[%s9288_s5 + $0x4d0] ss:$8 sps:$4 sm:$0xff]  }
 0x784   :  { %3971 = vmatpush1.bf16.msra.mxu0 %v8075_v6  ;;  %v7277_v6 = vld [vmem:[%s9288_s5 + $0x4e4] ss:$8 sps:$4 sm:$0xff]  }
 0x785   :  { %3972 = vmatprep.subr.bf16.mxu0 %v8064_v26  ;;  %v7274_v26 = vld [vmem:[%s9288_s5 + $0x4f4] ss:$8 sps:$4 sm:$0xff]  }
 0x788   :  { %3973 = vmatpush1.bf16.msra.mxu0 %v8058_v20  ;;  %v7272_v20 = vld [vmem:[%s9288_s5 + $0x4f0] ss:$8 sps:$4 sm:$0xff]  }
 0x789   :  { %6779 = vmatprep.subr.bf16.mxu0 %v7488_v11 }
 0x78b   :  { %6380 = vmatmul.mubr.msk.bf16.vlgmr.msra.gmra.mxu0 %vm2321_vm3, %v7271_v4 }
 0x78c   :  { %6780 = vmatpush3.bf16.msra.mxu0 %v8122_v49  ;;  %6785 = vmatprep.mubr.msk.bf16.mxu0 %vm7489_vm4, %v7488_v11  ;;  %v7281_v49 = vld [vmem:[%s9288_s5 + $0x4c0] ss:$8 sps:$4 sm:$0xff]  }
 0x78d   :  { %6781 = vmatprep.subr.bf16.mxu0 %v7488_v11 }
 0x790   :  { %6782 = vmatpush3.bf16.msra.mxu0 %v8078_v54  ;;  %v7275_v54 = vld [vmem:[%s9288_s5 + $0x4e0] ss:$8 sps:$4 sm:$0xff]  }
 0x791   :  { %6783 = vmatprep.subr.bf16.mxu0 %v7488_v11 }
 0x794   :  { %6784 = vmatpush3.bf16.msra.mxu0 %v8060_v56  ;;  %v7280_v56 = vld [vmem:[%s9288_s5 + $0x4d4] ss:$8 sps:$4 sm:$0xff]  }
 0x795   :  { %4265 = vmatprep.subr.bf16.mxu0 %v7274_v26 }
 0x797   :  { %6786 = vmatmul.mubr.msk.bf16.vlgmr.msra.gmra.mxu0 %vm2321_vm3, %v7271_v4 }
 0x798   :  { %4266 = vmatpush1.bf16.msra.mxu0 %v7272_v20 }
 0x799   :  { %4267 = vmatprep.subr.bf16.mxu0 %v7277_v6  ;;  %v7328_v6 = vld [vmem:[%s9291_s8 + $0x28] sm:$0xff]  }
 0x79c   :  { %4268 = vmatpush1.bf16.msra.mxu0 %v7275_v54 }
 0x79d   :  { %4269 = vmatprep.subr.bf16.mxu0 %v7280_v56 }
 0x7a0   :  { %4270 = vmatpush1.bf16.msra.mxu0 %v7278_v3 }
 0x7a1   :  { %4271 = vmatprep.subr.bf16.mxu0 %v7283_v15  ;;  %v7329_v15 = vld [vmem:[%s9291_s8 + $0x20] sm:$0xff]  }
 0x7a4   :  { %4272 = vmatpush1.bf16.msra.mxu0 %v7281_v49  ;;  %v7330_v49 = vld [vmem:[%s9291_s8 + $0x18] sm:$0xff]  }
 0x7a5   :  { %4273 = vmatprep.subr.bf16.mxu0 %v7286_v36  ;;  %v7331_v36 = vld [vmem:[%s9291_s8 + $0x10] sm:$0xff]  }
 0x7a8   :  { %4274 = vmatpush1.bf16.msra.mxu0 %v7284_v29  ;;  %v7332_v29 = vld [vmem:[%s9291_s8 + $0x8] sm:$0xff]  }
 0x7a9   :  { %4275 = vmatprep.subr.bf16.mxu0 %v7289_v47  ;;  %v7333_v47 = vld [vmem:[%s9291_s8] sm:$0xff]  }
 0x7ac   :  { %4276 = vmatpush1.bf16.msra.mxu0 %v7287_v63  ;;  %v7334_v63 = vld [vmem:[%s9291_s8 + $0x68] sm:$0xff]  }
 0x7ad   :  { %4277 = vmatprep.subr.bf16.mxu0 %v7292_v44  ;;  %v7335_v44 = vld [vmem:[%s9291_s8 + $0x60] sm:$0xff]  }
 0x7b0   :  { %4278 = vmatpush1.bf16.msra.mxu0 %v7290_v39  ;;  %v7336_v39 = vld [vmem:[%s9291_s8 + $0x58] sm:$0xff]  }
 0x7b1   :  { %4279 = vmatprep.subr.bf16.mxu0 %v7295_v59  ;;  %v7337_v59 = vld [vmem:[%s9291_s8 + $0x50] sm:$0xff]  }
 0x7b4   :  { %4280 = vmatpush1.bf16.msra.mxu0 %v7293_v33  ;;  %v7338_v33 = vld [vmem:[%s9291_s8 + $0x48] sm:$0xff]  }
 0x7b5   :  { %4281 = vmatprep.subr.bf16.mxu0 %v7298_v60  ;;  %v7339_v60 = vld [vmem:[%s9291_s8 + $0x40] sm:$0xff]  }
 0x7b8   :  { %4282 = vmatpush2.bf16.msra.mxu0 %v7296_v0 }
 0x7b9   :  { %4283 = vmatprep.subr.bf16.mxu0 %v7301_v58 }
 0x7bc   :  { %4284 = vmatpush2.bf16.msra.mxu0 %v7299_v35 }
 0x7bd   :  { %4285 = vmatprep.subr.bf16.mxu0 %v7304_v22  ;;  %v4355_v22 = vld [vmem:[%s9289_s6] sm:$0x3] }
 0x7c0   :  { %4286 = vmatpush2.bf16.msra.mxu0 %v7302_v50 }
 0x7c1   :  { %4287 = vmatprep.subr.bf16.mxu0 %v7307_v7 }
 0x7c4   :  { %4288 = vmatpush2.bf16.msra.mxu0 %v7305_v41 }
 0x7c5   :  { %4289 = vmatprep.subr.bf16.mxu0 %v7310_v9 }
 0x7c8   :  { %4290 = vmatpush2.bf16.msra.mxu0 %v7308_v52  ;;  %v4360_v52 = vrot.slane %v4355_v22, %v8023_v61 }
 0x7c9   :  { %4291 = vmatprep.subr.bf16.mxu0 %v7313_v12 }
 0x7cc   :  { %4292 = vmatpush2.bf16.msra.mxu0 %v7311_v17 }
 0x7cd   :  { %4293 = vmatprep.subr.bf16.mxu0 %v7316_v13 }
 0x7d0   :  { %4294 = vmatpush2.bf16.msra.mxu0 %v7314_v55  ;;  %v4364_v55 = vrot.slane %v4355_v22, %v8028_v32  ;;  %v7370_v22 = vld [vmem:[%s9291_s8 + $0x178] sm:$0xff]  }
 0x7d1   :  { %4295 = vmatprep.subr.bf16.mxu0 %v7319_v18 }
 0x7d4   :  { %4296 = vmatpush2.bf16.msra.mxu0 %v7317_v21 }
 0x7d5   :  { %4752 = vmatprep.subr.bf16.mxu0 %v7487_v1 }
 0x836   :  { %v3891_v2 = vpop.f32.mrf.mxu1 }
 0x838   :  { %v3893_v24 = vpop.f32.mrf.mxu1 }
 0x83a   :  { %v3895_v31 = vpop.f32.mrf.mxu1 }
 0x83c   :  { %v3897_v53 = vpop.f32.mrf.mxu1 }
 0x83f   :  { %v3934_v48 = vpop.f32.mrf.mxu0 }
 0x840   :  { %v3935_v34 = vadd.f32 %v3934_v48, %v3891_v2 }
 0x841   :  { %v3936_v38 = vpop.f32.mrf.mxu0 }
 0x842   :  { %v8793_v30 = vadd.f32 %v3935_v34, %v8650_v28  ;;  %v3937_v10 = vadd.f32 %v3936_v38, %v3893_v24 }
 0x843   :  { %v3938_v62 = vpop.f32.mrf.mxu0 }
 0x844   :  { %v8796_v14 = vadd.f32 %v3937_v10, %v8654_v37  ;;  %v3939_v51 = vadd.f32 %v3938_v62, %v3895_v31  ;;  %v7326_v37 = vld [vmem:[%s9291_s8 + $0x38] sm:$0xff]  }
 0x845   :  { %v3940_v42 = vpop.f32.mrf.mxu0 }
 0x846   :  { %v8799_v45 = vadd.f32 %v3939_v51, %v8658_v57  ;;  %v3941_v19 = vadd.f32 %v3940_v42, %v3897_v53  ;;  %v7327_v57 = vld [vmem:[%s9291_s8 + $0x30] sm:$0xff]   ;;  %v4377_v53 = vld [vmem:[%s9290_s7] sm:$0x3]  ;;  %v6457_v42 = vld [vmem:[%s9290_s7 + $0x2] sm:$0x3] }
 0x848   :  { %v8802_v16 = vadd.f32 %v3941_v19, %v8660_v46  ;;  %v7341_v19 = vld [vmem:[%s9291_s8 + $0xa0] sm:$0xff]  }
 0x84b   :  { %v3992_v5 = vpop.f32.mrf.mxu0 }
 0x84d   :  { %v3994_v27 = vpop.f32.mrf.mxu0 }
 0x84f   :  { %v3996_v43 = vpop.f32.mrf.mxu0 }
 0x850   :  { %v4042_v26 = vpack.c.bf16 %v3996_v43, %v3992_v5  ;;  %v7343_v5 = vld [vmem:[%s9291_s8 + $0x90] sm:$0xff]   ;;  %v7345_v43 = vld [vmem:[%s9291_s8 + $0x80] sm:$0xff]  }
 0x851   :  { %v3998_v28 = vpop.f32.mrf.mxu0 }
 0x852   :  { %v4043_v4 = vpack.c.bf16 %v3998_v28, %v3994_v27  ;;  %v7344_v27 = vld [vmem:[%s9291_s8 + $0x88] sm:$0xff]   ;;  %v7346_v28 = vld [vmem:[%s9291_s8 + $0x78] sm:$0xff]  }
 0x854   :  { %4297 = vmatprep.mubr.bf16.mxu0 %v4043_v4  ;;  %v7347_v4 = vld [vmem:[%s9291_s8 + $0x70] sm:$0xff]  }
 0x855   :  { %4298 = vmatmul.mubr.bf16.vlgmr.msra.gmra.mxu0 %v4042_v26  ;;  %v7349_v26 = vld [vmem:[%s9291_s8 + $0xd0] sm:$0xff]  }
 0x856   :  { %4753 = vmatpush1.bf16.msra.mxu0 %v7326_v37  ;;  %v7348_v37 = vld [vmem:[%s9291_s8 + $0xd8] sm:$0xff]  }
 0x857   :  { %v4035_v20 = vpop.f32.mrf.mxu0  ;;  %4754 = vmatprep.subr.bf16.mxu0 %v7487_v1 }
 0x859   :  { %v6787_v46 = vpop.f32.mrf.mxu0 }
 0x85a   :  { %4755 = vmatpush1.bf16.msra.mxu0 %v7327_v57  ;;  %v7350_v57 = vld [vmem:[%s9291_s8 + $0xc8] sm:$0xff]   ;;  %v7352_v46 = vld [vmem:[%s9291_s8 + $0xb8] sm:$0xff]  }
 0x85b   :  { %v4038_v54 = vpop.f32.mrf.mxu0  ;;  %4756 = vmatprep.subr.bf16.mxu0 %v7487_v1 }
 0x85c   :  { %v4044_v56 = vpack.c.bf16 %v4038_v54, %v4035_v20  ;;  %v7351_v20 = vld [vmem:[%s9291_s8 + $0xc0] sm:$0xff]  }
 0x85d   :  { %v6788_v3 = vpop.f32.mrf.mxu0 }
 0x85e   :  { %6454 = vmatmul.mubr.msk.bf16.vlgmr.msra.gmra.mxu1 %vm534_vm1, %v4044_v56  ;;  %4757 = vmatpush1.bf16.msra.mxu0 %v7328_v6  ;;  %v7353_v6 = vld [vmem:[%s9291_s8 + $0xb0] sm:$0xff]  }
 0x85f   :  { %4758 = vmatprep.subr.bf16.mxu0 %v7487_v1  ;;  %4421 = vmatprep.mubr.bf16.mxu1 %v7487_v1 }
 0x862   :  { %4759 = vmatpush1.bf16.msra.mxu0 %v7329_v15 }
 0x863   :  { %4760 = vmatprep.subr.bf16.mxu0 %v7487_v1 }
 0x866   :  { %4761 = vmatpush1.bf16.msra.mxu0 %v7330_v49 }
 0x867   :  { %4762 = vmatprep.subr.bf16.mxu0 %v7487_v1 }
 0x86a   :  { %4763 = vmatpush1.bf16.msra.mxu0 %v7331_v36 }
 0x86b   :  { %4764 = vmatprep.subr.bf16.mxu0 %v7487_v1 }
 0x86e   :  { %4765 = vmatpush1.bf16.msra.mxu0 %v7332_v29 }
 0x86f   :  { %4766 = vmatprep.subr.bf16.mxu0 %v7487_v1 }
 0x872   :  { %4767 = vmatpush1.bf16.msra.mxu0 %v7333_v47 }
 0x873   :  { %4772 = vmatprep.subr.bf16.mxu0 %v7487_v1 }
 0x876   :  { %4773 = vmatpush2.bf16.msra.mxu0 %v7334_v63 }
 0x877   :  { %4774 = vmatprep.subr.bf16.mxu0 %v7487_v1 }
 0x87a   :  { %4775 = vmatpush2.bf16.msra.mxu0 %v7335_v44  ;;  %v6564_v44 = vld [vmem:[%s9290_s7 + $0x6] sm:$0x3] }
 0x87b   :  { %4776 = vmatprep.subr.bf16.mxu0 %v7487_v1 }
 0x87e   :  { %4777 = vmatpush2.bf16.msra.mxu0 %v7336_v39 }
 0x87f   :  { %4778 = vmatprep.subr.bf16.mxu0 %v7487_v1 }
 0x882   :  { %4779 = vmatpush2.bf16.msra.mxu0 %v7337_v59 }
 0x883   :  { %4780 = vmatprep.subr.bf16.mxu0 %v7487_v1 }
 0x886   :  { %4781 = vmatpush2.bf16.msra.mxu0 %v7338_v33  ;;  %v7368_v33 = vld [vmem:[%s9291_s8 + $0x188] sm:$0xff]  }
 0x887   :  { %4782 = vmatprep.subr.bf16.mxu0 %v7487_v1 }
 0x88a   :  { %4783 = vmatpush2.bf16.msra.mxu0 %v7339_v60 }
 0x915   :  { %v4299_v0 = vpop.f32.mrf.mxu0 }
 0x917   :  { %v4301_v58 = vpop.f32.mrf.mxu0 }
 0x919   :  { %v4303_v7 = vpop.f32.mrf.mxu0 }
 0x91b   :  { %v4305_v21 = vpop.f32.mrf.mxu0 }
 0x91e   :  { %v4342_v35 = vpop.f32.mrf.mxu1 }
 0x91f   :  { %v4343_v50 = vadd.f32 %v4342_v35, %v4299_v0  ;;  %v7369_v0 = vld [vmem:[%s9291_s8 + $0x180] sm:$0xff]   ;;  %v7354_v35 = vld [vmem:[%s9291_s8 + $0x118] sm:$0xff]  }
 0x920   :  { %v4344_v41 = vpop.f32.mrf.mxu1 }
 0x921   :  { %v4351_v9 = vadd.f32 %v4343_v50, %v8793_v30  ;;  %v4345_v12 = vadd.f32 %v4344_v41, %v4301_v58  ;;  %v6518_v58 = vld [vmem:[%s9290_s7 + $0x4] sm:$0x3]  ;;  %v7355_v50 = vld [vmem:[%s9291_s8 + $0x110] sm:$0xff]   ;;  %v7356_v41 = vld [vmem:[%s9291_s8 + $0x108] sm:$0xff]  }
 0x922   :  { %v4346_v17 = vpop.f32.mrf.mxu1 }
 0x923   :  { %v4352_v13 = vadd.f32 %v4345_v12, %v8796_v14  ;;  %v4347_v18 = vadd.f32 %v4346_v17, %v4303_v7  ;;  %v4367_v23 = vadd.f32 %v4360_v52, %v4351_v9  ;;  %v7371_v7 = vld [vmem:[%s9291_s8 + $0x170] sm:$0xff]   ;;  %v7372_v9 = vld [vmem:[%s9291_s8 + $0x168] sm:$0xff]   ;;  %v7373_v12 = vld [vmem:[%s9291_s8 + $0x160] sm:$0xff]  }
 0x924   :  { %v4348_v40 = vpop.f32.mrf.mxu1  ;;  %v7358_v17 = vld [vmem:[%s9291_s8 + $0xf8] sm:$0xff]  }
 0x925   :  { %v4353_v25 = vadd.f32 %v4347_v18, %v8799_v45  ;;  %v4349_v8 = vadd.f32 %v4348_v40, %v4305_v21  ;;  %v4368_v2 = vadd.f32 %v4364_v55, %v4352_v13  ;;  %v4371_v34 = vmax.f32 %v4367_v23, 0.0  ;;  %v7340_v45 = vld [vmem:[%s9291_s8 + $0xa8] sm:$0xff]   ;;  %v7374_v13 = vld [vmem:[%s9291_s8 + $0x158] sm:$0xff]   ;;  %v7375_v18 = vld [vmem:[%s9291_s8 + $0x150] sm:$0xff]  }
 0x926   :  { %v7360_v21 = vld [vmem:[%s9291_s8 + $0xe8] sm:$0xff]   ;;  %v7376_v40 = vld [vmem:[%s9291_s8 + $0x1b8] sm:$0xff]   ;;  %v7361_v23 = vld [vmem:[%s9291_s8 + $0xe0] sm:$0xff]  }
 0x927   :  { %v4369_v24 = vadd.f32 %v4360_v52, %v4353_v25  ;;  %v4354_v48 = vadd.f32 %v4349_v8, %v8802_v16  ;;  %v4372_v30 = vmax.f32 %v4368_v2, 0.0  ;;  %v7342_v16 = vld [vmem:[%s9291_s8 + $0x98] sm:$0xff]   ;;  %v7357_v52 = vld [vmem:[%s9291_s8 + $0x100] sm:$0xff]   ;;  %v7362_v25 = vld [vmem:[%s9291_s8 + $0x148] sm:$0xff]  }
 0x928   :  { %v7363_v8 = vld [vmem:[%s9291_s8 + $0x140] sm:$0xff]   ;;  %v7364_v2 = vld [vmem:[%s9291_s8 + $0x138] sm:$0xff]  }
 0x929   :  { %v4373_v31 = vmax.f32 %v4369_v24, 0.0  ;;  %v4370_v38 = vadd.f32 %v4364_v55, %v4354_v48  ;;  %v7359_v55 = vld [vmem:[%s9291_s8 + $0xf0] sm:$0xff]   ;;  %v7366_v48 = vld [vmem:[%s9291_s8 + $0x128] sm:$0xff]  }
 0x92a   :  { %v7365_v24 = vld [vmem:[%s9291_s8 + $0x130] sm:$0xff]  }
 0x92b   :  { %v4375_v10 = vpack.c.bf16 %v4373_v31, %v4371_v34  ;;  %v4374_v62 = vmax.f32 %v4370_v38, 0.0  ;;  %v7367_v34 = vld [vmem:[%s9291_s8 + $0x120] sm:$0xff]   ;;  %v7377_v31 = vld [vmem:[%s9291_s8 + $0x1b0] sm:$0xff]   ;;  %v7378_v38 = vld [vmem:[%s9291_s8 + $0x1a8] sm:$0xff]  }
 0x92d   :  { %v8870_v14 = vpack.c.bf16 %v4374_v62, %v4372_v30  ;;  %v8877_v51 = vsel %vm4382_vm5, %v4375_v10, 0  ;;  %v7379_v30 = vld [vmem:[%s9291_s8 + $0x1a0] sm:$0xff]   ;;  %v7380_v10 = vld [vmem:[%s9291_s8 + $0x198] sm:$0xff]   ;;  %v7381_v62 = vld [vmem:[%s9291_s8 + $0x190] sm:$0xff]  }
 0x92f   :  { %6455 = vmatprep.subr.msk.bf16.mxu1 %vm4382_vm5, %v8870_v14  ;;  %6565 = vmatprep.subr.msk.bf16.mxu0 %vm4382_vm5, %v8870_v14 }
 0x930   :  { %4404 = vmatpush1.bf16.msra.mxu1 %v8877_v51 }
 0x931   :  { %6458 = vmatprep.subr.msk.bf16.mxu1 %vm4382_vm5, %v8870_v14 }
 0x933   :  { %6456 = vmatmul.mubr.msk.bf16.vlgmr.msra.gmra.mxu1 %vm4378_vm6, %v4377_v53 }
 0x934   :  { %4480 = vmatpush1.bf16.msra.mxu1 %v8877_v51  ;;  %4497 = vmatprep.mubr.bf16.mxu1 %v7487_v1 }
 0x935   :  { %4625 = vmatprep.subr.bf16.mxu1 %v7487_v1 }
 0x93b   :  { %6459 = vmatmul.mubr.msk.bf16.vlgmr.msra.gmra.mxu1 %vm4378_vm6, %v6457_v42 }
 0x93c   :  { %4626 = vmatpush1.bf16.msra.mxu1 %v7340_v45 }
 0x93d   :  { %4627 = vmatprep.subr.bf16.mxu1 %v7487_v1 }
 0x940   :  { %4628 = vmatpush1.bf16.msra.mxu1 %v7341_v19 }
 0x941   :  { %4629 = vmatprep.subr.bf16.mxu1 %v7487_v1 }
 0x944   :  { %4630 = vmatpush1.bf16.msra.mxu1 %v7342_v16 }
 0x945   :  { %4631 = vmatprep.subr.bf16.mxu1 %v7487_v1 }
 0x948   :  { %4632 = vmatpush1.bf16.msra.mxu1 %v7343_v5 }
 0x949   :  { %4633 = vmatprep.subr.bf16.mxu1 %v7487_v1 }
 0x94c   :  { %4634 = vmatpush1.bf16.msra.mxu1 %v7344_v27 }
 0x94d   :  { %4635 = vmatprep.subr.bf16.mxu1 %v7487_v1 }
 0x950   :  { %4636 = vmatpush1.bf16.msra.mxu1 %v7345_v43 }
 0x951   :  { %4637 = vmatprep.subr.bf16.mxu1 %v7487_v1 }
 0x954   :  { %4638 = vmatpush1.bf16.msra.mxu1 %v7346_v28 }
 0x955   :  { %4639 = vmatprep.subr.bf16.mxu1 %v7487_v1 }
 0x958   :  { %4640 = vmatpush1.bf16.msra.mxu1 %v7347_v4 }
 0x959   :  { %4645 = vmatprep.subr.bf16.mxu1 %v7487_v1 }
 0x95c   :  { %4646 = vmatpush2.bf16.msra.mxu1 %v7348_v37 }
 0x95d   :  { %4647 = vmatprep.subr.bf16.mxu1 %v7487_v1 }
 0x960   :  { %4648 = vmatpush2.bf16.msra.mxu1 %v7349_v26 }
 0x961   :  { %4649 = vmatprep.subr.bf16.mxu1 %v7487_v1 }
 0x964   :  { %4650 = vmatpush2.bf16.msra.mxu1 %v7350_v57 }
 0x965   :  { %4651 = vmatprep.subr.bf16.mxu1 %v7487_v1 }
 0x968   :  { %4652 = vmatpush2.bf16.msra.mxu1 %v7351_v20 }
 0x969   :  { %4653 = vmatprep.subr.bf16.mxu1 %v7487_v1 }
 0x96c   :  { %4654 = vmatpush2.bf16.msra.mxu1 %v7352_v46 }
 0x96d   :  { %4655 = vmatprep.subr.bf16.mxu1 %v7487_v1 }
 0x970   :  { %4656 = vmatpush2.bf16.msra.mxu1 %v7353_v6 }
 0x971   :  { %6519 = vmatprep.subr.msk.bf16.mxu1 %vm4382_vm5, %v8870_v14 }
 0x9f3   :  { %v4423_v54 = vpop.f32.mrf.mxu1 }
 0x9f4   :  { %v4430_v15 = vpack.c.bf16 %v4423_v54, %v4423_v54 }
 0x9f5   :  { %v4425_v56 = vpop.f32.mrf.mxu1 }
 0x9f6   :  { %v4431_v3 = vpack.c.bf16 %v4425_v56, %v4425_v56 }
 0x9f7   :  { %v4427_v49 = vpop.f32.mrf.mxu1 }
 0x9f8   :  { %6517 = vmatprep.mubr.msk.bf16.mxu0 %vm4621_vm7, %v4431_v3  ;;  %v6610_v49 = vld [vmem:[%s9290_s7 + $0x8] sm:$0x3] }
 0x9f9   :  { %v4428_v36 = vpop.f32.mrf.mxu1  ;;  %4785 = vmatmul.mubr.bf16.vlgmr.msra.gmra.mxu0 %v4430_v15 }
 0x9fa   :  { %5017 = vmatpush1.bf16.msra.mxu0 %v8877_v51  ;;  %5034 = vmatprep.mubr.bf16.mxu0 %v7487_v1  ;;  %v7382_v36 = vld [vmem:[%s9291_s8 + $0x1f8] sm:$0xff]  }
 0x9fb   :  { %v4499_v29 = vpop.f32.mrf.mxu1  ;;  %5161 = vmatprep.subr.bf16.mxu0 %v7487_v1 }
 0x9fc   :  { %v4506_v39 = vpack.c.bf16 %v4499_v29, %v4499_v29  ;;  %v7383_v29 = vld [vmem:[%s9291_s8 + $0x1f0] sm:$0xff]  }
 0x9fd   :  { %v4501_v47 = vpop.f32.mrf.mxu1 }
 0x9fe   :  { %v4507_v63 = vpack.c.bf16 %v4501_v47, %v4501_v47  ;;  %v7385_v47 = vld [vmem:[%s9291_s8 + $0x1e0] sm:$0xff]  }
 0x9ff   :  { %v4503_v59 = vpop.f32.mrf.mxu1 }
 0xa00   :  { %6502 = vmatprep.mubr.msk.bf16.mxu1 %vm4621_vm7, %v4507_v63  ;;  %v7386_v63 = vld [vmem:[%s9291_s8 + $0x1d8] sm:$0xff]   ;;  %v7389_v59 = vld [vmem:[%s9291_s8 + $0x1c0] sm:$0xff]  }
 0xa01   :  { %4658 = vmatmul.mubr.bf16.vlgmr.msra.gmra.mxu1 %v4506_v39  ;;  %v4504_v60 = vpop.f32.mrf.mxu1  ;;  %6566 = vmatmul.mubr.msk.bf16.vlgmr.msra.gmra.mxu0 %vm4378_vm6, %v6564_v44  ;;  %v7387_v44 = vld [vmem:[%s9291_s8 + $0x1d0] sm:$0xff]   ;;  %v7388_v39 = vld [vmem:[%s9291_s8 + $0x1c8] sm:$0xff]  }
 0xa02   :  { %4812 = vmatpush1.bf16.msra.mxu1 %v8877_v51  ;;  %4829 = vmatprep.mubr.bf16.mxu1 %v7487_v1  ;;  %v7391_v60 = vld [vmem:[%s9291_s8 + $0x220] sm:$0xff]  }
 0xa03   :  { %4956 = vmatprep.subr.bf16.mxu1 %v7487_v1  ;;  %5162 = vmatpush1.bf16.msra.mxu0 %v7368_v33  ;;  %v7390_v33 = vld [vmem:[%s9291_s8 + $0x228] sm:$0xff]  }
 0xa04   :  { %5163 = vmatprep.subr.bf16.mxu0 %v7487_v1 }
 0xa07   :  { %5164 = vmatpush1.bf16.msra.mxu0 %v7369_v0  ;;  %v7392_v0 = vld [vmem:[%s9291_s8 + $0x218] sm:$0xff]  }
 0xa08   :  { %5165 = vmatprep.subr.bf16.mxu0 %v7487_v1 }
 0xa09   :  { %6520 = vmatmul.mubr.msk.bf16.vlgmr.msra.gmra.mxu1 %vm4378_vm6, %v6518_v58  ;;  %v7393_v58 = vld [vmem:[%s9291_s8 + $0x210] sm:$0xff]  }
 0xa0a   :  { %4957 = vmatpush1.bf16.msra.mxu1 %v7354_v35  ;;  %v7394_v35 = vld [vmem:[%s9291_s8 + $0x208] sm:$0xff]  }
 0xa0b   :  { %4958 = vmatprep.subr.bf16.mxu1 %v7487_v1  ;;  %5166 = vmatpush1.bf16.msra.mxu0 %v7370_v22  ;;  %v7395_v22 = vld [vmem:[%s9291_s8 + $0x200] sm:$0xff]  }
 0xa0c   :  { %5167 = vmatprep.subr.bf16.mxu0 %v7487_v1 }
 0xa0e   :  { %4959 = vmatpush1.bf16.msra.mxu1 %v7355_v50  ;;  %v7396_v50 = vld [vmem:[%s9293_s10 + $0x70] ss:$8 sps:$4 sm:$0xff]  }
 0xa0f   :  { %4960 = vmatprep.subr.bf16.mxu1 %v7487_v1  ;;  %5168 = vmatpush1.bf16.msra.mxu0 %v7371_v7  ;;  %v7398_v7 = vld [vmem:[%s9293_s10 + $0x74] ss:$8 sps:$4 sm:$0xff]  }
 0xa10   :  { %5169 = vmatprep.subr.bf16.mxu0 %v7487_v1 }
 0xa12   :  { %4961 = vmatpush1.bf16.msra.mxu1 %v7356_v41  ;;  %v7401_v41 = vld [vmem:[%s9293_s10 + $0x64] ss:$8 sps:$4 sm:$0xff]  }
 0xa13   :  { %4962 = vmatprep.subr.bf16.mxu1 %v7487_v1  ;;  %5170 = vmatpush1.bf16.msra.mxu0 %v7372_v9  ;;  %v7399_v9 = vld [vmem:[%s9293_s10 + $0x60] ss:$8 sps:$4 sm:$0xff]  }
 0xa14   :  { %5171 = vmatprep.subr.bf16.mxu0 %v7487_v1 }
 0xa16   :  { %4963 = vmatpush1.bf16.msra.mxu1 %v7357_v52 }
 0xa17   :  { %4964 = vmatprep.subr.bf16.mxu1 %v7487_v1  ;;  %5172 = vmatpush1.bf16.msra.mxu0 %v7373_v12 }
 0xa18   :  { %5173 = vmatprep.subr.bf16.mxu0 %v7487_v1 }
 0xa1a   :  { %4965 = vmatpush1.bf16.msra.mxu1 %v7358_v17 }
 0xa1b   :  { %4966 = vmatprep.subr.bf16.mxu1 %v7487_v1  ;;  %5174 = vmatpush1.bf16.msra.mxu0 %v7374_v13 }
 0xa1c   :  { %5175 = vmatprep.subr.bf16.mxu0 %v7487_v1 }
 0xa1e   :  { %4967 = vmatpush1.bf16.msra.mxu1 %v7359_v55 }
 0xa1f   :  { %4968 = vmatprep.subr.bf16.mxu1 %v7487_v1  ;;  %5176 = vmatpush1.bf16.msra.mxu0 %v7375_v18 }
 0xa20   :  { %5181 = vmatprep.subr.bf16.mxu0 %v7487_v1 }
 0xa22   :  { %4969 = vmatpush1.bf16.msra.mxu1 %v7360_v21 }
 0xa23   :  { %4970 = vmatprep.subr.bf16.mxu1 %v7487_v1  ;;  %5182 = vmatpush2.bf16.msra.mxu0 %v7376_v40 }
 0xa24   :  { %5183 = vmatprep.subr.bf16.mxu0 %v7487_v1 }
 0xa26   :  { %4971 = vmatpush1.bf16.msra.mxu1 %v7361_v23 }
 0xa27   :  { %4976 = vmatprep.subr.bf16.mxu1 %v7487_v1  ;;  %5184 = vmatpush2.bf16.msra.mxu0 %v7377_v31 }
 0xa28   :  { %5185 = vmatprep.subr.bf16.mxu0 %v7487_v1 }
 0xa2a   :  { %4977 = vmatpush2.bf16.msra.mxu1 %v7362_v25 }
 0xa2b   :  { %4978 = vmatprep.subr.bf16.mxu1 %v7487_v1  ;;  %5186 = vmatpush2.bf16.msra.mxu0 %v7378_v38  ;;  %v7404_v38 = vld [vmem:[%s9293_s10 + $0x54] ss:$8 sps:$4 sm:$0xff]  }
 0xa2c   :  { %5187 = vmatprep.subr.bf16.mxu0 %v7487_v1 }
 0xa2e   :  { %4979 = vmatpush2.bf16.msra.mxu1 %v7363_v8 }
 0xa2f   :  { %4980 = vmatprep.subr.bf16.mxu1 %v7487_v1  ;;  %5188 = vmatpush2.bf16.msra.mxu0 %v7379_v30  ;;  %v7402_v30 = vld [vmem:[%s9293_s10 + $0x50] ss:$8 sps:$4 sm:$0xff]  }
 0xa30   :  { %5189 = vmatprep.subr.bf16.mxu0 %v7487_v1 }
 0xa32   :  { %4981 = vmatpush2.bf16.msra.mxu1 %v7364_v2 }
 0xa33   :  { %4982 = vmatprep.subr.bf16.mxu1 %v7487_v1  ;;  %5190 = vmatpush2.bf16.msra.mxu0 %v7380_v10  ;;  %v7407_v10 = vld [vmem:[%s9293_s10 + $0x44] ss:$8 sps:$4 sm:$0xff]  }
 0xa34   :  { %5191 = vmatprep.subr.bf16.mxu0 %v7487_v1 }
 0xa36   :  { %4983 = vmatpush2.bf16.msra.mxu1 %v7365_v24 }
 0xa37   :  { %4984 = vmatprep.subr.bf16.mxu1 %v7487_v1  ;;  %5192 = vmatpush2.bf16.msra.mxu0 %v7381_v62  ;;  %v7405_v62 = vld [vmem:[%s9293_s10 + $0x40] ss:$8 sps:$4 sm:$0xff]  }
 0xa38   :  { %5488 = vmatprep.subr.bf16.mxu0 %v7398_v7  ;;  %v5605_v7 = vld [vmem:[%s9294_s11] sm:$0x3] }
 0xa3a   :  { %4985 = vmatpush2.bf16.msra.mxu1 %v7366_v48 }
 0xa3b   :  { %4986 = vmatprep.subr.bf16.mxu1 %v7487_v1 }
 0xa3e   :  { %4987 = vmatpush2.bf16.msra.mxu1 %v7367_v34 }
 0xa3f   :  { %6611 = vmatprep.subr.msk.bf16.mxu1 %vm4382_vm5, %v8870_v14 }
 0xab9   :  { %v4786_v14 = vpop.f32.mrf.mxu0 }
 0xabb   :  { %v4788_v53 = vpop.f32.mrf.mxu0 }
 0xabd   :  { %v4789_v42 = vpop.f32.mrf.mxu0 }
 0xabe   :  { %v6656_v42 = vld [vmem:[%s9292_s9] ss:$0 sm:$0xff] }
 0xabf   :  { %v4790_v45 = vpop.f32.mrf.mxu0 }
 0xac1   :  { %v4659_v19 = vpop.f32.mrf.mxu1  ;;  %v5036_v16 = vpop.f32.mrf.mxu0 }
 0xac2   :  { %v9078_v5 = vadd.f32 %v4786_v14, %v4659_v19  ;;  %v5043_v43 = vpack.c.bf16 %v5036_v16, %v5036_v16  ;;  %v7410_v14 = vld [vmem:[%s9293_s10 + $0x34] ss:$8 sps:$4 sm:$0xff]  }
 0xac3   :  { %v4661_v27 = vpop.f32.mrf.mxu1  ;;  %v5038_v28 = vpop.f32.mrf.mxu0 }
 0xac4   :  { %v5044_v4 = vpack.c.bf16 %v5038_v28, %v5038_v28 }
 0xac5   :  { %v4662_v37 = vpop.f32.mrf.mxu1  ;;  %v5040_v26 = vpop.f32.mrf.mxu0 }
 0xac6   :  { %6609 = vmatprep.mubr.msk.bf16.mxu0 %vm4621_vm7, %v5044_v4  ;;  %v7408_v4 = vld [vmem:[%s9293_s10 + $0x30] ss:$8 sps:$4 sm:$0xff]   ;;  %v7413_v26 = vld [vmem:[%s9293_s10 + $0x24] ss:$8 sps:$4 sm:$0xff]  }
 0xac7   :  { %v4663_v57 = vpop.f32.mrf.mxu1  ;;  %5194 = vmatmul.mubr.bf16.vlgmr.msra.gmra.mxu0 %v5043_v43  ;;  %v5041_v20 = vpop.f32.mrf.mxu0 }
 0xac8   :  { %5512 = vmatprep.mubr.bf16.mxu0 %v7487_v1  ;;  %5489 = vmatpush1.bf16.msra.mxu0 %v7396_v50  ;;  %v7411_v57 = vld [vmem:[%s9293_s10 + $0x20] ss:$8 sps:$4 sm:$0xff]   ;;  %v7416_v20 = vld [vmem:[%s9293_s10 + $0x14] ss:$8 sps:$4 sm:$0xff]  }
 0xac9   :  { %v4831_v46 = vpop.f32.mrf.mxu1  ;;  %5490 = vmatprep.subr.bf16.mxu0 %v7401_v41  ;;  %v5610_v41 = vrot.slane %v5605_v7, %v8023_v61  ;;  %v6683_v61 = vld [vmem:[%s9296_s13] ss:$0 sm:$0xff] }
 0xaca   :  { %v4838_v56 = vpack.c.bf16 %v4831_v46, %v4831_v46  ;;  %v7414_v46 = vld [vmem:[%s9293_s10 + $0x10] ss:$8 sps:$4 sm:$0xff]  }
 0xacb   :  { %v4833_v6 = vpop.f32.mrf.mxu1 }
 0xacc   :  { %v4839_v54 = vpack.c.bf16 %v4833_v6, %v4833_v6  ;;  %5491 = vmatpush1.bf16.msra.mxu0 %v7399_v9  ;;  %v7419_v6 = vld [vmem:[%s9293_s10 + $0x4] ss:$8 sps:$4 sm:$0xff]  }
 0xacd   :  { %v4835_v3 = vpop.f32.mrf.mxu1  ;;  %5492 = vmatprep.subr.bf16.mxu0 %v7404_v38 }
 0xace   :  { %6563 = vmatprep.mubr.msk.bf16.mxu1 %vm4621_vm7, %v4839_v54  ;;  %v7420_v54 = vld [vmem:[%s9295_s12 + $0x38] sm:$0xff]   ;;  %v7422_v3 = vld [vmem:[%s9295_s12 + $0x30] sm:$0xff]  }
 0xacf   :  { %4989 = vmatmul.mubr.bf16.vlgmr.msra.gmra.mxu1 %v4838_v56  ;;  %v4836_v15 = vpop.f32.mrf.mxu1  ;;  %v7421_v56 = vld [vmem:[%s9297_s14 + $0x38] sm:$0xff]  }
 0xad0   :  { %5222 = vmatpush1.bf16.msra.mxu1 %v8877_v51  ;;  %5239 = vmatprep.mubr.bf16.mxu1 %v7487_v1  ;;  %v7384_v51 = vld [vmem:[%s9291_s8 + $0x1e8] sm:$0xff]   ;;  %v7423_v15 = vld [vmem:[%s9297_s14 + $0x30] sm:$0xff]  }
 0xad1   :  { %5366 = vmatprep.subr.bf16.mxu1 %v7487_v1  ;;  %5493 = vmatpush1.bf16.msra.mxu0 %v7402_v30 }
 0xad2   :  { %5494 = vmatprep.subr.bf16.mxu0 %v7407_v10 }
 0xad5   :  { %5495 = vmatpush1.bf16.msra.mxu0 %v7405_v62 }
 0xad6   :  { %5572 = vmatprep.subr.bf16.mxu0 %v7410_v14 }
 0xad7   :  { %6612 = vmatmul.mubr.msk.bf16.vlgmr.msra.gmra.mxu1 %vm4378_vm6, %v6610_v49  ;;  %v7424_v49 = vld [vmem:[%s9295_s12 + $0x28] sm:$0xff]  }
 0xad8   :  { %5367 = vmatpush1.bf16.msra.mxu1 %v7382_v36  ;;  %v7425_v36 = vld [vmem:[%s9297_s14 + $0x28] sm:$0xff]  }
 0xad9   :  { %5368 = vmatprep.subr.bf16.mxu1 %v7487_v1 }
 0xadc   :  { %5369 = vmatpush1.bf16.msra.mxu1 %v7383_v29  ;;  %v7426_v29 = vld [vmem:[%s9295_s12 + $0x20] sm:$0xff]  }
 0xadd   :  { %5370 = vmatprep.subr.bf16.mxu1 %v7487_v1 }
 0xae0   :  { %5371 = vmatpush1.bf16.msra.mxu1 %v7384_v51  ;;  %v7427_v51 = vld [vmem:[%s9297_s14 + $0x20] sm:$0xff]  }
 0xae1   :  { %5372 = vmatprep.subr.bf16.mxu1 %v7487_v1 }
 0xae4   :  { %5373 = vmatpush1.bf16.msra.mxu1 %v7385_v47  ;;  %v7428_v47 = vld [vmem:[%s9295_s12 + $0x18] sm:$0xff]  }
 0xae5   :  { %5374 = vmatprep.subr.bf16.mxu1 %v7487_v1 }
 0xae8   :  { %5375 = vmatpush1.bf16.msra.mxu1 %v7386_v63  ;;  %v7429_v63 = vld [vmem:[%s9297_s14 + $0x18] sm:$0xff]  }
 0xae9   :  { %5376 = vmatprep.subr.bf16.mxu1 %v7487_v1 }
 0xaec   :  { %5377 = vmatpush1.bf16.msra.mxu1 %v7387_v44  ;;  %v7430_v44 = vld [vmem:[%s9295_s12 + $0x10] sm:$0xff]  }
 0xaed   :  { %5378 = vmatprep.subr.bf16.mxu1 %v7487_v1 }
 0xaf0   :  { %5379 = vmatpush1.bf16.msra.mxu1 %v7388_v39  ;;  %v7431_v39 = vld [vmem:[%s9297_s14 + $0x10] sm:$0xff]  }
 0xaf1   :  { %5380 = vmatprep.subr.bf16.mxu1 %v7487_v1 }
 0xaf4   :  { %5381 = vmatpush1.bf16.msra.mxu1 %v7389_v59  ;;  %v7432_v59 = vld [vmem:[%s9295_s12 + $0x8] sm:$0xff]  }
 0xaf5   :  { %5386 = vmatprep.subr.bf16.mxu1 %v7487_v1 }
 0xaf8   :  { %5387 = vmatpush2.bf16.msra.mxu1 %v7390_v33  ;;  %v7433_v33 = vld [vmem:[%s9297_s14 + $0x8] sm:$0xff]  }
 0xaf9   :  { %5388 = vmatprep.subr.bf16.mxu1 %v7487_v1 }
 0xafc   :  { %5389 = vmatpush2.bf16.msra.mxu1 %v7391_v60  ;;  %v7434_v60 = vld [vmem:[%s9295_s12] sm:$0xff]  }
 0xafd   :  { %5390 = vmatprep.subr.bf16.mxu1 %v7487_v1 }
 0xb00   :  { %5391 = vmatpush2.bf16.msra.mxu1 %v7392_v0  ;;  %v7435_v0 = vld [vmem:[%s9297_s14] sm:$0xff]   ;;  %s7490_s14 = smov [#allocation6]  }
 0xb01   :  { %5392 = vmatprep.subr.bf16.mxu1 %v7487_v1  ;;  %s5855_s5 = sshll.u32 %s7490_s14, 4  ;;  %s5856_s5 = int_to_ptr.vmem [resolvable:$true] %s5855_s5 }
 0xb02   :  { %s7460_s29 = scalar_lea.vmem %s5856_s5, 32  ;;  %p7465_p6 = scmp.lt.s32.totalorder %s5856_s5, %s5856_s5 }
 0xb03   :  { %p7461_p5 = scmp.ne.s32.totalorder %s5856_s5, %s7460_s29  ;;  %p7466_p7 = scmp.lt.s32.totalorder %s7460_s29, %s7460_s29 }
 0xb04   :  { %5393 = vmatpush2.bf16.msra.mxu1 %v7393_v58 }
 0xb05   :  { %5394 = vmatprep.subr.bf16.mxu1 %v7487_v1  ;;  %p7467_p8 = por %p7466_p7, %p7465_p6 }
 0xb07   :  { %p7468_p9 = pnand %p7467_p8, %p7461_p5 }
 0xb08   :  { %5395 = vmatpush2.bf16.msra.mxu1 %v7394_v35 }
 0xb09   :  { %5396 = vmatprep.subr.bf16.mxu1 %v7487_v1 }
 0xb0c   :  { %5397 = vmatpush2.bf16.msra.mxu1 %v7395_v22 }
 0xb0d   :  { %6789 = vmatprep.subr.bf16.mxu1 %v7488_v11 }
 0xb87   :  { %v5195_v52 = vpop.f32.mrf.mxu0 }
 0xb89   :  { %v5197_v12 = vpop.f32.mrf.mxu0 }
 0xb8b   :  { %v5198_v17 = vpop.f32.mrf.mxu0 }
 0xb8d   :  { %v5199_v13 = vpop.f32.mrf.mxu0 }
 0xb8f   :  { %v4990_v55 = vpop.f32.mrf.mxu1 }
 0xb90   :  { %v4996_v18 = vadd.f32 %v4990_v55, %v9078_v5 }
 0xb91   :  { %v4992_v21 = vpop.f32.mrf.mxu1 }
 0xb92   :  { %v5201_v40 = vadd.f32 %v5195_v52, %v4996_v18 }
 0xb93   :  { %v4993_v23 = vpop.f32.mrf.mxu1 }
 0xb95   :  { %v4994_v25 = vpop.f32.mrf.mxu1 }
 0xb97   :  { %v5241_v8 = vpop.f32.mrf.mxu1 }
 0xb98   :  { %v5248_v48 = vpack.c.bf16 %v5241_v8, %v5241_v8 }
 0xb99   :  { %v5243_v2 = vpop.f32.mrf.mxu1 }
 0xb9a   :  { %v5249_v24 = vpack.c.bf16 %v5243_v2, %v5243_v2  ;;  %v6692_v2 = vld [vmem:[#allocation2] ss:$0 sm:$0xff] }
 0xb9b   :  { %v5245_v34 = vpop.f32.mrf.mxu1 }
 0xb9c   :  { %6655 = vmatprep.mubr.msk.bf16.mxu1 %vm4621_vm7, %v5249_v24 }
 0xb9d   :  { %5399 = vmatmul.mubr.bf16.vlgmr.msra.gmra.mxu1 %v5248_v48  ;;  %v5246_v31 = vpop.f32.mrf.mxu1 }
 0xb9e   :  { %6805 = vmatprep.mubr.msk.bf16.mxu1 %vm7489_vm4, %v7488_v11  ;;  %6790 = vmatpush3.bf16.msra.mxu1 %v7420_v54 }
 0xb9f   :  { %6791 = vmatprep.subr.bf16.mxu1 %v7488_v11 }
 0xba2   :  { %6792 = vmatpush3.bf16.msra.mxu1 %v7422_v3 }
 0xba3   :  { %6793 = vmatprep.subr.bf16.mxu1 %v7488_v11 }
 0xba6   :  { %6794 = vmatpush3.bf16.msra.mxu1 %v7424_v49 }
 0xba7   :  { %6795 = vmatprep.subr.bf16.mxu1 %v7488_v11 }
 0xbaa   :  { %6796 = vmatpush3.bf16.msra.mxu1 %v7426_v29 }
 0xbab   :  { %6797 = vmatprep.subr.bf16.mxu1 %v7488_v11 }
 0xbae   :  { %6798 = vmatpush3.bf16.msra.mxu1 %v7428_v47 }
 0xbaf   :  { %6799 = vmatprep.subr.bf16.mxu1 %v7488_v11 }
 0xbb2   :  { %6800 = vmatpush3.bf16.msra.mxu1 %v7430_v44 }
 0xbb3   :  { %6801 = vmatprep.subr.bf16.mxu1 %v7488_v11 }
 0xbb6   :  { %6802 = vmatpush3.bf16.msra.mxu1 %v7432_v59 }
 0xbb7   :  { %6803 = vmatprep.subr.bf16.mxu1 %v7488_v11 }
 0xbba   :  { %6804 = vmatpush3.bf16.msra.mxu1 %v7434_v60 }
 0xc5d   :  { %v5400_v53 = vpop.f32.mrf.mxu1 }
 0xc5e   :  { %v5406_v45 = vadd.f32 %v5400_v53, %v5201_v40 }
 0xc5f   :  { %v5402_v19 = vpop.f32.mrf.mxu1 }
 0xc60   :  { %v5414_v16 = vadd.f32 %v6656_v42, %v5406_v45 }
 0xc61   :  { %v5403_v5 = vpop.f32.mrf.mxu1 }
 0xc62   :  { %v5415_v27 = vmax.f32 %v5414_v16, 0.0 }
 0xc63   :  { %v5404_v43 = vpop.f32.mrf.mxu1 }
 0xc64   :  { %v5416_v28 = vpack.c.bf16 %v5415_v27, %v5415_v27 }
 0xc66   :  { %v5435_v37 = vrot.slane %v5416_v28, 1 }
 0xc68   :  { %6673 = vmatmul.mubr.msk.bf16.vlgmr.msra.gmra.mxu0 %vm5476_vm8, %v5435_v37 }
 0xc69   :  { %5573 = vmatpush1.bf16.msra.mxu0 %v7408_v4  ;;  %5596 = vmatprep.mubr.bf16.mxu0 %v7487_v1  ;;  %v7417_v1 = vld [vmem:[%s9293_s10] ss:$8 sps:$4 sm:$0xff]  }
 0xc6a   :  { %5574 = vmatprep.subr.bf16.mxu0 %v7413_v26 }
 0xc6d   :  { %5575 = vmatpush1.bf16.msra.mxu0 %v7411_v57 }
 0xc6e   :  { %5576 = vmatprep.subr.bf16.mxu0 %v7416_v20 }
 0xc71   :  { %5577 = vmatpush1.bf16.msra.mxu0 %v7414_v46 }
 0xc72   :  { %5578 = vmatprep.subr.bf16.mxu0 %v7419_v6 }
 0xc75   :  { %5579 = vmatpush1.bf16.msra.mxu0 %v7417_v1 }
 0xc76   :  { %6809 = vmatprep.subr.bf16.mxu0 %v7488_v11 }
 0xc78   :  { %6682 = vmatmul.mubr.msk.bf16.vlgmr.msra.gmra.mxu0 %vm5476_vm8, %v5416_v28 }
 0xc79   :  { %6825 = vmatprep.mubr.msk.bf16.mxu0 %vm7489_vm4, %v7488_v11  ;;  %6810 = vmatpush3.bf16.msra.mxu0 %v7421_v56 }
 0xc7a   :  { %6811 = vmatprep.subr.bf16.mxu0 %v7488_v11 }
 0xc7d   :  { %6812 = vmatpush3.bf16.msra.mxu0 %v7423_v15 }
 0xc7e   :  { %6813 = vmatprep.subr.bf16.mxu0 %v7488_v11 }
 0xc81   :  { %6814 = vmatpush3.bf16.msra.mxu0 %v7425_v36 }
 0xc82   :  { %6815 = vmatprep.subr.bf16.mxu0 %v7488_v11 }
 0xc85   :  { %6816 = vmatpush3.bf16.msra.mxu0 %v7427_v51 }
 0xc86   :  { %6817 = vmatprep.subr.bf16.mxu0 %v7488_v11 }
 0xc89   :  { %6818 = vmatpush3.bf16.msra.mxu0 %v7429_v63 }
 0xc8a   :  { %6819 = vmatprep.subr.bf16.mxu0 %v7488_v11 }
 0xc8d   :  { %6820 = vmatpush3.bf16.msra.mxu0 %v7431_v39 }
 0xc8e   :  { %6821 = vmatprep.subr.bf16.mxu0 %v7488_v11 }
 0xc91   :  { %6822 = vmatpush3.bf16.msra.mxu0 %v7433_v33 }
 0xc92   :  { %6823 = vmatprep.subr.bf16.mxu0 %v7488_v11  ;;  %v5614_v11 = vrot.slane %v5605_v7, %v8028_v32 }
 0xc95   :  { %6824 = vmatpush3.bf16.msra.mxu0 %v7435_v0 }
 0xd28   :  { %v5514_v58 = vpop.f32.mrf.mxu0 }
 0xd2a   :  { %v5516_v35 = vpop.f32.mrf.mxu0 }
 0xd2c   :  { %v5518_v22 = vpop.f32.mrf.mxu0 }
 0xd2e   :  { %v5519_v50 = vpop.f32.mrf.mxu0 }
 0xd38   :  { %v5598_v9 = vpop.f32.mrf.mxu0 }
 0xd39   :  { %v5599_v52 = vadd.f32 %v5598_v9, %v5514_v58 }
 0xd3a   :  { %v5600_v12 = vpop.f32.mrf.mxu0 }
 0xd3b   :  { %v5617_v17 = vadd.f32 %v5610_v41, %v5599_v52  ;;  %v5601_v13 = vadd.f32 %v5600_v12, %v5516_v35 }
 0xd3c   :  { %v5602_v55 = vpop.f32.mrf.mxu0 }
 0xd3d   :  { %7436 = vtanh.f32 %v5617_v17  ;;  %v5618_v18 = vadd.f32 %v5614_v11, %v5601_v13 }
 0xd3e   :  { %v5603_v21 = vpop.f32.mrf.mxu0 }
 0xd3f   :  { %7438 = vtanh.f32 %v5618_v18 }
 0xd4a   :  { %v7437_v40 = vpop.eup %7436 }
 0xd4b   :  { %v5621_v23 = vpack.c.bf16 %v7437_v40, %v7437_v40 }
 0xd4c   :  { %v7439_v25 = vpop.eup %7438 }
 0xd4d   :  { %v5622_v8 = vpack.c.bf16 %v7439_v25, %v7439_v25  ;;  %6806 = vmatmul.mubr.bf16.vlgmr.msra.gmra.mxu1 %v5621_v23 }
 0xd4f   :  { %6826 = vmatmul.mubr.bf16.vlgmr.msra.gmra.mxu0 %v5622_v8 }
 0xe0d   :  { %v5728_v32 = vpop.f32.mrf.mxu1 }
 0xe0e   :  { %v5729_v24 = vadd.f32 %v6683_v61, %v5728_v32 }
 0xe0f   :  { %v6807_v48 = vpop.f32.mrf.mxu1  ;;  %v5841_v34 = vpop.f32.mrf.mxu0 }
 0xe10   :  { %v5842_v31 = vadd.f32 %v6692_v2, %v5841_v34  ;;  %5735 = vst.msk [vmem:[#allocation6] sm:$0x3] %vm5734_vm9, %v5729_v24 }
 0xe11   :  { %v5731_v38 = vpop.f32.mrf.mxu1  ;;  %v6827_v30 = vpop.f32.mrf.mxu0 }
 0xe12   :  { %7471 = shalt.err (!%p7468_p9)
}
 0xe13   :  { %5858 = dma.vmem_to_hbm [thread:$0]  %s5856_s5, 32, %s9299_s16, [#allocation5]   ;;  %5848 = vst.msk [vmem:[%s9300_s17] sm:$0x3] %vm5847_vm10, %v5842_v31  ;;  %v6808_v10 = vpop.f32.mrf.mxu1  ;;  %v5844_v62 = vpop.f32.mrf.mxu0 }
 0xe15   :  { %v6828_v14 = vpop.f32.mrf.mxu0 }
 0xe16   :  { %7482 = dma.done.wait [#allocation5], 32  }
 0xe17   :  { %7483 = vsyncadd [#allocation5], 4294967264 }
 0xe18   :  { %5866 = vsyncpa [#allocation4], 1 }
 0xe19   :  { %5867 = vsyncpa [#allocation5], 1 }

</bundles_post_ra>
